<compile_context>
chip_gen: v7x
topology: tpu7x:2x2x1
jax: 0.10.0
libtpu: 0.0.40
codegen_flags: <defaults>
</compile_context>

<pallas_src>
import jax
import jax.numpy as jnp
from jax.experimental import pallas as pl

# ----------------------------- model config ---------------------------------
B = 2          # batch
C = 3          # input channels
IMG = 16       # H = W
PATCH = 4      # patch size -> 4x4 = 16 patches
D = 32         # embed dim
HEADS = 4      # attention heads
HEAD_DIM = D // HEADS
DEPTH = 2      # transformer blocks
MLP_HIDDEN = 4 * D
N_PATCH = (IMG // PATCH) ** 2
SEQ = N_PATCH + 1              # + cls token
ROWS = B * SEQ                 # batch stacked on the M axis inside the kernel
PATCH_DIM = C * PATCH * PATCH
LN_EPS = 1e-6                  # timm ViT LayerNorm eps
NEG_INF = -1e30                # additive mask value (finite: avoids inf-inf)


# ----------------------------- fused Pallas kernel ---------------------------
def _vit_fused_kernel(
    patches_ref, pw_ref, posadd_ref, mask_ref,
    ln1g_ref, ln1b_ref,
    qkvw_ref, qkvb_ref, projw_ref, projb_ref,
    ln2g_ref, ln2b_ref,
    fc1w_ref, fc1b_ref, fc2w_ref, fc2b_ref,
    ng_ref, nb_ref,
    out_ref,
):
    f32 = jnp.float32
    bf16 = jnp.bfloat16

    def mm(a, b):
        # bf16 MXU operands, fp32 accumulation.
        return jnp.dot(a, b, preferred_element_type=f32)

    def layernorm(x, g, b):
        mean = jnp.mean(x, axis=-1, keepdims=True)
        xc = x - mean
        var = jnp.mean(xc * xc, axis=-1, keepdims=True)
        return xc * jax.lax.rsqrt(var + LN_EPS) * g + b

    mask = mask_ref[...]                  # (ROWS, ROWS) fp32: 0 within batch, -1e30 across
    scale = HEAD_DIM ** -0.5

    # Patch embed + cls token + pos embed.  The cls rows of `patches` are zero,
    # so their embedding is 0; cls token + conv bias are folded into posadd.
    x = mm(patches_ref[...], pw_ref[...]) + posadd_ref[...]        # (ROWS, D) fp32

    for d in range(DEPTH):                                         # DEPTH = 2, unrolled
        # ------------- attention branch (pre-LN) -------------
        h = layernorm(x, ln1g_ref[d], ln1b_ref[d])                 # (ROWS, D)
        qkv = mm(h.astype(bf16), qkvw_ref[d]) + qkvb_ref[d]        # (ROWS, 3D) fp32
        qkv_b16 = qkv.astype(bf16)                                 # hoisted cast
        pw_d = projw_ref[d]                                        # (D, D) bf16

        attn = None
        for hd in range(HEADS):                                    # HEADS = 4, unrolled
            off = hd * HEAD_DIM
            qh = qkv_b16[:, 0 * D + off: 0 * D + off + HEAD_DIM]   # (ROWS, HD)
            kh = qkv_b16[:, 1 * D + off: 1 * D + off + HEAD_DIM]
            vh = qkv_b16[:, 2 * D + off: 2 * D + off + HEAD_DIM]
            s = jax.lax.dot_general(
                qh, kh, (((1,), (1,)), ((), ())),
                preferred_element_type=f32) * scale + mask         # (ROWS, ROWS)
            s = s - jnp.max(s, axis=-1, keepdims=True)             # stable softmax (fp32)
            p = jnp.exp(s)
            p = p * pl.reciprocal(jnp.sum(p, axis=-1, keepdims=True), approx=True)
            o = mm(p.astype(bf16), vh)                             # (ROWS, HD) fp32
            # per-head rows of the lane-dense proj weight (sublane-aligned slice)
            contrib = mm(o.astype(bf16), pw_d[off:off + HEAD_DIM, :])   # (ROWS, D)
            attn = contrib if attn is None else attn + contrib
        x = x + attn + projb_ref[d]                                # residual + proj bias

        # ------------- MLP branch (pre-LN) -------------
        h = layernorm(x, ln2g_ref[d], ln2b_ref[d])                 # (ROWS, D)
        h1 = mm(h.astype(bf16), fc1w_ref[d]) + fc1b_ref[d]         # (ROWS, MLP_HIDDEN)
        # exact (erf) GELU, fp32, matching torch.nn.GELU() default
        h1 = 0.5 * h1 * (1.0 + jax.lax.erf(h1 * 0.7071067811865476))
        x = x + mm(h1.astype(bf16), fc2w_ref[d]) + fc2b_ref[d]     # residual

    # Final LayerNorm (row-wise); cls rows are extracted in the wrapper.
    out_ref[...] = layernorm(x, ng_ref[...], nb_ref[...])


# ----------------------------- one-time param packing ------------------------
def pack_params(params):
    """Done once at init: stacks blocks, folds cls/pos/bias, casts weights to bf16."""
    bf16 = jnp.bfloat16
    blocks = params["blocks"]
    stack = lambda name: jnp.stack([blk[name] for blk in blocks], axis=0)

    pos = params["pos_embed"][0]                                   # (SEQ, D)
    pos_add = jnp.concatenate(
        [params["cls_token"].reshape(1, D) + pos[0:1],
         pos[1:] + params["patch_b"].reshape(1, D)], axis=0)       # (SEQ, D)
    pos_add = jnp.tile(pos_add, (B, 1)).astype(jnp.float32)        # (ROWS, D)

    # Block-diagonal additive mask: 0 within a batch element, -1e30 across.
    row_batch = jnp.repeat(jnp.arange(B), SEQ)
    mask = jnp.where(row_batch[:, None] == row_batch[None, :],
                     0.0, NEG_INF).astype(jnp.float32)             # (ROWS, ROWS)

    return {
        "patch_w": params["patch_w"].astype(bf16),                 # (PATCH_DIM, D)
        "pos_add": pos_add,
        "mask": mask,
        "ln1_g": stack("ln1_g").reshape(DEPTH, 1, D),
        "ln1_b": stack("ln1_b").reshape(DEPTH, 1, D),
        "qkv_w": stack("qkv_w").astype(bf16),                      # (DEPTH, D, 3D)
        "qkv_b": stack("qkv_b").reshape(DEPTH, 1, 3 * D),
        "proj_w": stack("proj_w").astype(bf16),                    # (DEPTH, D, D)
        "proj_b": stack("proj_b").reshape(DEPTH, 1, D),
        "ln2_g": stack("ln2_g").reshape(DEPTH, 1, D),
        "ln2_b": stack("ln2_b").reshape(DEPTH, 1, D),
        "fc1_w": stack("fc1_w").astype(bf16),                      # (DEPTH, D, MLP_HIDDEN)
        "fc1_b": stack("fc1_b").reshape(DEPTH, 1, MLP_HIDDEN),
        "fc2_w": stack("fc2_w").astype(bf16),                      # (DEPTH, MLP_HIDDEN, D)
        "fc2_b": stack("fc2_b").reshape(DEPTH, 1, D),
        "norm_g": params["norm_g"].reshape(1, D),
        "norm_b": params["norm_b"].reshape(1, D),
    }


# ----------------------------- wrapper ---------------------------------------
def vit_forward(x, pk):
    """Equivalent of CustomVisionTransformer.forward: returns x[:, 0] of shape (B, D)."""
    b, c, hgt, wdt = x.shape
    gh, gw = hgt // PATCH, wdt // PATCH

    # conv(p x p, stride p) == flatten non-overlapping patches (C, ph, pw order)
    # + a single linear projection (done on the MXU inside the kernel).
    patches = (
        x.reshape(b, c, gh, PATCH, gw, PATCH)
        .transpose(0, 2, 4, 1, 3, 5)
        .reshape(b, gh * gw, PATCH_DIM)
    )
    # Prepend one zero "patch" row per batch: its embedding is exactly 0, so the
    # cls token enters through the additive pos term instead (no in-kernel concat).
    patches = jnp.concatenate(
        [jnp.zeros((b, 1, PATCH_DIM), patches.dtype), patches], axis=1)
    patches = patches.reshape(b * SEQ, PATCH_DIM).astype(jnp.bfloat16)

    out = pl.pallas_call(
        _vit_fused_kernel,
        out_shape=jax.ShapeDtypeStruct((b * SEQ, D), jnp.float32),
    )(patches, pk["patch_w"], pk["pos_add"], pk["mask"],
      pk["ln1_g"], pk["ln1_b"],
      pk["qkv_w"], pk["qkv_b"], pk["proj_w"], pk["proj_b"],
      pk["ln2_g"], pk["ln2_b"],
      pk["fc1_w"], pk["fc1_b"], pk["fc2_w"], pk["fc2_b"],
      pk["norm_g"], pk["norm_b"])

    # cls token of each batch element (rows 0, SEQ, 2*SEQ, ...)
    return out.reshape(b, SEQ, D)[:, 0]


# ----------------------------- deterministic params --------------------------
def init_params(key):
    def nrm(k, shape, scale=0.02):
        return scale * jax.random.normal(k, shape, jnp.float32)

    keys = jax.random.split(key, 3 + DEPTH)
    params = {
        "patch_w": nrm(keys[0], (PATCH_DIM, D)),
        "patch_b": jnp.zeros((D,), jnp.float32),
        "cls_token": nrm(keys[1], (1, 1, D)),
        "pos_embed": nrm(keys[2], (1, SEQ, D)),
        "norm_g": jnp.ones((D,), jnp.float32),
        "norm_b": jnp.zeros((D,), jnp.float32),
        "blocks": [],
    }
    for i in range(DEPTH):
        bk = jax.random.split(keys[3 + i], 4)
        params["blocks"].append(
            {
                "ln1_g": jnp.ones((D,), jnp.float32),
                "ln1_b": jnp.zeros((D,), jnp.float32),
                "qkv_w": nrm(bk[0], (D, 3 * D)),
                "qkv_b": jnp.zeros((3 * D,), jnp.float32),
                "proj_w": nrm(bk[1], (D, D)),
                "proj_b": jnp.zeros((D,), jnp.float32),
                "ln2_g": jnp.ones((D,), jnp.float32),
                "ln2_b": jnp.zeros((D,), jnp.float32),
                "fc1_w": nrm(bk[2], (D, MLP_HIDDEN)),
                "fc1_b": jnp.zeros((MLP_HIDDEN,), jnp.float32),
                "fc2_w": nrm(bk[3], (MLP_HIDDEN, D)),
                "fc2_b": jnp.zeros((D,), jnp.float32),
            }
        )
    return params


# ----------------------------- main -------------------------------------------
if __name__ == "__main__":
    root = jax.random.PRNGKey(0)
    k_params, k_x = jax.random.split(root)
    params = init_params(k_params)
    packed = pack_params(params)          # one-time packing, NOT in the per-call path
    x = jax.random.normal(k_x, (B, C, IMG, IMG), jnp.float32)  # NCHW like PyTorch

    fwd = jax.jit(vit_forward)
    out = jax.block_until_ready(fwd(x, packed))

    assert out.shape == (B, D), out.shape
    assert jnp.all(jnp.isfinite(out))
    print("KERNEL_OK")
</pallas_src>

<mosaic_0001>
module attributes {stable_mosaic.version = 11 : i64} {
  func.func @_vit_fused_kernel(%arg0: memref<34x48xbf16, #tpu.memory_space<vmem>>, %arg1: memref<48x32xbf16, #tpu.memory_space<vmem>>, %arg2: memref<34x32xf32, #tpu.memory_space<vmem>>, %arg3: memref<34x34xf32, #tpu.memory_space<vmem>>, %arg4: memref<2x1x32xf32, #tpu.memory_space<vmem>>, %arg5: memref<2x1x32xf32, #tpu.memory_space<vmem>>, %arg6: memref<2x32x96xbf16, #tpu.memory_space<vmem>>, %arg7: memref<2x1x96xf32, #tpu.memory_space<vmem>>, %arg8: memref<2x32x32xbf16, #tpu.memory_space<vmem>>, %arg9: memref<2x1x32xf32, #tpu.memory_space<vmem>>, %arg10: memref<2x1x32xf32, #tpu.memory_space<vmem>>, %arg11: memref<2x1x32xf32, #tpu.memory_space<vmem>>, %arg12: memref<2x32x128xbf16, #tpu.memory_space<vmem>>, %arg13: memref<2x1x128xf32, #tpu.memory_space<vmem>>, %arg14: memref<2x128x32xbf16, #tpu.memory_space<vmem>>, %arg15: memref<2x1x32xf32, #tpu.memory_space<vmem>>, %arg16: memref<1x32xf32, #tpu.memory_space<vmem>>, %arg17: memref<1x32xf32, #tpu.memory_space<vmem>>, %arg18: memref<34x32xf32, #tpu.memory_space<vmem>>) attributes {dimension_semantics = [], scalar_prefetch = 0 : i64, scratch_operands = 0 : i64, tpu.core_type = #tpu.core_type<tc>} {
    %c0 = arith.constant 0 : index
    %c0_0 = arith.constant 0 : index
    %0 = vector.load %arg3[%c0, %c0_0] : memref<34x34xf32, #tpu.memory_space<vmem>>, vector<34x34xf32>
    %c0_1 = arith.constant 0 : index
    %c0_2 = arith.constant 0 : index
    %1 = vector.load %arg0[%c0_1, %c0_2] : memref<34x48xbf16, #tpu.memory_space<vmem>>, vector<34x48xbf16>
    %c0_3 = arith.constant 0 : index
    %c0_4 = arith.constant 0 : index
    %2 = vector.load %arg1[%c0_3, %c0_4] : memref<48x32xbf16, #tpu.memory_space<vmem>>, vector<48x32xbf16>
    %cst = arith.constant dense<0.000000e+00> : vector<34x32xf32>
    %3 = tpu.matmul %1, %2, %cst {dimension_numbers = #tpu.dot_dimension_numbers<[1], [0], [0], [1], [0, 0, 1, 1], [], []>} : vector<34x48xbf16>, vector<48x32xbf16>, vector<34x32xf32> -> vector<34x32xf32>
    %c0_5 = arith.constant 0 : index
    %c0_6 = arith.constant 0 : index
    %4 = vector.load %arg2[%c0_5, %c0_6] : memref<34x32xf32, #tpu.memory_space<vmem>>, vector<34x32xf32>
    %5 = arith.addf %3, %4 : vector<34x32xf32>
    %c0_7 = arith.constant 0 : index
    %c0_8 = arith.constant 0 : index
    %c0_9 = arith.constant 0 : index
    %6 = vector.load %arg4[%c0_7, %c0_8, %c0_9] : memref<2x1x32xf32, #tpu.memory_space<vmem>>, vector<1x1x32xf32>
    %7 = vector.shape_cast %6 : vector<1x1x32xf32> to vector<1x32xf32>
    %c0_10 = arith.constant 0 : index
    %c0_11 = arith.constant 0 : index
    %c0_12 = arith.constant 0 : index
    %8 = vector.load %arg5[%c0_10, %c0_11, %c0_12] : memref<2x1x32xf32, #tpu.memory_space<vmem>>, vector<1x1x32xf32>
    %9 = vector.shape_cast %8 : vector<1x1x32xf32> to vector<1x32xf32>
    %cst_13 = arith.constant dense<0.000000e+00> : vector<34xf32>
    %10 = vector.multi_reduction <add>, %5, %cst_13 [1] : vector<34x32xf32> to vector<34xf32>
    %11 = vector.shape_cast %10 : vector<34xf32> to vector<34x1xf32>
    %cst_14 = arith.constant 3.200000e+01 : f32
    %12 = vector.broadcast %cst_14 : f32 to vector<34x1xf32>
    %13 = arith.divf %11, %12 : vector<34x1xf32>
    %14 = vector.broadcast %13 : vector<34x1xf32> to vector<34x32xf32>
    %15 = arith.subf %5, %14 : vector<34x32xf32>
    %16 = arith.mulf %15, %15 : vector<34x32xf32>
    %cst_15 = arith.constant dense<0.000000e+00> : vector<34xf32>
    %17 = vector.multi_reduction <add>, %16, %cst_15 [1] : vector<34x32xf32> to vector<34xf32>
    %18 = vector.shape_cast %17 : vector<34xf32> to vector<34x1xf32>
    %cst_16 = arith.constant 3.200000e+01 : f32
    %19 = vector.broadcast %cst_16 : f32 to vector<34x1xf32>
    %20 = arith.divf %18, %19 : vector<34x1xf32>
    %cst_17 = arith.constant 9.99999997E-7 : f32
    %21 = vector.broadcast %cst_17 : f32 to vector<34x1xf32>
    %22 = arith.addf %20, %21 : vector<34x1xf32>
    %23 = math.rsqrt %22 : vector<34x1xf32>
    %24 = vector.broadcast %23 : vector<34x1xf32> to vector<34x32xf32>
    %25 = arith.mulf %15, %24 : vector<34x32xf32>
    %26 = vector.broadcast %7 : vector<1x32xf32> to vector<34x32xf32>
    %27 = arith.mulf %25, %26 : vector<34x32xf32>
    %28 = vector.broadcast %9 : vector<1x32xf32> to vector<34x32xf32>
    %29 = arith.addf %27, %28 : vector<34x32xf32>
    %30 = arith.truncf %29 : vector<34x32xf32> to vector<34x32xbf16>
    %c0_18 = arith.constant 0 : index
    %c0_19 = arith.constant 0 : index
    %c0_20 = arith.constant 0 : index
    %31 = vector.load %arg6[%c0_18, %c0_19, %c0_20] : memref<2x32x96xbf16, #tpu.memory_space<vmem>>, vector<1x32x96xbf16>
    %32 = vector.shape_cast %31 : vector<1x32x96xbf16> to vector<32x96xbf16>
    %cst_21 = arith.constant dense<0.000000e+00> : vector<34x96xf32>
    %33 = tpu.matmul %30, %32, %cst_21 {dimension_numbers = #tpu.dot_dimension_numbers<[1], [0], [0], [1], [0, 0, 1, 1], [], []>} : vector<34x32xbf16>, vector<32x96xbf16>, vector<34x96xf32> -> vector<34x96xf32>
    %c0_22 = arith.constant 0 : index
    %c0_23 = arith.constant 0 : index
    %c0_24 = arith.constant 0 : index
    %34 = vector.load %arg7[%c0_22, %c0_23, %c0_24] : memref<2x1x96xf32, #tpu.memory_space<vmem>>, vector<1x1x96xf32>
    %35 = vector.shape_cast %34 : vector<1x1x96xf32> to vector<1x96xf32>
    %36 = vector.broadcast %35 : vector<1x96xf32> to vector<34x96xf32>
    %37 = arith.addf %33, %36 : vector<34x96xf32>
    %38 = arith.truncf %37 : vector<34x96xf32> to vector<34x96xbf16>
    %c0_25 = arith.constant 0 : index
    %c0_26 = arith.constant 0 : index
    %c0_27 = arith.constant 0 : index
    %39 = vector.load %arg8[%c0_25, %c0_26, %c0_27] : memref<2x32x32xbf16, #tpu.memory_space<vmem>>, vector<1x32x32xbf16>
    %40 = vector.shape_cast %39 : vector<1x32x32xbf16> to vector<32x32xbf16>
    %41 = vector.extract_strided_slice %38 {offsets = [0, 0], sizes = [34, 8], strides = [1, 1]} : vector<34x96xbf16> to vector<34x8xbf16>
    %42 = vector.extract_strided_slice %38 {offsets = [0, 32], sizes = [34, 8], strides = [1, 1]} : vector<34x96xbf16> to vector<34x8xbf16>
    %43 = vector.extract_strided_slice %38 {offsets = [0, 64], sizes = [34, 8], strides = [1, 1]} : vector<34x96xbf16> to vector<34x8xbf16>
    %cst_28 = arith.constant dense<0.000000e+00> : vector<34x34xf32>
    %44 = tpu.matmul %41, %42, %cst_28 {dimension_numbers = #tpu.dot_dimension_numbers<[1], [1], [0], [0], [0, 0, 1, 0], [], []>} : vector<34x8xbf16>, vector<34x8xbf16>, vector<34x34xf32> -> vector<34x34xf32>
    %cst_29 = arith.constant 0.353553385 : f32
    %45 = vector.broadcast %cst_29 : f32 to vector<34x34xf32>
    %46 = arith.mulf %44, %45 : vector<34x34xf32>
    %47 = arith.addf %46, %0 : vector<34x34xf32>
    %cst_30 = arith.constant dense<0xFF800000> : vector<34xf32>
    %48 = vector.multi_reduction <maximumf>, %47, %cst_30 [1] : vector<34x34xf32> to vector<34xf32>
    %49 = vector.shape_cast %48 : vector<34xf32> to vector<34x1xf32>
    %50 = vector.broadcast %49 : vector<34x1xf32> to vector<34x34xf32>
    %51 = arith.subf %47, %50 : vector<34x34xf32>
    %52 = math.exp %51 : vector<34x34xf32>
    %cst_31 = arith.constant dense<0.000000e+00> : vector<34xf32>
    %53 = vector.multi_reduction <add>, %52, %cst_31 [1] : vector<34x34xf32> to vector<34xf32>
    %54 = vector.shape_cast %53 : vector<34xf32> to vector<34x1xf32>
    %55 = tpu.reciprocal %54 {approx = true} : vector<34x1xf32> -> vector<34x1xf32>
    %56 = vector.broadcast %55 : vector<34x1xf32> to vector<34x34xf32>
    %57 = arith.mulf %52, %56 : vector<34x34xf32>
    %58 = arith.truncf %57 : vector<34x34xf32> to vector<34x34xbf16>
    %cst_32 = arith.constant dense<0.000000e+00> : vector<34x8xf32>
    %59 = tpu.matmul %58, %43, %cst_32 {dimension_numbers = #tpu.dot_dimension_numbers<[1], [0], [0], [1], [0, 0, 1, 1], [], []>} : vector<34x34xbf16>, vector<34x8xbf16>, vector<34x8xf32> -> vector<34x8xf32>
    %60 = arith.truncf %59 : vector<34x8xf32> to vector<34x8xbf16>
    %61 = vector.extract_strided_slice %40 {offsets = [0, 0], sizes = [8, 32], strides = [1, 1]} : vector<32x32xbf16> to vector<8x32xbf16>
    %cst_33 = arith.constant dense<0.000000e+00> : vector<34x32xf32>
    %62 = tpu.matmul %60, %61, %cst_33 {dimension_numbers = #tpu.dot_dimension_numbers<[1], [0], [0], [1], [0, 0, 1, 1], [], []>} : vector<34x8xbf16>, vector<8x32xbf16>, vector<34x32xf32> -> vector<34x32xf32>
    %63 = vector.extract_strided_slice %38 {offsets = [0, 8], sizes = [34, 8], strides = [1, 1]} : vector<34x96xbf16> to vector<34x8xbf16>
    %64 = vector.extract_strided_slice %38 {offsets = [0, 40], sizes = [34, 8], strides = [1, 1]} : vector<34x96xbf16> to vector<34x8xbf16>
    %65 = vector.extract_strided_slice %38 {offsets = [0, 72], sizes = [34, 8], strides = [1, 1]} : vector<34x96xbf16> to vector<34x8xbf16>
    %cst_34 = arith.constant dense<0.000000e+00> : vector<34x34xf32>
    %66 = tpu.matmul %63, %64, %cst_34 {dimension_numbers = #tpu.dot_dimension_numbers<[1], [1], [0], [0], [0, 0, 1, 0], [], []>} : vector<34x8xbf16>, vector<34x8xbf16>, vector<34x34xf32> -> vector<34x34xf32>
    %cst_35 = arith.constant 0.353553385 : f32
    %67 = vector.broadcast %cst_35 : f32 to vector<34x34xf32>
    %68 = arith.mulf %66, %67 : vector<34x34xf32>
    %69 = arith.addf %68, %0 : vector<34x34xf32>
    %cst_36 = arith.constant dense<0xFF800000> : vector<34xf32>
    %70 = vector.multi_reduction <maximumf>, %69, %cst_36 [1] : vector<34x34xf32> to vector<34xf32>
    %71 = vector.shape_cast %70 : vector<34xf32> to vector<34x1xf32>
    %72 = vector.broadcast %71 : vector<34x1xf32> to vector<34x34xf32>
    %73 = arith.subf %69, %72 : vector<34x34xf32>
    %74 = math.exp %73 : vector<34x34xf32>
    %cst_37 = arith.constant dense<0.000000e+00> : vector<34xf32>
    %75 = vector.multi_reduction <add>, %74, %cst_37 [1] : vector<34x34xf32> to vector<34xf32>
    %76 = vector.shape_cast %75 : vector<34xf32> to vector<34x1xf32>
    %77 = tpu.reciprocal %76 {approx = true} : vector<34x1xf32> -> vector<34x1xf32>
    %78 = vector.broadcast %77 : vector<34x1xf32> to vector<34x34xf32>
    %79 = arith.mulf %74, %78 : vector<34x34xf32>
    %80 = arith.truncf %79 : vector<34x34xf32> to vector<34x34xbf16>
    %cst_38 = arith.constant dense<0.000000e+00> : vector<34x8xf32>
    %81 = tpu.matmul %80, %65, %cst_38 {dimension_numbers = #tpu.dot_dimension_numbers<[1], [0], [0], [1], [0, 0, 1, 1], [], []>} : vector<34x34xbf16>, vector<34x8xbf16>, vector<34x8xf32> -> vector<34x8xf32>
    %82 = arith.truncf %81 : vector<34x8xf32> to vector<34x8xbf16>
    %83 = vector.extract_strided_slice %40 {offsets = [8, 0], sizes = [8, 32], strides = [1, 1]} : vector<32x32xbf16> to vector<8x32xbf16>
    %cst_39 = arith.constant dense<0.000000e+00> : vector<34x32xf32>
    %84 = tpu.matmul %82, %83, %cst_39 {dimension_numbers = #tpu.dot_dimension_numbers<[1], [0], [0], [1], [0, 0, 1, 1], [], []>} : vector<34x8xbf16>, vector<8x32xbf16>, vector<34x32xf32> -> vector<34x32xf32>
    %85 = arith.addf %62, %84 : vector<34x32xf32>
    %86 = vector.extract_strided_slice %38 {offsets = [0, 16], sizes = [34, 8], strides = [1, 1]} : vector<34x96xbf16> to vector<34x8xbf16>
    %87 = vector.extract_strided_slice %38 {offsets = [0, 48], sizes = [34, 8], strides = [1, 1]} : vector<34x96xbf16> to vector<34x8xbf16>
    %88 = vector.extract_strided_slice %38 {offsets = [0, 80], sizes = [34, 8], strides = [1, 1]} : vector<34x96xbf16> to vector<34x8xbf16>
    %cst_40 = arith.constant dense<0.000000e+00> : vector<34x34xf32>
    %89 = tpu.matmul %86, %87, %cst_40 {dimension_numbers = #tpu.dot_dimension_numbers<[1], [1], [0], [0], [0, 0, 1, 0], [], []>} : vector<34x8xbf16>, vector<34x8xbf16>, vector<34x34xf32> -> vector<34x34xf32>
    %cst_41 = arith.constant 0.353553385 : f32
    %90 = vector.broadcast %cst_41 : f32 to vector<34x34xf32>
    %91 = arith.mulf %89, %90 : vector<34x34xf32>
    %92 = arith.addf %91, %0 : vector<34x34xf32>
    %cst_42 = arith.constant dense<0xFF800000> : vector<34xf32>
    %93 = vector.multi_reduction <maximumf>, %92, %cst_42 [1] : vector<34x34xf32> to vector<34xf32>
    %94 = vector.shape_cast %93 : vector<34xf32> to vector<34x1xf32>
    %95 = vector.broadcast %94 : vector<34x1xf32> to vector<34x34xf32>
    %96 = arith.subf %92, %95 : vector<34x34xf32>
    %97 = math.exp %96 : vector<34x34xf32>
    %cst_43 = arith.constant dense<0.000000e+00> : vector<34xf32>
    %98 = vector.multi_reduction <add>, %97, %cst_43 [1] : vector<34x34xf32> to vector<34xf32>
    %99 = vector.shape_cast %98 : vector<34xf32> to vector<34x1xf32>
    %100 = tpu.reciprocal %99 {approx = true} : vector<34x1xf32> -> vector<34x1xf32>
    %101 = vector.broadcast %100 : vector<34x1xf32> to vector<34x34xf32>
    %102 = arith.mulf %97, %101 : vector<34x34xf32>
    %103 = arith.truncf %102 : vector<34x34xf32> to vector<34x34xbf16>
    %cst_44 = arith.constant dense<0.000000e+00> : vector<34x8xf32>
    %104 = tpu.matmul %103, %88, %cst_44 {dimension_numbers = #tpu.dot_dimension_numbers<[1], [0], [0], [1], [0, 0, 1, 1], [], []>} : vector<34x34xbf16>, vector<34x8xbf16>, vector<34x8xf32> -> vector<34x8xf32>
    %105 = arith.truncf %104 : vector<34x8xf32> to vector<34x8xbf16>
    %106 = vector.extract_strided_slice %40 {offsets = [16, 0], sizes = [8, 32], strides = [1, 1]} : vector<32x32xbf16> to vector<8x32xbf16>
    %cst_45 = arith.constant dense<0.000000e+00> : vector<34x32xf32>
    %107 = tpu.matmul %105, %106, %cst_45 {dimension_numbers = #tpu.dot_dimension_numbers<[1], [0], [0], [1], [0, 0, 1, 1], [], []>} : vector<34x8xbf16>, vector<8x32xbf16>, vector<34x32xf32> -> vector<34x32xf32>
    %108 = arith.addf %85, %107 : vector<34x32xf32>
    %109 = vector.extract_strided_slice %38 {offsets = [0, 24], sizes = [34, 8], strides = [1, 1]} : vector<34x96xbf16> to vector<34x8xbf16>
    %110 = vector.extract_strided_slice %38 {offsets = [0, 56], sizes = [34, 8], strides = [1, 1]} : vector<34x96xbf16> to vector<34x8xbf16>
    %111 = vector.extract_strided_slice %38 {offsets = [0, 88], sizes = [34, 8], strides = [1, 1]} : vector<34x96xbf16> to vector<34x8xbf16>
    %cst_46 = arith.constant dense<0.000000e+00> : vector<34x34xf32>
    %112 = tpu.matmul %109, %110, %cst_46 {dimension_numbers = #tpu.dot_dimension_numbers<[1], [1], [0], [0], [0, 0, 1, 0], [], []>} : vector<34x8xbf16>, vector<34x8xbf16>, vector<34x34xf32> -> vector<34x34xf32>
    %cst_47 = arith.constant 0.353553385 : f32
    %113 = vector.broadcast %cst_47 : f32 to vector<34x34xf32>
    %114 = arith.mulf %112, %113 : vector<34x34xf32>
    %115 = arith.addf %114, %0 : vector<34x34xf32>
    %cst_48 = arith.constant dense<0xFF800000> : vector<34xf32>
    %116 = vector.multi_reduction <maximumf>, %115, %cst_48 [1] : vector<34x34xf32> to vector<34xf32>
    %117 = vector.shape_cast %116 : vector<34xf32> to vector<34x1xf32>
    %118 = vector.broadcast %117 : vector<34x1xf32> to vector<34x34xf32>
    %119 = arith.subf %115, %118 : vector<34x34xf32>
    %120 = math.exp %119 : vector<34x34xf32>
    %cst_49 = arith.constant dense<0.000000e+00> : vector<34xf32>
    %121 = vector.multi_reduction <add>, %120, %cst_49 [1] : vector<34x34xf32> to vector<34xf32>
    %122 = vector.shape_cast %121 : vector<34xf32> to vector<34x1xf32>
    %123 = tpu.reciprocal %122 {approx = true} : vector<34x1xf32> -> vector<34x1xf32>
    %124 = vector.broadcast %123 : vector<34x1xf32> to vector<34x34xf32>
    %125 = arith.mulf %120, %124 : vector<34x34xf32>
    %126 = arith.truncf %125 : vector<34x34xf32> to vector<34x34xbf16>
    %cst_50 = arith.constant dense<0.000000e+00> : vector<34x8xf32>
    %127 = tpu.matmul %126, %111, %cst_50 {dimension_numbers = #tpu.dot_dimension_numbers<[1], [0], [0], [1], [0, 0, 1, 1], [], []>} : vector<34x34xbf16>, vector<34x8xbf16>, vector<34x8xf32> -> vector<34x8xf32>
    %128 = arith.truncf %127 : vector<34x8xf32> to vector<34x8xbf16>
    %129 = vector.extract_strided_slice %40 {offsets = [24, 0], sizes = [8, 32], strides = [1, 1]} : vector<32x32xbf16> to vector<8x32xbf16>
    %cst_51 = arith.constant dense<0.000000e+00> : vector<34x32xf32>
    %130 = tpu.matmul %128, %129, %cst_51 {dimension_numbers = #tpu.dot_dimension_numbers<[1], [0], [0], [1], [0, 0, 1, 1], [], []>} : vector<34x8xbf16>, vector<8x32xbf16>, vector<34x32xf32> -> vector<34x32xf32>
    %131 = arith.addf %108, %130 : vector<34x32xf32>
    %132 = arith.addf %5, %131 : vector<34x32xf32>
    %c0_52 = arith.constant 0 : index
    %c0_53 = arith.constant 0 : index
    %c0_54 = arith.constant 0 : index
    %133 = vector.load %arg9[%c0_52, %c0_53, %c0_54] : memref<2x1x32xf32, #tpu.memory_space<vmem>>, vector<1x1x32xf32>
    %134 = vector.shape_cast %133 : vector<1x1x32xf32> to vector<1x32xf32>
    %135 = vector.broadcast %134 : vector<1x32xf32> to vector<34x32xf32>
    %136 = arith.addf %132, %135 : vector<34x32xf32>
    %c0_55 = arith.constant 0 : index
    %c0_56 = arith.constant 0 : index
    %c0_57 = arith.constant 0 : index
    %137 = vector.load %arg10[%c0_55, %c0_56, %c0_57] : memref<2x1x32xf32, #tpu.memory_space<vmem>>, vector<1x1x32xf32>
    %138 = vector.shape_cast %137 : vector<1x1x32xf32> to vector<1x32xf32>
    %c0_58 = arith.constant 0 : index
    %c0_59 = arith.constant 0 : index
    %c0_60 = arith.constant 0 : index
    %139 = vector.load %arg11[%c0_58, %c0_59, %c0_60] : memref<2x1x32xf32, #tpu.memory_space<vmem>>, vector<1x1x32xf32>
    %140 = vector.shape_cast %139 : vector<1x1x32xf32> to vector<1x32xf32>
    %cst_61 = arith.constant dense<0.000000e+00> : vector<34xf32>
    %141 = vector.multi_reduction <add>, %136, %cst_61 [1] : vector<34x32xf32> to vector<34xf32>
    %142 = vector.shape_cast %141 : vector<34xf32> to vector<34x1xf32>
    %cst_62 = arith.constant 3.200000e+01 : f32
    %143 = vector.broadcast %cst_62 : f32 to vector<34x1xf32>
    %144 = arith.divf %142, %143 : vector<34x1xf32>
    %145 = vector.broadcast %144 : vector<34x1xf32> to vector<34x32xf32>
    %146 = arith.subf %136, %145 : vector<34x32xf32>
    %147 = arith.mulf %146, %146 : vector<34x32xf32>
    %cst_63 = arith.constant dense<0.000000e+00> : vector<34xf32>
    %148 = vector.multi_reduction <add>, %147, %cst_63 [1] : vector<34x32xf32> to vector<34xf32>
    %149 = vector.shape_cast %148 : vector<34xf32> to vector<34x1xf32>
    %cst_64 = arith.constant 3.200000e+01 : f32
    %150 = vector.broadcast %cst_64 : f32 to vector<34x1xf32>
    %151 = arith.divf %149, %150 : vector<34x1xf32>
    %cst_65 = arith.constant 9.99999997E-7 : f32
    %152 = vector.broadcast %cst_65 : f32 to vector<34x1xf32>
    %153 = arith.addf %151, %152 : vector<34x1xf32>
    %154 = math.rsqrt %153 : vector<34x1xf32>
    %155 = vector.broadcast %154 : vector<34x1xf32> to vector<34x32xf32>
    %156 = arith.mulf %146, %155 : vector<34x32xf32>
    %157 = vector.broadcast %138 : vector<1x32xf32> to vector<34x32xf32>
    %158 = arith.mulf %156, %157 : vector<34x32xf32>
    %159 = vector.broadcast %140 : vector<1x32xf32> to vector<34x32xf32>
    %160 = arith.addf %158, %159 : vector<34x32xf32>
    %161 = arith.truncf %160 : vector<34x32xf32> to vector<34x32xbf16>
    %c0_66 = arith.constant 0 : index
    %c0_67 = arith.constant 0 : index
    %c0_68 = arith.constant 0 : index
    %162 = vector.load %arg12[%c0_66, %c0_67, %c0_68] : memref<2x32x128xbf16, #tpu.memory_space<vmem>>, vector<1x32x128xbf16>
    %163 = vector.shape_cast %162 : vector<1x32x128xbf16> to vector<32x128xbf16>
    %cst_69 = arith.constant dense<0.000000e+00> : vector<34x128xf32>
    %164 = tpu.matmul %161, %163, %cst_69 {dimension_numbers = #tpu.dot_dimension_numbers<[1], [0], [0], [1], [0, 0, 1, 1], [], []>} : vector<34x32xbf16>, vector<32x128xbf16>, vector<34x128xf32> -> vector<34x128xf32>
    %c0_70 = arith.constant 0 : index
    %c0_71 = arith.constant 0 : index
    %c0_72 = arith.constant 0 : index
    %165 = vector.load %arg13[%c0_70, %c0_71, %c0_72] : memref<2x1x128xf32, #tpu.memory_space<vmem>>, vector<1x1x128xf32>
    %166 = vector.shape_cast %165 : vector<1x1x128xf32> to vector<1x128xf32>
    %167 = vector.broadcast %166 : vector<1x128xf32> to vector<34x128xf32>
    %168 = arith.addf %164, %167 : vector<34x128xf32>
    %cst_73 = arith.constant 5.000000e-01 : f32
    %169 = vector.broadcast %cst_73 : f32 to vector<34x128xf32>
    %170 = arith.mulf %169, %168 : vector<34x128xf32>
    %cst_74 = arith.constant 0.707106769 : f32
    %171 = vector.broadcast %cst_74 : f32 to vector<34x128xf32>
    %172 = arith.mulf %168, %171 : vector<34x128xf32>
    %173 = math.erf %172 : vector<34x128xf32>
    %cst_75 = arith.constant 1.000000e+00 : f32
    %174 = vector.broadcast %cst_75 : f32 to vector<34x128xf32>
    %175 = arith.addf %174, %173 : vector<34x128xf32>
    %176 = arith.mulf %170, %175 : vector<34x128xf32>
    %177 = arith.truncf %176 : vector<34x128xf32> to vector<34x128xbf16>
    %c0_76 = arith.constant 0 : index
    %c0_77 = arith.constant 0 : index
    %c0_78 = arith.constant 0 : index
    %178 = vector.load %arg14[%c0_76, %c0_77, %c0_78] : memref<2x128x32xbf16, #tpu.memory_space<vmem>>, vector<1x128x32xbf16>
    %179 = vector.shape_cast %178 : vector<1x128x32xbf16> to vector<128x32xbf16>
    %cst_79 = arith.constant dense<0.000000e+00> : vector<34x32xf32>
    %180 = tpu.matmul %177, %179, %cst_79 {dimension_numbers = #tpu.dot_dimension_numbers<[1], [0], [0], [1], [0, 0, 1, 1], [], []>} : vector<34x128xbf16>, vector<128x32xbf16>, vector<34x32xf32> -> vector<34x32xf32>
    %181 = arith.addf %136, %180 : vector<34x32xf32>
    %c0_80 = arith.constant 0 : index
    %c0_81 = arith.constant 0 : index
    %c0_82 = arith.constant 0 : index
    %182 = vector.load %arg15[%c0_80, %c0_81, %c0_82] : memref<2x1x32xf32, #tpu.memory_space<vmem>>, vector<1x1x32xf32>
    %183 = vector.shape_cast %182 : vector<1x1x32xf32> to vector<1x32xf32>
    %184 = vector.broadcast %183 : vector<1x32xf32> to vector<34x32xf32>
    %185 = arith.addf %181, %184 : vector<34x32xf32>
    %c1 = arith.constant 1 : index
    %c0_83 = arith.constant 0 : index
    %c0_84 = arith.constant 0 : index
    %186 = vector.load %arg4[%c1, %c0_83, %c0_84] : memref<2x1x32xf32, #tpu.memory_space<vmem>>, vector<1x1x32xf32>
    %187 = vector.shape_cast %186 : vector<1x1x32xf32> to vector<1x32xf32>
    %c1_85 = arith.constant 1 : index
    %c0_86 = arith.constant 0 : index
    %c0_87 = arith.constant 0 : index
    %188 = vector.load %arg5[%c1_85, %c0_86, %c0_87] : memref<2x1x32xf32, #tpu.memory_space<vmem>>, vector<1x1x32xf32>
    %189 = vector.shape_cast %188 : vector<1x1x32xf32> to vector<1x32xf32>
    %cst_88 = arith.constant dense<0.000000e+00> : vector<34xf32>
    %190 = vector.multi_reduction <add>, %185, %cst_88 [1] : vector<34x32xf32> to vector<34xf32>
    %191 = vector.shape_cast %190 : vector<34xf32> to vector<34x1xf32>
    %cst_89 = arith.constant 3.200000e+01 : f32
    %192 = vector.broadcast %cst_89 : f32 to vector<34x1xf32>
    %193 = arith.divf %191, %192 : vector<34x1xf32>
    %194 = vector.broadcast %193 : vector<34x1xf32> to vector<34x32xf32>
    %195 = arith.subf %185, %194 : vector<34x32xf32>
    %196 = arith.mulf %195, %195 : vector<34x32xf32>
    %cst_90 = arith.constant dense<0.000000e+00> : vector<34xf32>
    %197 = vector.multi_reduction <add>, %196, %cst_90 [1] : vector<34x32xf32> to vector<34xf32>
    %198 = vector.shape_cast %197 : vector<34xf32> to vector<34x1xf32>
    %cst_91 = arith.constant 3.200000e+01 : f32
    %199 = vector.broadcast %cst_91 : f32 to vector<34x1xf32>
    %200 = arith.divf %198, %199 : vector<34x1xf32>
    %cst_92 = arith.constant 9.99999997E-7 : f32
    %201 = vector.broadcast %cst_92 : f32 to vector<34x1xf32>
    %202 = arith.addf %200, %201 : vector<34x1xf32>
    %203 = math.rsqrt %202 : vector<34x1xf32>
    %204 = vector.broadcast %203 : vector<34x1xf32> to vector<34x32xf32>
    %205 = arith.mulf %195, %204 : vector<34x32xf32>
    %206 = vector.broadcast %187 : vector<1x32xf32> to vector<34x32xf32>
    %207 = arith.mulf %205, %206 : vector<34x32xf32>
    %208 = vector.broadcast %189 : vector<1x32xf32> to vector<34x32xf32>
    %209 = arith.addf %207, %208 : vector<34x32xf32>
    %210 = arith.truncf %209 : vector<34x32xf32> to vector<34x32xbf16>
    %c1_93 = arith.constant 1 : index
    %c0_94 = arith.constant 0 : index
    %c0_95 = arith.constant 0 : index
    %211 = vector.load %arg6[%c1_93, %c0_94, %c0_95] : memref<2x32x96xbf16, #tpu.memory_space<vmem>>, vector<1x32x96xbf16>
    %212 = vector.shape_cast %211 : vector<1x32x96xbf16> to vector<32x96xbf16>
    %cst_96 = arith.constant dense<0.000000e+00> : vector<34x96xf32>
    %213 = tpu.matmul %210, %212, %cst_96 {dimension_numbers = #tpu.dot_dimension_numbers<[1], [0], [0], [1], [0, 0, 1, 1], [], []>} : vector<34x32xbf16>, vector<32x96xbf16>, vector<34x96xf32> -> vector<34x96xf32>
    %c1_97 = arith.constant 1 : index
    %c0_98 = arith.constant 0 : index
    %c0_99 = arith.constant 0 : index
    %214 = vector.load %arg7[%c1_97, %c0_98, %c0_99] : memref<2x1x96xf32, #tpu.memory_space<vmem>>, vector<1x1x96xf32>
    %215 = vector.shape_cast %214 : vector<1x1x96xf32> to vector<1x96xf32>
    %216 = vector.broadcast %215 : vector<1x96xf32> to vector<34x96xf32>
    %217 = arith.addf %213, %216 : vector<34x96xf32>
    %218 = arith.truncf %217 : vector<34x96xf32> to vector<34x96xbf16>
    %c1_100 = arith.constant 1 : index
    %c0_101 = arith.constant 0 : index
    %c0_102 = arith.constant 0 : index
    %219 = vector.load %arg8[%c1_100, %c0_101, %c0_102] : memref<2x32x32xbf16, #tpu.memory_space<vmem>>, vector<1x32x32xbf16>
    %220 = vector.shape_cast %219 : vector<1x32x32xbf16> to vector<32x32xbf16>
    %221 = vector.extract_strided_slice %218 {offsets = [0, 0], sizes = [34, 8], strides = [1, 1]} : vector<34x96xbf16> to vector<34x8xbf16>
    %222 = vector.extract_strided_slice %218 {offsets = [0, 32], sizes = [34, 8], strides = [1, 1]} : vector<34x96xbf16> to vector<34x8xbf16>
    %223 = vector.extract_strided_slice %218 {offsets = [0, 64], sizes = [34, 8], strides = [1, 1]} : vector<34x96xbf16> to vector<34x8xbf16>
    %cst_103 = arith.constant dense<0.000000e+00> : vector<34x34xf32>
    %224 = tpu.matmul %221, %222, %cst_103 {dimension_numbers = #tpu.dot_dimension_numbers<[1], [1], [0], [0], [0, 0, 1, 0], [], []>} : vector<34x8xbf16>, vector<34x8xbf16>, vector<34x34xf32> -> vector<34x34xf32>
    %cst_104 = arith.constant 0.353553385 : f32
    %225 = vector.broadcast %cst_104 : f32 to vector<34x34xf32>
    %226 = arith.mulf %224, %225 : vector<34x34xf32>
    %227 = arith.addf %226, %0 : vector<34x34xf32>
    %cst_105 = arith.constant dense<0xFF800000> : vector<34xf32>
    %228 = vector.multi_reduction <maximumf>, %227, %cst_105 [1] : vector<34x34xf32> to vector<34xf32>
    %229 = vector.shape_cast %228 : vector<34xf32> to vector<34x1xf32>
    %230 = vector.broadcast %229 : vector<34x1xf32> to vector<34x34xf32>
    %231 = arith.subf %227, %230 : vector<34x34xf32>
    %232 = math.exp %231 : vector<34x34xf32>
    %cst_106 = arith.constant dense<0.000000e+00> : vector<34xf32>
    %233 = vector.multi_reduction <add>, %232, %cst_106 [1] : vector<34x34xf32> to vector<34xf32>
    %234 = vector.shape_cast %233 : vector<34xf32> to vector<34x1xf32>
    %235 = tpu.reciprocal %234 {approx = true} : vector<34x1xf32> -> vector<34x1xf32>
    %236 = vector.broadcast %235 : vector<34x1xf32> to vector<34x34xf32>
    %237 = arith.mulf %232, %236 : vector<34x34xf32>
    %238 = arith.truncf %237 : vector<34x34xf32> to vector<34x34xbf16>
    %cst_107 = arith.constant dense<0.000000e+00> : vector<34x8xf32>
    %239 = tpu.matmul %238, %223, %cst_107 {dimension_numbers = #tpu.dot_dimension_numbers<[1], [0], [0], [1], [0, 0, 1, 1], [], []>} : vector<34x34xbf16>, vector<34x8xbf16>, vector<34x8xf32> -> vector<34x8xf32>
    %240 = arith.truncf %239 : vector<34x8xf32> to vector<34x8xbf16>
    %241 = vector.extract_strided_slice %220 {offsets = [0, 0], sizes = [8, 32], strides = [1, 1]} : vector<32x32xbf16> to vector<8x32xbf16>
    %cst_108 = arith.constant dense<0.000000e+00> : vector<34x32xf32>
    %242 = tpu.matmul %240, %241, %cst_108 {dimension_numbers = #tpu.dot_dimension_numbers<[1], [0], [0], [1], [0, 0, 1, 1], [], []>} : vector<34x8xbf16>, vector<8x32xbf16>, vector<34x32xf32> -> vector<34x32xf32>
    %243 = vector.extract_strided_slice %218 {offsets = [0, 8], sizes = [34, 8], strides = [1, 1]} : vector<34x96xbf16> to vector<34x8xbf16>
    %244 = vector.extract_strided_slice %218 {offsets = [0, 40], sizes = [34, 8], strides = [1, 1]} : vector<34x96xbf16> to vector<34x8xbf16>
    %245 = vector.extract_strided_slice %218 {offsets = [0, 72], sizes = [34, 8], strides = [1, 1]} : vector<34x96xbf16> to vector<34x8xbf16>
    %cst_109 = arith.constant dense<0.000000e+00> : vector<34x34xf32>
    %246 = tpu.matmul %243, %244, %cst_109 {dimension_numbers = #tpu.dot_dimension_numbers<[1], [1], [0], [0], [0, 0, 1, 0], [], []>} : vector<34x8xbf16>, vector<34x8xbf16>, vector<34x34xf32> -> vector<34x34xf32>
    %cst_110 = arith.constant 0.353553385 : f32
    %247 = vector.broadcast %cst_110 : f32 to vector<34x34xf32>
    %248 = arith.mulf %246, %247 : vector<34x34xf32>
    %249 = arith.addf %248, %0 : vector<34x34xf32>
    %cst_111 = arith.constant dense<0xFF800000> : vector<34xf32>
    %250 = vector.multi_reduction <maximumf>, %249, %cst_111 [1] : vector<34x34xf32> to vector<34xf32>
    %251 = vector.shape_cast %250 : vector<34xf32> to vector<34x1xf32>
    %252 = vector.broadcast %251 : vector<34x1xf32> to vector<34x34xf32>
    %253 = arith.subf %249, %252 : vector<34x34xf32>
    %254 = math.exp %253 : vector<34x34xf32>
    %cst_112 = arith.constant dense<0.000000e+00> : vector<34xf32>
    %255 = vector.multi_reduction <add>, %254, %cst_112 [1] : vector<34x34xf32> to vector<34xf32>
    %256 = vector.shape_cast %255 : vector<34xf32> to vector<34x1xf32>
    %257 = tpu.reciprocal %256 {approx = true} : vector<34x1xf32> -> vector<34x1xf32>
    %258 = vector.broadcast %257 : vector<34x1xf32> to vector<34x34xf32>
    %259 = arith.mulf %254, %258 : vector<34x34xf32>
    %260 = arith.truncf %259 : vector<34x34xf32> to vector<34x34xbf16>
    %cst_113 = arith.constant dense<0.000000e+00> : vector<34x8xf32>
    %261 = tpu.matmul %260, %245, %cst_113 {dimension_numbers = #tpu.dot_dimension_numbers<[1], [0], [0], [1], [0, 0, 1, 1], [], []>} : vector<34x34xbf16>, vector<34x8xbf16>, vector<34x8xf32> -> vector<34x8xf32>
    %262 = arith.truncf %261 : vector<34x8xf32> to vector<34x8xbf16>
    %263 = vector.extract_strided_slice %220 {offsets = [8, 0], sizes = [8, 32], strides = [1, 1]} : vector<32x32xbf16> to vector<8x32xbf16>
    %cst_114 = arith.constant dense<0.000000e+00> : vector<34x32xf32>
    %264 = tpu.matmul %262, %263, %cst_114 {dimension_numbers = #tpu.dot_dimension_numbers<[1], [0], [0], [1], [0, 0, 1, 1], [], []>} : vector<34x8xbf16>, vector<8x32xbf16>, vector<34x32xf32> -> vector<34x32xf32>
    %265 = arith.addf %242, %264 : vector<34x32xf32>
    %266 = vector.extract_strided_slice %218 {offsets = [0, 16], sizes = [34, 8], strides = [1, 1]} : vector<34x96xbf16> to vector<34x8xbf16>
    %267 = vector.extract_strided_slice %218 {offsets = [0, 48], sizes = [34, 8], strides = [1, 1]} : vector<34x96xbf16> to vector<34x8xbf16>
    %268 = vector.extract_strided_slice %218 {offsets = [0, 80], sizes = [34, 8], strides = [1, 1]} : vector<34x96xbf16> to vector<34x8xbf16>
    %cst_115 = arith.constant dense<0.000000e+00> : vector<34x34xf32>
    %269 = tpu.matmul %266, %267, %cst_115 {dimension_numbers = #tpu.dot_dimension_numbers<[1], [1], [0], [0], [0, 0, 1, 0], [], []>} : vector<34x8xbf16>, vector<34x8xbf16>, vector<34x34xf32> -> vector<34x34xf32>
    %cst_116 = arith.constant 0.353553385 : f32
    %270 = vector.broadcast %cst_116 : f32 to vector<34x34xf32>
    %271 = arith.mulf %269, %270 : vector<34x34xf32>
    %272 = arith.addf %271, %0 : vector<34x34xf32>
    %cst_117 = arith.constant dense<0xFF800000> : vector<34xf32>
    %273 = vector.multi_reduction <maximumf>, %272, %cst_117 [1] : vector<34x34xf32> to vector<34xf32>
    %274 = vector.shape_cast %273 : vector<34xf32> to vector<34x1xf32>
    %275 = vector.broadcast %274 : vector<34x1xf32> to vector<34x34xf32>
    %276 = arith.subf %272, %275 : vector<34x34xf32>
    %277 = math.exp %276 : vector<34x34xf32>
    %cst_118 = arith.constant dense<0.000000e+00> : vector<34xf32>
    %278 = vector.multi_reduction <add>, %277, %cst_118 [1] : vector<34x34xf32> to vector<34xf32>
    %279 = vector.shape_cast %278 : vector<34xf32> to vector<34x1xf32>
    %280 = tpu.reciprocal %279 {approx = true} : vector<34x1xf32> -> vector<34x1xf32>
    %281 = vector.broadcast %280 : vector<34x1xf32> to vector<34x34xf32>
    %282 = arith.mulf %277, %281 : vector<34x34xf32>
    %283 = arith.truncf %282 : vector<34x34xf32> to vector<34x34xbf16>
    %cst_119 = arith.constant dense<0.000000e+00> : vector<34x8xf32>
    %284 = tpu.matmul %283, %268, %cst_119 {dimension_numbers = #tpu.dot_dimension_numbers<[1], [0], [0], [1], [0, 0, 1, 1], [], []>} : vector<34x34xbf16>, vector<34x8xbf16>, vector<34x8xf32> -> vector<34x8xf32>
    %285 = arith.truncf %284 : vector<34x8xf32> to vector<34x8xbf16>
    %286 = vector.extract_strided_slice %220 {offsets = [16, 0], sizes = [8, 32], strides = [1, 1]} : vector<32x32xbf16> to vector<8x32xbf16>
    %cst_120 = arith.constant dense<0.000000e+00> : vector<34x32xf32>
    %287 = tpu.matmul %285, %286, %cst_120 {dimension_numbers = #tpu.dot_dimension_numbers<[1], [0], [0], [1], [0, 0, 1, 1], [], []>} : vector<34x8xbf16>, vector<8x32xbf16>, vector<34x32xf32> -> vector<34x32xf32>
    %288 = arith.addf %265, %287 : vector<34x32xf32>
    %289 = vector.extract_strided_slice %218 {offsets = [0, 24], sizes = [34, 8], strides = [1, 1]} : vector<34x96xbf16> to vector<34x8xbf16>
    %290 = vector.extract_strided_slice %218 {offsets = [0, 56], sizes = [34, 8], strides = [1, 1]} : vector<34x96xbf16> to vector<34x8xbf16>
    %291 = vector.extract_strided_slice %218 {offsets = [0, 88], sizes = [34, 8], strides = [1, 1]} : vector<34x96xbf16> to vector<34x8xbf16>
    %cst_121 = arith.constant dense<0.000000e+00> : vector<34x34xf32>
    %292 = tpu.matmul %289, %290, %cst_121 {dimension_numbers = #tpu.dot_dimension_numbers<[1], [1], [0], [0], [0, 0, 1, 0], [], []>} : vector<34x8xbf16>, vector<34x8xbf16>, vector<34x34xf32> -> vector<34x34xf32>
    %cst_122 = arith.constant 0.353553385 : f32
    %293 = vector.broadcast %cst_122 : f32 to vector<34x34xf32>
    %294 = arith.mulf %292, %293 : vector<34x34xf32>
    %295 = arith.addf %294, %0 : vector<34x34xf32>
    %cst_123 = arith.constant dense<0xFF800000> : vector<34xf32>
    %296 = vector.multi_reduction <maximumf>, %295, %cst_123 [1] : vector<34x34xf32> to vector<34xf32>
    %297 = vector.shape_cast %296 : vector<34xf32> to vector<34x1xf32>
    %298 = vector.broadcast %297 : vector<34x1xf32> to vector<34x34xf32>
    %299 = arith.subf %295, %298 : vector<34x34xf32>
    %300 = math.exp %299 : vector<34x34xf32>
    %cst_124 = arith.constant dense<0.000000e+00> : vector<34xf32>
    %301 = vector.multi_reduction <add>, %300, %cst_124 [1] : vector<34x34xf32> to vector<34xf32>
    %302 = vector.shape_cast %301 : vector<34xf32> to vector<34x1xf32>
    %303 = tpu.reciprocal %302 {approx = true} : vector<34x1xf32> -> vector<34x1xf32>
    %304 = vector.broadcast %303 : vector<34x1xf32> to vector<34x34xf32>
    %305 = arith.mulf %300, %304 : vector<34x34xf32>
    %306 = arith.truncf %305 : vector<34x34xf32> to vector<34x34xbf16>
    %cst_125 = arith.constant dense<0.000000e+00> : vector<34x8xf32>
    %307 = tpu.matmul %306, %291, %cst_125 {dimension_numbers = #tpu.dot_dimension_numbers<[1], [0], [0], [1], [0, 0, 1, 1], [], []>} : vector<34x34xbf16>, vector<34x8xbf16>, vector<34x8xf32> -> vector<34x8xf32>
    %308 = arith.truncf %307 : vector<34x8xf32> to vector<34x8xbf16>
    %309 = vector.extract_strided_slice %220 {offsets = [24, 0], sizes = [8, 32], strides = [1, 1]} : vector<32x32xbf16> to vector<8x32xbf16>
    %cst_126 = arith.constant dense<0.000000e+00> : vector<34x32xf32>
    %310 = tpu.matmul %308, %309, %cst_126 {dimension_numbers = #tpu.dot_dimension_numbers<[1], [0], [0], [1], [0, 0, 1, 1], [], []>} : vector<34x8xbf16>, vector<8x32xbf16>, vector<34x32xf32> -> vector<34x32xf32>
    %311 = arith.addf %288, %310 : vector<34x32xf32>
    %312 = arith.addf %185, %311 : vector<34x32xf32>
    %c1_127 = arith.constant 1 : index
    %c0_128 = arith.constant 0 : index
    %c0_129 = arith.constant 0 : index
    %313 = vector.load %arg9[%c1_127, %c0_128, %c0_129] : memref<2x1x32xf32, #tpu.memory_space<vmem>>, vector<1x1x32xf32>
    %314 = vector.shape_cast %313 : vector<1x1x32xf32> to vector<1x32xf32>
    %315 = vector.broadcast %314 : vector<1x32xf32> to vector<34x32xf32>
    %316 = arith.addf %312, %315 : vector<34x32xf32>
    %c1_130 = arith.constant 1 : index
    %c0_131 = arith.constant 0 : index
    %c0_132 = arith.constant 0 : index
    %317 = vector.load %arg10[%c1_130, %c0_131, %c0_132] : memref<2x1x32xf32, #tpu.memory_space<vmem>>, vector<1x1x32xf32>
    %318 = vector.shape_cast %317 : vector<1x1x32xf32> to vector<1x32xf32>
    %c1_133 = arith.constant 1 : index
    %c0_134 = arith.constant 0 : index
    %c0_135 = arith.constant 0 : index
    %319 = vector.load %arg11[%c1_133, %c0_134, %c0_135] : memref<2x1x32xf32, #tpu.memory_space<vmem>>, vector<1x1x32xf32>
    %320 = vector.shape_cast %319 : vector<1x1x32xf32> to vector<1x32xf32>
    %cst_136 = arith.constant dense<0.000000e+00> : vector<34xf32>
    %321 = vector.multi_reduction <add>, %316, %cst_136 [1] : vector<34x32xf32> to vector<34xf32>
    %322 = vector.shape_cast %321 : vector<34xf32> to vector<34x1xf32>
    %cst_137 = arith.constant 3.200000e+01 : f32
    %323 = vector.broadcast %cst_137 : f32 to vector<34x1xf32>
    %324 = arith.divf %322, %323 : vector<34x1xf32>
    %325 = vector.broadcast %324 : vector<34x1xf32> to vector<34x32xf32>
    %326 = arith.subf %316, %325 : vector<34x32xf32>
    %327 = arith.mulf %326, %326 : vector<34x32xf32>
    %cst_138 = arith.constant dense<0.000000e+00> : vector<34xf32>
    %328 = vector.multi_reduction <add>, %327, %cst_138 [1] : vector<34x32xf32> to vector<34xf32>
    %329 = vector.shape_cast %328 : vector<34xf32> to vector<34x1xf32>
    %cst_139 = arith.constant 3.200000e+01 : f32
    %330 = vector.broadcast %cst_139 : f32 to vector<34x1xf32>
    %331 = arith.divf %329, %330 : vector<34x1xf32>
    %cst_140 = arith.constant 9.99999997E-7 : f32
    %332 = vector.broadcast %cst_140 : f32 to vector<34x1xf32>
    %333 = arith.addf %331, %332 : vector<34x1xf32>
    %334 = math.rsqrt %333 : vector<34x1xf32>
    %335 = vector.broadcast %334 : vector<34x1xf32> to vector<34x32xf32>
    %336 = arith.mulf %326, %335 : vector<34x32xf32>
    %337 = vector.broadcast %318 : vector<1x32xf32> to vector<34x32xf32>
    %338 = arith.mulf %336, %337 : vector<34x32xf32>
    %339 = vector.broadcast %320 : vector<1x32xf32> to vector<34x32xf32>
    %340 = arith.addf %338, %339 : vector<34x32xf32>
    %341 = arith.truncf %340 : vector<34x32xf32> to vector<34x32xbf16>
    %c1_141 = arith.constant 1 : index
    %c0_142 = arith.constant 0 : index
    %c0_143 = arith.constant 0 : index
    %342 = vector.load %arg12[%c1_141, %c0_142, %c0_143] : memref<2x32x128xbf16, #tpu.memory_space<vmem>>, vector<1x32x128xbf16>
    %343 = vector.shape_cast %342 : vector<1x32x128xbf16> to vector<32x128xbf16>
    %cst_144 = arith.constant dense<0.000000e+00> : vector<34x128xf32>
    %344 = tpu.matmul %341, %343, %cst_144 {dimension_numbers = #tpu.dot_dimension_numbers<[1], [0], [0], [1], [0, 0, 1, 1], [], []>} : vector<34x32xbf16>, vector<32x128xbf16>, vector<34x128xf32> -> vector<34x128xf32>
    %c1_145 = arith.constant 1 : index
    %c0_146 = arith.constant 0 : index
    %c0_147 = arith.constant 0 : index
    %345 = vector.load %arg13[%c1_145, %c0_146, %c0_147] : memref<2x1x128xf32, #tpu.memory_space<vmem>>, vector<1x1x128xf32>
    %346 = vector.shape_cast %345 : vector<1x1x128xf32> to vector<1x128xf32>
    %347 = vector.broadcast %346 : vector<1x128xf32> to vector<34x128xf32>
    %348 = arith.addf %344, %347 : vector<34x128xf32>
    %cst_148 = arith.constant 5.000000e-01 : f32
    %349 = vector.broadcast %cst_148 : f32 to vector<34x128xf32>
    %350 = arith.mulf %349, %348 : vector<34x128xf32>
    %cst_149 = arith.constant 0.707106769 : f32
    %351 = vector.broadcast %cst_149 : f32 to vector<34x128xf32>
    %352 = arith.mulf %348, %351 : vector<34x128xf32>
    %353 = math.erf %352 : vector<34x128xf32>
    %cst_150 = arith.constant 1.000000e+00 : f32
    %354 = vector.broadcast %cst_150 : f32 to vector<34x128xf32>
    %355 = arith.addf %354, %353 : vector<34x128xf32>
    %356 = arith.mulf %350, %355 : vector<34x128xf32>
    %357 = arith.truncf %356 : vector<34x128xf32> to vector<34x128xbf16>
    %c1_151 = arith.constant 1 : index
    %c0_152 = arith.constant 0 : index
    %c0_153 = arith.constant 0 : index
    %358 = vector.load %arg14[%c1_151, %c0_152, %c0_153] : memref<2x128x32xbf16, #tpu.memory_space<vmem>>, vector<1x128x32xbf16>
    %359 = vector.shape_cast %358 : vector<1x128x32xbf16> to vector<128x32xbf16>
    %cst_154 = arith.constant dense<0.000000e+00> : vector<34x32xf32>
    %360 = tpu.matmul %357, %359, %cst_154 {dimension_numbers = #tpu.dot_dimension_numbers<[1], [0], [0], [1], [0, 0, 1, 1], [], []>} : vector<34x128xbf16>, vector<128x32xbf16>, vector<34x32xf32> -> vector<34x32xf32>
    %361 = arith.addf %316, %360 : vector<34x32xf32>
    %c1_155 = arith.constant 1 : index
    %c0_156 = arith.constant 0 : index
    %c0_157 = arith.constant 0 : index
    %362 = vector.load %arg15[%c1_155, %c0_156, %c0_157] : memref<2x1x32xf32, #tpu.memory_space<vmem>>, vector<1x1x32xf32>
    %363 = vector.shape_cast %362 : vector<1x1x32xf32> to vector<1x32xf32>
    %364 = vector.broadcast %363 : vector<1x32xf32> to vector<34x32xf32>
    %365 = arith.addf %361, %364 : vector<34x32xf32>
    %c0_158 = arith.constant 0 : index
    %c0_159 = arith.constant 0 : index
    %366 = vector.load %arg16[%c0_158, %c0_159] : memref<1x32xf32, #tpu.memory_space<vmem>>, vector<1x32xf32>
    %c0_160 = arith.constant 0 : index
    %c0_161 = arith.constant 0 : index
    %367 = vector.load %arg17[%c0_160, %c0_161] : memref<1x32xf32, #tpu.memory_space<vmem>>, vector<1x32xf32>
    %cst_162 = arith.constant dense<0.000000e+00> : vector<34xf32>
    %368 = vector.multi_reduction <add>, %365, %cst_162 [1] : vector<34x32xf32> to vector<34xf32>
    %369 = vector.shape_cast %368 : vector<34xf32> to vector<34x1xf32>
    %cst_163 = arith.constant 3.200000e+01 : f32
    %370 = vector.broadcast %cst_163 : f32 to vector<34x1xf32>
    %371 = arith.divf %369, %370 : vector<34x1xf32>
    %372 = vector.broadcast %371 : vector<34x1xf32> to vector<34x32xf32>
    %373 = arith.subf %365, %372 : vector<34x32xf32>
    %374 = arith.mulf %373, %373 : vector<34x32xf32>
    %cst_164 = arith.constant dense<0.000000e+00> : vector<34xf32>
    %375 = vector.multi_reduction <add>, %374, %cst_164 [1] : vector<34x32xf32> to vector<34xf32>
    %376 = vector.shape_cast %375 : vector<34xf32> to vector<34x1xf32>
    %cst_165 = arith.constant 3.200000e+01 : f32
    %377 = vector.broadcast %cst_165 : f32 to vector<34x1xf32>
    %378 = arith.divf %376, %377 : vector<34x1xf32>
    %cst_166 = arith.constant 9.99999997E-7 : f32
    %379 = vector.broadcast %cst_166 : f32 to vector<34x1xf32>
    %380 = arith.addf %378, %379 : vector<34x1xf32>
    %381 = math.rsqrt %380 : vector<34x1xf32>
    %382 = vector.broadcast %381 : vector<34x1xf32> to vector<34x32xf32>
    %383 = arith.mulf %373, %382 : vector<34x32xf32>
    %384 = vector.broadcast %366 : vector<1x32xf32> to vector<34x32xf32>
    %385 = arith.mulf %383, %384 : vector<34x32xf32>
    %386 = vector.broadcast %367 : vector<1x32xf32> to vector<34x32xf32>
    %387 = arith.addf %385, %386 : vector<34x32xf32>
    %c0_167 = arith.constant 0 : index
    %c0_168 = arith.constant 0 : index
    %388 = vector.load %arg18[%c0_167, %c0_168] : memref<34x32xf32, #tpu.memory_space<vmem>>, vector<34x32xf32>
    tpu.vector_store %arg18[%c0_167, %c0_168], %387 {strides = array<i32>} : memref<34x32xf32, #tpu.memory_space<vmem>>, vector<34x32xf32>,
    return
  }
}

</mosaic_0001>

<bundles_post_ra>
// kernel: vit_forward.1
= control target key start
LH: loop header
LB: loop body
LE: loop exit
PB: predicated region body
PF: predicated region fallthrough
CT: control target
= control target key end

     0   :  { %v4985_v0 = vmov 0.0   ;;  %vm4986_vm0 = vmmov 0   ;;  %vm112_vm1 = vcmask 392192   ;;  %vm180_vm2 = vcmask 261120   ;;  %s4987_s19 = smov 96   ;;  %s4989_s20 = smov 120   ;;  %s6354_s1 = inlined_call_operand.vmem [shape: bf16[48,32], index: 1, kind: input, shape index: {}]   ;;  %s6355_s0 = inlined_call_operand.vmem [shape: bf16[34,48], index: 0, kind: input, shape index: {}]   ;;  %s6356_s2 = inlined_call_operand.vmem [shape: f32[34,32], index: 2, kind: input, shape index: {}]   ;;  %s6357_s6 = inlined_call_operand.vmem [shape: bf16[2,32,96], index: 6, kind: input, shape index: {}]   ;;  %s6358_s4 = inlined_call_operand.vmem [shape: f32[2,1,32], index: 4, kind: input, shape index: {}]   ;;  %s6359_s5 = inlined_call_operand.vmem [shape: f32[2,1,32], index: 5, kind: input, shape index: {}]   ;;  %s6360_s7 = inlined_call_operand.vmem [shape: f32[2,1,96], index: 7, kind: input, shape index: {}]   ;;  %s6361_s3 = inlined_call_operand.vmem [shape: f32[34,34], index: 3, kind: input, shape index: {}]   ;;  %s6362_s8 = inlined_call_operand.vmem [shape: bf16[2,32,32], index: 8, kind: input, shape index: {}]   ;;  %s6363_s9 = inlined_call_operand.vmem [shape: f32[2,1,32], index: 9, kind: input, shape index: {}]   ;;  %s6364_s12 = inlined_call_operand.vmem [shape: bf16[2,32,128], index: 12, kind: input, shape index: {}]   ;;  %s6365_s14 = inlined_call_operand.vmem [shape: bf16[2,128,32], index: 14, kind: input, shape index: {}]   ;;  %s6366_s10 = inlined_call_operand.vmem [shape: f32[2,1,32], index: 10, kind: input, shape index: {}]   ;;  %s6367_s11 = inlined_call_operand.vmem [shape: f32[2,1,32], index: 11, kind: input, shape index: {}]   ;;  %s6368_s13 = inlined_call_operand.vmem [shape: f32[2,1,128], index: 13, kind: input, shape index: {}]   ;;  %s6369_s15 = inlined_call_operand.vmem [shape: f32[2,1,32], index: 15, kind: input, shape index: {}]   ;;  %s6370_s16 = inlined_call_operand.vmem [shape: f32[1,32], index: 16, kind: input, shape index: {}]   ;;  %s6371_s17 = inlined_call_operand.vmem [shape: f32[1,32], index: 17, kind: input, shape index: {}]   ;;  %s6372_s18 = inlined_call_operand.vmem [shape: f32[34,32], index: 18, kind: output, shape index: {}]  }
   0x1   :  { %6382 = sst [smem:[#allocation2_spill]] %s6354_s1  ;;  %4163 = vmatprep.subr.bf16.mxu0 %v4985_v0  ;;  %4169 = vmatprep.mubr.msk.bf16.mxu0 %vm4986_vm0, %v4985_v0  ;;  %vm193_vm3 = vcmask 254976   ;;  %v4726_v59 = vld [vmem:[%s6357_s6] sm:$0xff]   ;;  %v4727_v60 = vld [vmem:[%s6357_s6 + $0x8] sm:$0xff]   ;;  %vm377_vm4 = vcmask 64512   ;;  %vm462_vm5 = vcmask 277504  }
   0x2   :  { %6383 = sst [smem:[#allocation3_spill]] %s6355_s0  ;;  %s6385_s29 = sld [smem:[#allocation2_spill]]  ;;  %4181 = vmatprep.subr.bf16.mxu1 %v4985_v0  ;;  %4185 = vmatprep.mubr.msk.bf16.mxu1 %vm4986_vm0, %v4985_v0  ;;  %vm475_vm6 = vcmask 271360   ;;  %vm539_vm7 = vcmask 1040384   ;;  %vm844_vm8 = vcmask 1043456  }
   0x3   :  { %6384 = sst [smem:[#allocation4_spill]] %s6356_s2  ;;  %s6386_s22 = sld [smem:[#allocation3_spill]]  ;;  %4182 = vmatpush3.bf16.msra.mxu1 %v4726_v59 }
   0x4   :  { %s6387_s28 = sld [smem:[#allocation4_spill]]  ;;  %4183 = vmatprep.subr.bf16.mxu1 %v4985_v0  ;;  %s4988_s0 = smov 88  }
   0x5   :  { %s4990_s30 = smov 64   ;;  %s4991_s1 = smov 56  }
   0x6   :  { %s4992_s21 = smov 80   ;;  %s4994_s26 = smov 48  }
   0x7   :  { %4184 = vmatpush3.bf16.msra.mxu1 %v4727_v60  ;;  %s6380_s27 = smov 72   ;;  %s6376_s23 = smov 40  }
   0x8   :  { %v4720_v1 = vld [vmem:[%s6385_s29] sm:$0xff]   ;;  %v4721_v2 = vld [vmem:[%s6385_s29 + $0x8] sm:$0xff]   ;;  %v4722_v3 = vld [vmem:[%s6385_s29 + $0x10] sm:$0xff]   ;;  %4197 = vmatprep.subr.bf16.mxu1 %v4985_v0  ;;  %s6389_s24 = smov 104  }
   0x9   :  { %4164 = vmatpush3.bf16.msra.mxu0 %v4720_v1  ;;  %v4723_v4 = vld [vmem:[%s6386_s22] sm:$0xff]   ;;  %v4724_v5 = vld [vmem:[%s6386_s22 + $0x8] sm:$0xff]   ;;  %v4725_v6 = vld [vmem:[%s6386_s22 + $0x10] ss:$0 sps:$4 sm:$0x11]   ;;  %s4993_s22 = smov 112  }
   0xa   :  { %4165 = vmatprep.subr.bf16.mxu0 %v4985_v0  ;;  %v76_v7 = vld [vmem:[%s6387_s28] sm:$0xff]  ;;  %v77_v9 = vld [vmem:[%s6387_s28 + $0x8] sm:$0xff]  ;;  %v78_v16 = vld [vmem:[%s6387_s28 + $0x10] sm:$0xff] }
   0xb   :  { %v79_v19 = vld [vmem:[%s6387_s28 + $0x18] sm:$0xff]  ;;  %v80_v26 = vld [vmem:[%s6387_s28 + $0x20] sm:$0x3]  ;;  %s6378_s28 = smov 104  }
   0xd   :  { %4166 = vmatpush3.bf16.msra.mxu0 %v4721_v2 }
   0xe   :  { %4167 = vmatprep.subr.bf16.mxu0 %v4985_v0 }
  0x11   :  { %4168 = vmatpush3.bf16.msra.mxu0 %v4722_v3 }
  0x12   :  { %4215 = vmatprep.subr.bf16.mxu0 %v4985_v0 }
  0x14   :  { %4170 = vmatmul.mubr.msk.bf16.vlgmr.msra.gmra.mrb[0].mxu0 %vm112_vm1, %v4723_v4 }
  0x15   :  { %4173 = vmatprep.mubr.msk.bf16.mxu0 %vm4986_vm0, %v4985_v0 }
  0x1c   :  { %4174 = vmatmul.mubr.msk.bf16.gmra.mrb[4].mxu0 %vm112_vm1, %v4724_v5 }
  0x1d   :  { %4177 = vmatprep.mubr.msk.bf16.mxu0 %vm4986_vm0, %v4985_v0 }
  0x24   :  { %4178 = vmatmul.mubr.msk.bf16.gmra.mrb[8].mxu0 %vm112_vm1, %v4725_v6 }
  0x25   :  { %4221 = vmatprep.mubr.msk.bf16.mxu0 %vm4986_vm0, %v4985_v0 }
  0xe7   :  { %v156_v8 = vpop.f32.mrb[0].mxu0 }
  0xe8   :  { %v5132_v10 = vadd.f32 %v156_v8, %v76_v7  ;;  %v4171_v11 = vpop.f32.mrb[1].mxu0 }
  0xe9   :  { %v159_v12 = vpop.f32.mrb[2].mxu0 }
  0xea   :  { %v5134_v13 = vadd.f32 %v159_v12, %v77_v9  ;;  %v4172_v14 = vpop.f32.mrb[3].mxu0  ;;  %v181_v15 = vsel %vm180_vm2, %v5132_v10, 0.0 }
  0xeb   :  { %182 = vadd.xlane.f32.xlu0 %v181_v15 }
  0xec   :  { %v184_v17 = vsel %vm180_vm2, %v5134_v13, 0.0 }
  0xef   :  { %185 = vadd.xlane.f32.xlu0 %v184_v17  ;;  %v164_v18 = vpop.f32.mrb[4].mxu0 }
  0xf0   :  { %v5146_v20 = vadd.f32 %v164_v18, %v78_v16  ;;  %v4175_v21 = vpop.f32.mrb[5].mxu0  ;;  %v3825_v16 = vld [vmem:[%s6358_s4] ss:$0 sm:$0xff] }
  0xf1   :  { %v167_v22 = vpop.f32.mrb[6].mxu0 }
  0xf2   :  { %v5148_v23 = vadd.f32 %v167_v22, %v79_v19  ;;  %v4176_v24 = vpop.f32.mrb[7].mxu0  ;;  %v187_v25 = vsel %vm180_vm2, %v5146_v20, 0.0  ;;  %v3826_v22 = vld [vmem:[%s6359_s5] ss:$0 sm:$0xff] }
  0xf3   :  { %188 = vadd.xlane.f32.xlu1 %v187_v25 }
  0xf4   :  { %v190_v27 = vsel %vm180_vm2, %v5148_v23, 0.0 }
  0xf7   :  { %191 = vadd.xlane.f32.xlu1 %v190_v27  ;;  %v172_v28 = vpop.f32.mrb[8].mxu0 }
  0xf8   :  { %v5157_v29 = vadd.f32 %v172_v28, %v80_v26  ;;  %v4179_v30 = vpop.f32.mrb[9].mxu0 }
  0xf9   :  { %v175_v31 = vpop.f32.mrb[10].mxu0 }
  0xfa   :  { %v194_v32 = vsel %vm193_vm3, %v5157_v29, 0.0  ;;  %v4180_v33 = vpop.f32.mrb[11].mxu0 }
  0xfb   :  { %195 = vadd.xlane.f32.xlu0 %v194_v32 }
 0x178   :  { %v183_v34 = vpop.xlane.xlu0 %182 }
 0x179   :  { %v198_v35 = vmul.f32 0.03125, %v183_v34 }
 0x17b   :  { %v203_v36 = vsub.f32 %v5132_v10, %v198_v35 }
 0x17c   :  { %v186_v37 = vpop.xlane.xlu0 %185 }
 0x17d   :  { %v199_v38 = vmul.f32 0.03125, %v186_v37  ;;  %v208_v39 = vmul.f32 %v203_v36, %v203_v36 }
 0x17f   :  { %v204_v40 = vsub.f32 %v5134_v13, %v199_v38  ;;  %v213_v41 = vsel %vm180_vm2, %v208_v39, 0.0 }
 0x180   :  { %v189_v42 = vpop.xlane.xlu1 %188  ;;  %214 = vadd.xlane.f32.xlu1 %v213_v41 }
 0x181   :  { %v200_v43 = vmul.f32 0.03125, %v189_v42  ;;  %v209_v44 = vmul.f32 %v204_v40, %v204_v40 }
 0x183   :  { %v205_v45 = vsub.f32 %v5146_v20, %v200_v43  ;;  %v216_v46 = vsel %vm180_vm2, %v209_v44, 0.0  ;;  %v3827_v43 = vld [vmem:[%s6360_s7] ss:$0 sm:$0xff] }
 0x184   :  { %v192_v47 = vpop.xlane.xlu1 %191  ;;  %217 = vadd.xlane.f32.xlu0 %v216_v46 }
 0x185   :  { %v201_v48 = vmul.f32 0.03125, %v192_v47  ;;  %v210_v49 = vmul.f32 %v205_v45, %v205_v45 }
 0x187   :  { %v206_v50 = vsub.f32 %v5148_v23, %v201_v48  ;;  %v219_v51 = vsel %vm180_vm2, %v210_v49, 0.0 }
 0x188   :  { %220 = vadd.xlane.f32.xlu1 %v219_v51  ;;  %v196_v52 = vpop.xlane.xlu0 %195 }
 0x189   :  { %v202_v53 = vmul.f32 0.03125, %v196_v52  ;;  %v211_v54 = vmul.f32 %v206_v50, %v206_v50 }
 0x18b   :  { %v207_v55 = vsub.f32 %v5157_v29, %v202_v53  ;;  %v222_v56 = vsel %vm180_vm2, %v211_v54, 0.0 }
 0x18c   :  { %223 = vadd.xlane.f32.xlu0 %v222_v56 }
 0x18d   :  { %v212_v57 = vmul.f32 %v207_v55, %v207_v55 }
 0x18f   :  { %v225_v58 = vsel %vm193_vm3, %v212_v57, 0.0 }
 0x190   :  { %226 = vadd.xlane.f32.xlu1 %v225_v58 }
 0x20d   :  { %v215_v61 = vpop.xlane.xlu1 %214 }
 0x20e   :  { %v228_v62 = vmul.f32 0.03125, %v215_v61 }
 0x210   :  { %v233_v63 = vadd.f32 1e-06, %v228_v62 }
 0x211   :  { %v218_v1 = vpop.xlane.xlu0 %217 }
 0x212   :  { %4750 = vrsqrt.f32 %v233_v63  ;;  %v229_v2 = vmul.f32 0.03125, %v218_v1 }
 0x214   :  { %v234_v3 = vadd.f32 1e-06, %v229_v2 }
 0x215   :  { %v221_v4 = vpop.xlane.xlu1 %220 }
 0x216   :  { %4752 = vrsqrt.f32 %v234_v3  ;;  %v230_v5 = vmul.f32 0.03125, %v221_v4 }
 0x218   :  { %v235_v6 = vadd.f32 1e-06, %v230_v5 }
 0x219   :  { %v224_v7 = vpop.xlane.xlu0 %223 }
 0x21a   :  { %4754 = vrsqrt.f32 %v235_v6  ;;  %v231_v8 = vmul.f32 0.03125, %v224_v7 }
 0x21c   :  { %v4751_v9 = vpop.eup %4750  ;;  %v236_v11 = vadd.f32 1e-06, %v231_v8 }
 0x21d   :  { %v227_v12 = vpop.xlane.xlu1 %226  ;;  %v243_v14 = vmul.f32 %v4751_v9, %v203_v36 }
 0x21e   :  { %4756 = vrsqrt.f32 %v236_v11  ;;  %v232_v15 = vmul.f32 0.03125, %v227_v12 }
 0x21f   :  { %v254_v21 = vmul.f32 %v3825_v16, %v243_v14 }
 0x220   :  { %v4753_v17 = vpop.eup %4752  ;;  %v237_v18 = vadd.f32 1e-06, %v232_v15 }
 0x221   :  { %v244_v19 = vmul.f32 %v4753_v17, %v204_v40  ;;  %v265_v26 = vadd.f32 %v3826_v22, %v254_v21 }
 0x222   :  { %4758 = vrsqrt.f32 %v237_v18 }
 0x223   :  { %v255_v24 = vmul.f32 %v3825_v16, %v244_v19  ;;  %v5257_v19 = vld [vmem:[%s6361_s3] sm:$0xff] }
 0x224   :  { %v4755_v25 = vpop.eup %4754 }
 0x225   :  { %v266_v27 = vadd.f32 %v3826_v22, %v255_v24  ;;  %v245_v28 = vmul.f32 %v4755_v25, %v205_v45  ;;  %v5262_v25 = vld [vmem:[%s6361_s3 + $0x8] sm:$0xff] }
 0x227   :  { %v270_v30 = vpack.c.bf16 %v266_v27, %v265_v26  ;;  %v256_v33 = vmul.f32 %v3825_v16, %v245_v28 }
 0x228   :  { %v4757_v31 = vpop.eup %4756 }
 0x229   :  { %4186 = vmatmul.mubr.msk.bf16.vlgmr.msra.gmra.mrb[0].mxu1 %vm180_vm2, %v270_v30  ;;  %v246_v32 = vmul.f32 %v4757_v31, %v206_v50  ;;  %v267_v36 = vadd.f32 %v3826_v22, %v256_v33 }
 0x22a   :  { %4189 = vmatprep.mubr.msk.bf16.mxu1 %vm4986_vm0, %v4985_v0 }
 0x22b   :  { %v257_v34 = vmul.f32 %v3825_v16, %v246_v32 }
 0x22c   :  { %v4759_v35 = vpop.eup %4758 }
 0x22d   :  { %v268_v37 = vadd.f32 %v3826_v22, %v257_v34  ;;  %v247_v38 = vmul.f32 %v4759_v35, %v207_v55  ;;  %v5277_v34 = vld [vmem:[%s6361_s3 + $0x10] sm:$0xff] }
 0x22f   :  { %v271_v39 = vpack.c.bf16 %v268_v37, %v267_v36  ;;  %v258_v40 = vmul.f32 %v3825_v16, %v247_v38  ;;  %v5282_v38 = vld [vmem:[%s6361_s3 + $0x18] sm:$0xff] }
 0x231   :  { %4190 = vmatmul.mubr.msk.bf16.gmra.mrb[4].mxu1 %vm180_vm2, %v271_v39  ;;  %v269_v41 = vadd.f32 %v3826_v22, %v258_v40 }
 0x232   :  { %4193 = vmatprep.mubr.msk.bf16.mxu1 %vm4986_vm0, %v4985_v0 }
 0x233   :  { %v272_v42 = vpack.c.bf16 %v269_v41, %v269_v41 }
 0x239   :  { %4194 = vmatmul.mubr.msk.bf16.gmra.mrb[8].mxu1 %vm180_vm2, %v272_v42 }
 0x23a   :  { %4203 = vmatprep.mubr.msk.bf16.mxu1 %vm4986_vm0, %v4985_v0 }
 0x2fc   :  { %v339_v44 = vpop.f32.mrb[0].mxu1 }
 0x2fd   :  { %v4187_v45 = vpop.f32.mrb[1].mxu1  ;;  %v340_v47 = vadd.f32 %v3827_v43, %v339_v44 }
 0x2fe   :  { %v342_v46 = vpop.f32.mrb[2].mxu1  ;;  %v5292_v45 = vld [vmem:[%s6361_s3 + $0x20] sm:$0x3] }
 0x2ff   :  { %v343_v48 = vadd.f32 %v3827_v43, %v342_v46  ;;  %v4188_v49 = vpop.f32.mrb[3].mxu1 }
 0x301   :  { %v5197_v50 = vpack.c.bf16 %v343_v48, %v340_v47 }
 0x303   :  { %371 = vrot.lane.b32.xlu0 %v5197_v50, %s4987_s19 }
 0x304   :  { %v347_v51 = vpop.f32.mrb[4].mxu1 }
 0x305   :  { %v4191_v52 = vpop.f32.mrb[5].mxu1  ;;  %v348_v54 = vadd.f32 %v3827_v43, %v347_v51 }
 0x306   :  { %v350_v53 = vpop.f32.mrb[6].mxu1 }
 0x307   :  { %v351_v55 = vadd.f32 %v3827_v43, %v350_v53  ;;  %v4192_v56 = vpop.f32.mrb[7].mxu1 }
 0x309   :  { %v5201_v57 = vpack.c.bf16 %v351_v55, %v348_v54 }
 0x30b   :  { %610 = vrot.lane.b32.xlu0 %v5201_v57, %s4988_s0  ;;  %373 = vrot.lane.b32.xlu1 %v5201_v57, %s4987_s19 }
 0x30c   :  { %v355_v58 = vpop.f32.mrb[8].mxu1 }
 0x30d   :  { %v356_v59 = vadd.f32 %v3827_v43, %v355_v58  ;;  %v4195_v60 = vpop.f32.mrb[9].mxu1 }
 0x30e   :  { %v358_v61 = vpop.f32.mrb[10].mxu1 }
 0x30f   :  { %v5207_v62 = vpack.c.bf16 %v356_v59, %v356_v59  ;;  %602 = vrot.lane.b32.xlu0 %v5197_v50, %s4989_s20  ;;  %v4196_v63 = vpop.f32.mrb[11].mxu1 }
 0x311   :  { %375 = vrot.lane.b32.xlu1 %v5207_v62, %s4987_s19 }
 0x313   :  { %606 = vrot.lane.b32.xlu0 %v5207_v62, %s4989_s20 }
 0x315   :  { %608 = vrot.lane.b32.xlu1 %v5197_v50, %s4988_s0 }
 0x319   :  { %612 = vrot.lane.b32.xlu1 %v5207_v62, %s4988_s0 }
 0x31d   :  { %604 = vrot.lane.b32.xlu1 %v5201_v57, %s4989_s20 }
 0x375   :  { %v372_v1 = vpop.permute.xlu0 %371 }
 0x376   :  { %v388_v2 = vsel %vm377_vm4, %v372_v1, 0 }
 0x377   :  { %4198 = vmatpush3.bf16.xpose.msra.mxu1 %v388_v2 }
 0x378   :  { %4199 = vmatprep.subr.bf16.mxu1 %v4985_v0 }
 0x37d   :  { %v374_v3 = vpop.permute.xlu1 %373  ;;  %v611_v9 = vpop.permute.xlu0 %610 }
 0x37e   :  { %v391_v4 = vsel %vm377_vm4, %v374_v3, 0  ;;  %v627_v11 = vsel %vm377_vm4, %v611_v9, 0 }
 0x37f   :  { %4200 = vmatpush3.bf16.xpose.msra.mxu1 %v391_v4 }
 0x380   :  { %4201 = vmatprep.subr.bf16.mxu1 %v4985_v0 }
 0x381   :  { %v603_v15 = vpop.permute.xlu0 %602 }
 0x383   :  { %v376_v5 = vpop.permute.xlu1 %375 }
 0x384   :  { %v394_v6 = vsel %vm377_vm4, %v376_v5, 0 }
 0x385   :  { %v607_v17 = vpop.permute.xlu0 %606 }
 0x387   :  { %4202 = vmatpush3.bf16.xpose.msra.mxu1 %v394_v6  ;;  %v609_v7 = vpop.permute.xlu1 %608 }
 0x388   :  { %4233 = vmatprep.subr.bf16.mxu1 %v4985_v0  ;;  %v624_v8 = vsel %vm377_vm4, %v609_v7, 0 }
 0x38b   :  { %v613_v12 = vpop.permute.xlu1 %612 }
 0x38c   :  { %v630_v14 = vsel %vm377_vm4, %v613_v12, 0 }
 0x38e   :  { %4204 = vmatmul.mubr.msk.bf16.vlgmr.msra.gmra.mrb[12].mxu1 %vm377_vm4, %v5197_v50 }
 0x38f   :  { %4234 = vmatpush3.bf16.xpose.msra.mxu1 %v624_v8  ;;  %4207 = vmatprep.mubr.msk.bf16.mxu1 %vm4986_vm0, %v4985_v0  ;;  %v605_v16 = vpop.permute.xlu1 %604 }
 0x390   :  { %4235 = vmatprep.subr.bf16.mxu1 %v4985_v0 }
 0x396   :  { %4208 = vmatmul.mubr.msk.bf16.gmra.mrb[16].mxu1 %vm377_vm4, %v5201_v57 }
 0x397   :  { %4236 = vmatpush3.bf16.xpose.msra.mxu1 %v627_v11  ;;  %4211 = vmatprep.mubr.msk.bf16.mxu1 %vm4986_vm0, %v4985_v0 }
 0x398   :  { %4237 = vmatprep.subr.bf16.mxu1 %v4985_v0 }
 0x39e   :  { %4212 = vmatmul.mubr.msk.bf16.gmra.mrb[20].mxu1 %vm377_vm4, %v5207_v62 }
 0x39f   :  { %4238 = vmatpush3.bf16.xpose.msra.mxu1 %v630_v14  ;;  %4239 = vmatprep.mubr.msk.bf16.mxu1 %vm4986_vm0, %v4985_v0 }
 0x3a0   :  { %4269 = vmatprep.subr.bf16.mxu1 %v4985_v0 }
 0x3a6   :  { %4240 = vmatmul.mubr.msk.bf16.vlgmr.msra.gmra.mrb[24].mxu1 %vm377_vm4, %v603_v15 }
 0x3a7   :  { %4243 = vmatprep.mubr.msk.bf16.mxu1 %vm4986_vm0, %v4985_v0 }
 0x3ae   :  { %4244 = vmatmul.mubr.msk.bf16.gmra.mrb[28].mxu1 %vm377_vm4, %v605_v16 }
 0x3af   :  { %4247 = vmatprep.mubr.msk.bf16.mxu1 %vm4986_vm0, %v4985_v0 }
 0x3b6   :  { %4248 = vmatmul.mubr.msk.bf16.gmra.mrb[32].mxu1 %vm377_vm4, %v607_v17 }
 0x3b7   :  { %4271 = vmatprep.mubr.msk.bf16.mxu1 %vm4986_vm0, %v4985_v0 }
 0x461   :  { %v430_v18 = vpop.f32.mrb[12].mxu1 }
 0x462   :  { %v452_v21 = vmul.f32 0.35355338, %v430_v18  ;;  %v4205_v22 = vpop.f32.mrb[13].mxu1 }
 0x463   :  { %v433_v24 = vpop.f32.mrb[14].mxu1 }
 0x464   :  { %v453_v26 = vmul.f32 0.35355338, %v433_v24  ;;  %v4206_v27 = vpop.f32.mrb[15].mxu1  ;;  %v5265_v28 = vadd.f32 %v452_v21, %v5257_v19 }
 0x466   :  { %v463_v30 = vsel %vm462_vm5, %v5265_v28, -inf  ;;  %v5270_v31 = vadd.f32 %v453_v26, %v5262_v25 }
 0x467   :  { %464 = vmax.xlane.f32.xlu1 %v463_v30 }
 0x468   :  { %v466_v32 = vsel %vm462_vm5, %v5270_v31, -inf }
 0x469   :  { %467 = vmax.xlane.f32.xlu0 %v466_v32  ;;  %v438_v33 = vpop.f32.mrb[16].mxu1 }
 0x46a   :  { %v454_v35 = vmul.f32 0.35355338, %v438_v33  ;;  %v4209_v36 = vpop.f32.mrb[17].mxu1 }
 0x46b   :  { %v441_v37 = vpop.f32.mrb[18].mxu1 }
 0x46c   :  { %v455_v39 = vmul.f32 0.35355338, %v441_v37  ;;  %v4210_v40 = vpop.f32.mrb[19].mxu1  ;;  %v459_v41 = vadd.f32 %v454_v35, %v5277_v34 }
 0x46e   :  { %v469_v42 = vsel %vm462_vm5, %v459_v41, -inf  ;;  %v5287_v43 = vadd.f32 %v455_v39, %v5282_v38 }
 0x46f   :  { %470 = vmax.xlane.f32.xlu0 %v469_v42 }
 0x470   :  { %v472_v48 = vsel %vm462_vm5, %v5287_v43, -inf }
 0x471   :  { %v446_v44 = vpop.f32.mrb[20].mxu1 }
 0x472   :  { %v456_v46 = vmul.f32 0.35355338, %v446_v44  ;;  %v4213_v47 = vpop.f32.mrb[21].mxu1 }
 0x473   :  { %473 = vmax.xlane.f32.xlu0 %v472_v48  ;;  %v449_v49 = vpop.f32.mrb[22].mxu1 }
 0x474   :  { %v4214_v51 = vpop.f32.mrb[23].mxu1  ;;  %v461_v52 = vadd.f32 %v456_v46, %v5292_v45 }
 0x476   :  { %v476_v53 = vsel %vm475_vm6, %v461_v52, -inf }
 0x477   :  { %477 = vmax.xlane.f32.xlu1 %v476_v53 }
 0x479   :  { %v666_v54 = vpop.f32.mrb[24].mxu1 }
 0x47a   :  { %v688_v55 = vmul.f32 0.35355338, %v666_v54  ;;  %v4241_v56 = vpop.f32.mrb[25].mxu1 }
 0x47b   :  { %v669_v58 = vpop.f32.mrb[26].mxu1 }
 0x47c   :  { %v689_v59 = vmul.f32 0.35355338, %v669_v58  ;;  %v4242_v60 = vpop.f32.mrb[27].mxu1  ;;  %v693_v61 = vadd.f32 %v688_v55, %v5257_v19 }
 0x47e   :  { %v698_v63 = vsel %vm462_vm5, %v693_v61, -inf  ;;  %v5301_v1 = vadd.f32 %v689_v59, %v5262_v25 }
 0x47f   :  { %699 = vmax.xlane.f32.xlu0 %v698_v63 }
 0x480   :  { %v701_v2 = vsel %vm462_vm5, %v5301_v1, -inf }
 0x481   :  { %702 = vmax.xlane.f32.xlu1 %v701_v2  ;;  %v674_v3 = vpop.f32.mrb[28].mxu1 }
 0x482   :  { %v690_v4 = vmul.f32 0.35355338, %v674_v3  ;;  %v4245_v5 = vpop.f32.mrb[29].mxu1 }
 0x483   :  { %v677_v6 = vpop.f32.mrb[30].mxu1 }
 0x484   :  { %v691_v7 = vmul.f32 0.35355338, %v677_v6  ;;  %v4246_v8 = vpop.f32.mrb[31].mxu1  ;;  %v695_v9 = vadd.f32 %v690_v4, %v5277_v34 }
 0x486   :  { %v704_v11 = vsel %vm462_vm5, %v695_v9, -inf  ;;  %v696_v12 = vadd.f32 %v691_v7, %v5282_v38 }
 0x487   :  { %705 = vmax.xlane.f32.xlu0 %v704_v11 }
 0x488   :  { %v707_v14 = vsel %vm462_vm5, %v696_v12, -inf }
 0x489   :  { %708 = vmax.xlane.f32.xlu1 %v707_v14  ;;  %v682_v15 = vpop.f32.mrb[32].mxu1 }
 0x48a   :  { %v4249_v16 = vpop.f32.mrb[33].mxu1  ;;  %v692_v21 = vmul.f32 0.35355338, %v682_v15 }
 0x48b   :  { %v685_v17 = vpop.f32.mrb[34].mxu1 }
 0x48c   :  { %v4250_v18 = vpop.f32.mrb[35].mxu1  ;;  %v5314_v22 = vadd.f32 %v692_v21, %v5292_v45 }
 0x48e   :  { %v710_v24 = vsel %vm475_vm6, %v5314_v22, -inf }
 0x49a   :  { %524 = vrot.lane.b32.xlu1 %v5201_v57, %s4990_s30 }
 0x49d   :  { %522 = vrot.lane.b32.xlu0 %v5197_v50, %s4990_s30 }
 0x4bc   :  { %711 = vmax.xlane.f32.xlu0 %v710_v24 }
 0x4f4   :  { %v465_v26 = vpop.xlane.xlu1 %464 }
 0x4f5   :  { %v479_v27 = vsub.f32 %v5265_v28, %v465_v26 }
 0x4f6   :  { %v468_v30 = vpop.xlane.xlu0 %467 }
 0x4f7   :  { %v484_v32 = vmul.f32 1.442695, %v479_v27  ;;  %v480_v33 = vsub.f32 %v5270_v31, %v468_v30 }
 0x4f9   :  { %4760 = vpow2.f32 %v484_v32  ;;  %v486_v35 = vmul.f32 1.442695, %v480_v33 }
 0x4fb   :  { %4762 = vpow2.f32 %v486_v35 }
 0x4fc   :  { %v471_v36 = vpop.xlane.xlu0 %470 }
 0x4fd   :  { %v481_v37 = vsub.f32 %v459_v41, %v471_v36 }
 0x4ff   :  { %v488_v39 = vmul.f32 1.442695, %v481_v37 }
 0x500   :  { %v474_v40 = vpop.xlane.xlu0 %473 }
 0x501   :  { %4764 = vpow2.f32 %v488_v39  ;;  %v482_v42 = vsub.f32 %v5287_v43, %v474_v40 }
 0x503   :  { %v5321_v44 = vpop.eup %4760  ;;  %v490_v46 = vmul.f32 1.442695, %v482_v42 }
 0x504   :  { %v478_v47 = vpop.xlane.xlu1 %477  ;;  %v494_v28 = vsel %vm462_vm5, %v5321_v44, 0.0 }
 0x505   :  { %v5325_v48 = vpop.eup %4762  ;;  %4766 = vpow2.f32 %v490_v46  ;;  %v483_v31 = vsub.f32 %v461_v52, %v478_v47  ;;  %495 = vadd.xlane.f32.xlu1 %v494_v28 }
 0x506   :  { %v497_v41 = vsel %vm462_vm5, %v5325_v48, 0.0 }
 0x507   :  { %v492_v49 = vmul.f32 1.442695, %v483_v31  ;;  %498 = vadd.xlane.f32.xlu0 %v497_v41 }
 0x509   :  { %4768 = vpow2.f32 %v492_v49 }
 0x50b   :  { %v5329_v51 = vpop.eup %4764 }
 0x50c   :  { %v700_v43 = vpop.xlane.xlu0 %699  ;;  %v500_v53 = vsel %vm462_vm5, %v5329_v51, 0.0 }
 0x50d   :  { %v713_v54 = vsub.f32 %v693_v61, %v700_v43  ;;  %501 = vadd.xlane.f32.xlu1 %v500_v53 }
 0x50e   :  { %v703_v58 = vpop.xlane.xlu1 %702 }
 0x50f   :  { %v5333_v55 = vpop.eup %4766  ;;  %v718_v56 = vmul.f32 1.442695, %v713_v54  ;;  %v714_v16 = vsub.f32 %v5301_v1, %v703_v58 }
 0x510   :  { %v503_v52 = vsel %vm462_vm5, %v5333_v55, 0.0 }
 0x511   :  { %4770 = vpow2.f32 %v718_v56  ;;  %504 = vadd.xlane.f32.xlu0 %v503_v52  ;;  %v720_v17 = vmul.f32 1.442695, %v714_v16 }
 0x513   :  { %v5337_v59 = vpop.eup %4768 }
 0x514   :  { %v706_v60 = vpop.xlane.xlu0 %705  ;;  %v506_v63 = vsel %vm475_vm6, %v5337_v59, 0.0 }
 0x515   :  { %v715_v2 = vsub.f32 %v695_v9, %v706_v60  ;;  %507 = vadd.xlane.f32.xlu1 %v506_v63 }
 0x516   :  { %v709_v3 = vpop.xlane.xlu1 %708 }
 0x517   :  { %v722_v61 = vmul.f32 1.442695, %v715_v2  ;;  %v716_v4 = vsub.f32 %v696_v12, %v709_v3 }
 0x518   :  { %v523_v5 = vpop.permute.xlu0 %522 }
 0x519   :  { %4772 = vpow2.f32 %v722_v61  ;;  %v724_v6 = vmul.f32 1.442695, %v716_v4  ;;  %4216 = vmatpush3.bf16.msra.mxu0 %v523_v5 }
 0x51a   :  { %4217 = vmatprep.subr.bf16.mxu0 %v4985_v0  ;;  %v525_v8 = vpop.permute.xlu1 %524 }
 0x51b   :  { %v5342_v7 = vpop.eup %4770  ;;  %4774 = vpow2.f32 %v724_v6 }
 0x51c   :  { %v728_v11 = vsel %vm462_vm5, %v5342_v7, 0.0  ;;  %4776 = vpow2.f32 %v720_v17 }
 0x51d   :  { %729 = vadd.xlane.f32.xlu1 %v728_v11  ;;  %4218 = vmatpush3.bf16.msra.mxu0 %v525_v8 }
 0x51e   :  { %4219 = vmatprep.subr.bf16.mxu0 %v4985_v0 }
 0x523   :  { %v5347_v9 = vpop.eup %4772 }
 0x524   :  { %v734_v12 = vsel %vm462_vm5, %v5347_v9, 0.0 }
 0x525   :  { %v5351_v14 = vpop.eup %4774  ;;  %735 = vadd.xlane.f32.xlu1 %v734_v12 }
 0x526   :  { %v737_v15 = vsel %vm462_vm5, %v5351_v14, 0.0  ;;  %v5358_v18 = vpop.eup %4776 }
 0x527   :  { %526 = vrot.lane.b32.xlu0 %v5207_v62, %s4990_s30  ;;  %v731_v21 = vsel %vm462_vm5, %v5358_v18, 0.0 }
 0x529   :  { %738 = vadd.xlane.f32.xlu1 %v737_v15 }
 0x546   :  { %732 = vadd.xlane.f32.xlu0 %v731_v21 }
 0x549   :  { %v712_v24 = vpop.xlane.xlu0 %711 }
 0x54a   :  { %v717_v26 = vsub.f32 %v5314_v22, %v712_v24 }
 0x54c   :  { %v726_v27 = vmul.f32 1.442695, %v717_v26 }
 0x54e   :  { %4778 = vpow2.f32 %v726_v27 }
 0x558   :  { %v5363_v30 = vpop.eup %4778 }
 0x559   :  { %v740_v32 = vsel %vm475_vm6, %v5363_v30, 0.0 }
 0x55a   :  { %741 = vadd.xlane.f32.xlu1 %v740_v32 }
 0x55c   :  { %758 = vrot.lane.b32.xlu0 %v5201_v57, %s4991_s1 }
 0x560   :  { %760 = vrot.lane.b32.xlu0 %v5207_v62, %s4991_s1 }
 0x564   :  { %980 = vrot.lane.b32.xlu0 %v5201_v57, %s4992_s21 }
 0x568   :  { %972 = vrot.lane.b32.xlu0 %v5197_v50, %s4993_s22 }
 0x56b   :  { %756 = vrot.lane.b32.xlu1 %v5197_v50, %s4991_s1 }
 0x56c   :  { %976 = vrot.lane.b32.xlu0 %v5207_v62, %s4993_s22 }
 0x56f   :  { %978 = vrot.lane.b32.xlu1 %v5197_v50, %s4992_s21 }
 0x573   :  { %982 = vrot.lane.b32.xlu1 %v5207_v62, %s4992_s21 }
 0x577   :  { %974 = vrot.lane.b32.xlu1 %v5201_v57, %s4993_s22 }
 0x592   :  { %v496_v1 = vpop.xlane.xlu1 %495 }
 0x594   :  { %v499_v22 = vpop.xlane.xlu0 %498 }
 0x595   :  { %4780 = vrcp.f32 %v499_v22 }
 0x596   :  { %4782 = vrcp.f32 %v496_v1 }
 0x59a   :  { %v502_v33 = vpop.xlane.xlu1 %501 }
 0x59b   :  { %4784 = vrcp.f32 %v502_v33 }
 0x59e   :  { %v505_v35 = vpop.xlane.xlu0 %504 }
 0x59f   :  { %v4781_v36 = vpop.eup %4780  ;;  %4786 = vrcp.f32 %v505_v35 }
 0x5a0   :  { %v4783_v37 = vpop.eup %4782  ;;  %v515_v39 = vmul.f32 %v4781_v36, %v5325_v48 }
 0x5a1   :  { %v514_v46 = vmul.f32 %v4783_v37, %v5321_v44 }
 0x5a2   :  { %v508_v40 = vpop.xlane.xlu1 %507  ;;  %v527_v42 = vpop.permute.xlu0 %526 }
 0x5a3   :  { %v541_v47 = vsel %vm539_vm7, %v527_v42, 0  ;;  %4788 = vrcp.f32 %v508_v40  ;;  %v519_v28 = vpack.c.bf16 %v515_v39, %v514_v46 }
 0x5a4   :  { %4220 = vmatpush3.bf16.msra.mxu0 %v541_v47 }
 0x5a5   :  { %4251 = vmatprep.subr.bf16.mxu0 %v4985_v0  ;;  %v4785_v31 = vpop.eup %4784 }
 0x5a6   :  { %v516_v48 = vmul.f32 %v4785_v31, %v5329_v51 }
 0x5a7   :  { %4222 = vmatmul.mubr.msk.bf16.vlgmr.msra.gmra.mrb[12].mxu0 %vm462_vm5, %v519_v28 }
 0x5a8   :  { %4225 = vmatprep.mubr.msk.bf16.mxu0 %vm4986_vm0, %v4985_v0 }
 0x5a9   :  { %v4787_v41 = vpop.eup %4786 }
 0x5aa   :  { %v517_v49 = vmul.f32 %v4787_v41, %v5333_v55  ;;  %v730_v56 = vpop.xlane.xlu1 %729 }
 0x5ac   :  { %v520_v43 = vpack.c.bf16 %v517_v49, %v516_v48 }
 0x5ad   :  { %v4789_v44 = vpop.eup %4788 }
 0x5ae   :  { %v518_v53 = vmul.f32 %v4789_v44, %v5337_v59 }
 0x5af   :  { %4226 = vmatmul.mubr.msk.bf16.gmra.mrb[16].mxu0 %vm462_vm5, %v520_v43 }
 0x5b0   :  { %4229 = vmatprep.mubr.msk.bf16.mxu0 %vm4986_vm0, %v4985_v0  ;;  %v521_v54 = vpack.c.bf16 %v518_v53, %v518_v53 }
 0x5b2   :  { %v736_v52 = vpop.xlane.xlu1 %735 }
 0x5b6   :  { %v739_v58 = vpop.xlane.xlu1 %738 }
 0x5b7   :  { %4230 = vmatmul.mubr.msk.bf16.gmra.mrb[20].mxu0 %vm462_vm5, %v521_v54 }
 0x5b8   :  { %4257 = vmatprep.mubr.msk.bf16.mxu0 %vm4986_vm0, %v4985_v0 }
 0x5d3   :  { %v733_v51 = vpop.xlane.xlu0 %732 }
 0x5d4   :  { %4790 = vrcp.f32 %v733_v51 }
 0x5d5   :  { %4792 = vrcp.f32 %v730_v56 }
 0x5d6   :  { %4794 = vrcp.f32 %v739_v58 }
 0x5d7   :  { %v759_v60 = vpop.permute.xlu0 %758  ;;  %4796 = vrcp.f32 %v736_v52 }
 0x5db   :  { %v761_v3 = vpop.permute.xlu0 %760 }
 0x5dc   :  { %v774_v5 = vsel %vm539_vm7, %v761_v3, 0 }
 0x5de   :  { %v4791_v59 = vpop.eup %4790 }
 0x5df   :  { %v4793_v2 = vpop.eup %4792  ;;  %v749_v61 = vmul.f32 %v4791_v59, %v5358_v18  ;;  %v981_v56 = vpop.permute.xlu0 %980 }
 0x5e0   :  { %v748_v4 = vmul.f32 %v4793_v2, %v5342_v7  ;;  %v4795_v8 = vpop.eup %4794  ;;  %v364_v7 = vld [vmem:[%s6362_s8] sm:$0xf] }
 0x5e1   :  { %v4797_v11 = vpop.eup %4796  ;;  %v751_v12 = vmul.f32 %v4795_v8, %v5351_v14  ;;  %v914_v16 = vsel %vm844_vm8, %v364_v7, 0 }
 0x5e2   :  { %v753_v6 = vpack.c.bf16 %v749_v61, %v748_v4  ;;  %v750_v15 = vmul.f32 %v4797_v11, %v5347_v9  ;;  %v365_v9 = vld [vmem:[%s6362_s8 + $0x4] sm:$0xf] }
 0x5e3   :  { %v846_v24 = vsel %vm844_vm8, %v365_v9, 0 }
 0x5e4   :  { %v754_v17 = vpack.c.bf16 %v751_v12, %v750_v15  ;;  %4270 = vmatpush3.bf16.msra.mxu1 %v846_v24 }
 0x5e5   :  { %4297 = vmatprep.subr.bf16.mxu1 %v4985_v0 }
 0x5e7   :  { %v742_v55 = vpop.xlane.xlu1 %741 }
 0x5e8   :  { %4798 = vrcp.f32 %v742_v55  ;;  %v997_v55 = vsel %vm377_vm4, %v981_v56, 0 }
 0x5eb   :  { %v757_v63 = vpop.permute.xlu1 %756 }
 0x5ec   :  { %4252 = vmatpush3.bf16.msra.mxu0 %v757_v63 }
 0x5ed   :  { %4253 = vmatprep.subr.bf16.mxu0 %v4985_v0 }
 0x5ef   :  { %v979_v41 = vpop.permute.xlu1 %978 }
 0x5f0   :  { %4254 = vmatpush3.bf16.msra.mxu0 %v759_v60  ;;  %v994_v44 = vsel %vm377_vm4, %v979_v41, 0 }
 0x5f1   :  { %4255 = vmatprep.subr.bf16.mxu0 %v4985_v0 }
 0x5f2   :  { %v4799_v18 = vpop.eup %4798 }
 0x5f3   :  { %v752_v14 = vmul.f32 %v4799_v18, %v5363_v30  ;;  %v983_v59 = vpop.permute.xlu1 %982 }
 0x5f4   :  { %4256 = vmatpush3.bf16.msra.mxu0 %v774_v5  ;;  %v1000_v4 = vsel %vm377_vm4, %v983_v59, 0  ;;  %v973_v5 = vpop.permute.xlu0 %972 }
 0x5f5   :  { %4283 = vmatprep.subr.bf16.mxu0 %v4985_v0  ;;  %v755_v21 = vpack.c.bf16 %v752_v14, %v752_v14 }
 0x5f7   :  { %4258 = vmatmul.mubr.msk.bf16.vlgmr.msra.gmra.mrb[24].mxu0 %vm462_vm5, %v753_v6  ;;  %v975_v6 = vpop.permute.xlu1 %974 }
 0x5f8   :  { %4261 = vmatprep.mubr.msk.bf16.mxu0 %vm4986_vm0, %v4985_v0  ;;  %4284 = vmatpush3.bf16.msra.mxu0 %v914_v16  ;;  %v977_v8 = vpop.permute.xlu0 %976 }
 0x5f9   :  { %4315 = vmatprep.subr.bf16.mxu0 %v4985_v0 }
 0x5ff   :  { %4262 = vmatmul.mubr.msk.bf16.gmra.mrb[28].mxu0 %vm462_vm5, %v754_v17 }
 0x600   :  { %4265 = vmatprep.mubr.msk.bf16.mxu0 %vm4986_vm0, %v4985_v0 }
 0x607   :  { %4266 = vmatmul.mubr.msk.bf16.gmra.mrb[32].mxu0 %vm462_vm5, %v755_v21 }
 0x608   :  { %4285 = vmatprep.mubr.msk.bf16.mxu0 %vm4986_vm0, %v4985_v0 }
 0x67a   :  { %v577_v26 = vpop.f32.mrb[12].mxu0 }
 0x67b   :  { %v4223_v27 = vpop.f32.mrb[13].mxu0 }
 0x67c   :  { %v580_v32 = vpop.f32.mrb[14].mxu0 }
 0x67d   :  { %v599_v1 = vpack.c.bf16 %v580_v32, %v577_v26  ;;  %v4224_v30 = vpop.f32.mrb[15].mxu0 }
 0x67f   :  { %4286 = vmatmul.mubr.msk.bf16.vlgmr.msra.gmra.mrb[36].mxu0 %vm377_vm4, %v599_v1 }
 0x680   :  { %4289 = vmatprep.mubr.msk.bf16.mxu0 %vm4986_vm0, %v4985_v0 }
 0x682   :  { %v585_v22 = vpop.f32.mrb[16].mxu0 }
 0x683   :  { %v4227_v33 = vpop.f32.mrb[17].mxu0 }
 0x684   :  { %v588_v35 = vpop.f32.mrb[18].mxu0 }
 0x685   :  { %v600_v36 = vpack.c.bf16 %v588_v35, %v585_v22  ;;  %v4228_v37 = vpop.f32.mrb[19].mxu0 }
 0x687   :  { %4290 = vmatmul.mubr.msk.bf16.gmra.mrb[40].mxu0 %vm377_vm4, %v600_v36 }
 0x688   :  { %4293 = vmatprep.mubr.msk.bf16.mxu0 %vm4986_vm0, %v4985_v0 }
 0x68a   :  { %v593_v39 = vpop.f32.mrb[20].mxu0 }
 0x68b   :  { %v4231_v40 = vpop.f32.mrb[21].mxu0  ;;  %v601_v46 = vpack.c.bf16 %v593_v39, %v593_v39 }
 0x68c   :  { %v596_v42 = vpop.f32.mrb[22].mxu0 }
 0x68d   :  { %v4232_v47 = vpop.f32.mrb[23].mxu0 }
 0x68f   :  { %4294 = vmatmul.mubr.msk.bf16.gmra.mrb[44].mxu0 %vm377_vm4, %v601_v46 }
 0x690   :  { %4321 = vmatprep.mubr.msk.bf16.mxu0 %vm4986_vm0, %v4985_v0 }
 0x6ca   :  { %v810_v28 = vpop.f32.mrb[24].mxu0 }
 0x6cb   :  { %v4259_v31 = vpop.f32.mrb[25].mxu0 }
 0x6cc   :  { %v813_v48 = vpop.f32.mrb[26].mxu0 }
 0x6cd   :  { %v832_v49 = vpack.c.bf16 %v813_v48, %v810_v28  ;;  %v4260_v43 = vpop.f32.mrb[27].mxu0 }
 0x6cf   :  { %4272 = vmatmul.mubr.msk.bf16.vlgmr.msra.gmra.mrb[36].mxu1 %vm377_vm4, %v832_v49 }
 0x6d0   :  { %4298 = vmatpush3.bf16.xpose.msra.mxu1 %v994_v44  ;;  %4275 = vmatprep.mubr.msk.bf16.mxu1 %vm4986_vm0, %v4985_v0 }
 0x6d1   :  { %4299 = vmatprep.subr.bf16.mxu1 %v4985_v0 }
 0x6d2   :  { %v818_v53 = vpop.f32.mrb[28].mxu0 }
 0x6d3   :  { %v4263_v54 = vpop.f32.mrb[29].mxu0 }
 0x6d4   :  { %v821_v52 = vpop.f32.mrb[30].mxu0 }
 0x6d5   :  { %v833_v51 = vpack.c.bf16 %v821_v52, %v818_v53  ;;  %v4264_v58 = vpop.f32.mrb[31].mxu0 }
 0x6d7   :  { %4276 = vmatmul.mubr.msk.bf16.gmra.mrb[40].mxu1 %vm377_vm4, %v833_v51 }
 0x6d8   :  { %4300 = vmatpush3.bf16.xpose.msra.mxu1 %v997_v55  ;;  %4279 = vmatprep.mubr.msk.bf16.mxu1 %vm4986_vm0, %v4985_v0 }
 0x6d9   :  { %4301 = vmatprep.subr.bf16.mxu1 %v4985_v0 }
 0x6da   :  { %v826_v60 = vpop.f32.mrb[32].mxu0 }
 0x6db   :  { %v4267_v63 = vpop.f32.mrb[33].mxu0  ;;  %v834_v3 = vpack.c.bf16 %v826_v60, %v826_v60 }
 0x6dc   :  { %v829_v2 = vpop.f32.mrb[34].mxu0 }
 0x6dd   :  { %v4268_v61 = vpop.f32.mrb[35].mxu0 }
 0x6df   :  { %4280 = vmatmul.mubr.msk.bf16.gmra.mrb[44].mxu1 %vm377_vm4, %v834_v3 }
 0x6e0   :  { %4302 = vmatpush3.bf16.xpose.msra.mxu1 %v1000_v4  ;;  %4303 = vmatprep.mubr.msk.bf16.mxu1 %vm4986_vm0, %v4985_v0 }
 0x6e1   :  { %4333 = vmatprep.subr.bf16.mxu1 %v4985_v0 }
 0x6e7   :  { %4304 = vmatmul.mubr.msk.bf16.vlgmr.msra.gmra.mrb[48].mxu1 %vm377_vm4, %v973_v5 }
 0x6e8   :  { %4307 = vmatprep.mubr.msk.bf16.mxu1 %vm4986_vm0, %v4985_v0 }
 0x6ef   :  { %4308 = vmatmul.mubr.msk.bf16.gmra.mrb[52].mxu1 %vm377_vm4, %v975_v6 }
 0x6f0   :  { %4311 = vmatprep.mubr.msk.bf16.mxu1 %vm4986_vm0, %v4985_v0 }
 0x6f7   :  { %4312 = vmatmul.mubr.msk.bf16.gmra.mrb[56].mxu1 %vm377_vm4, %v977_v8 }
 0x6f8   :  { %4335 = vmatprep.mubr.msk.bf16.mxu1 %vm4986_vm0, %v4985_v0 }
 0x752   :  { %v950_v11 = vpop.f32.mrb[36].mxu0 }
 0x753   :  { %v4287_v12 = vpop.f32.mrb[37].mxu0 }
 0x754   :  { %v953_v7 = vpop.f32.mrb[38].mxu0 }
 0x755   :  { %v4288_v15 = vpop.f32.mrb[39].mxu0 }
 0x75a   :  { %v958_v16 = vpop.f32.mrb[40].mxu0 }
 0x75b   :  { %v4291_v17 = vpop.f32.mrb[41].mxu0 }
 0x75c   :  { %v961_v18 = vpop.f32.mrb[42].mxu0 }
 0x75d   :  { %v4292_v14 = vpop.f32.mrb[43].mxu0 }
 0x762   :  { %v966_v21 = vpop.f32.mrb[44].mxu0 }
 0x763   :  { %v4295_v9 = vpop.f32.mrb[45].mxu0 }
 0x764   :  { %v969_v24 = vpop.f32.mrb[46].mxu0 }
 0x765   :  { %v4296_v26 = vpop.f32.mrb[47].mxu0 }
 0x7a2   :  { %v882_v27 = vpop.f32.mrb[36].mxu1 }
 0x7a3   :  { %v5462_v32 = vadd.f32 %v950_v11, %v882_v27  ;;  %v4273_v1 = vpop.f32.mrb[37].mxu1 }
 0x7a4   :  { %v885_v30 = vpop.f32.mrb[38].mxu1 }
 0x7a5   :  { %v5464_v22 = vadd.f32 %v953_v7, %v885_v30  ;;  %v4274_v33 = vpop.f32.mrb[39].mxu1 }
 0x7aa   :  { %v890_v35 = vpop.f32.mrb[40].mxu1 }
 0x7ab   :  { %v5466_v36 = vadd.f32 %v958_v16, %v890_v35  ;;  %v4277_v37 = vpop.f32.mrb[41].mxu1 }
 0x7ac   :  { %v893_v39 = vpop.f32.mrb[42].mxu1 }
 0x7ad   :  { %v5468_v40 = vadd.f32 %v961_v18, %v893_v39  ;;  %v4278_v42 = vpop.f32.mrb[43].mxu1 }
 0x7b2   :  { %v898_v46 = vpop.f32.mrb[44].mxu1 }
 0x7b3   :  { %v5470_v47 = vadd.f32 %v966_v21, %v898_v46  ;;  %v4281_v28 = vpop.f32.mrb[45].mxu1 }
 0x7b4   :  { %v901_v31 = vpop.f32.mrb[46].mxu1 }
 0x7b5   :  { %v4282_v41 = vpop.f32.mrb[47].mxu1 }
 0x7ba   :  { %v1036_v48 = vpop.f32.mrb[48].mxu1 }
 0x7bb   :  { %v1058_v49 = vmul.f32 0.35355338, %v1036_v48  ;;  %v4305_v43 = vpop.f32.mrb[49].mxu1 }
 0x7bc   :  { %v1039_v44 = vpop.f32.mrb[50].mxu1 }
 0x7bd   :  { %v1059_v53 = vmul.f32 0.35355338, %v1039_v44  ;;  %v4306_v54 = vpop.f32.mrb[51].mxu1  ;;  %v1063_v56 = vadd.f32 %v1058_v49, %v5257_v19 }
 0x7bf   :  { %v1068_v52 = vsel %vm462_vm5, %v1063_v56, -inf  ;;  %v1064_v51 = vadd.f32 %v1059_v53, %v5262_v25 }
 0x7c0   :  { %1069 = vmax.xlane.f32.xlu1 %v1068_v52 }
 0x7c1   :  { %v1071_v58 = vsel %vm462_vm5, %v1064_v51, -inf }
 0x7c2   :  { %1072 = vmax.xlane.f32.xlu0 %v1071_v58  ;;  %v1044_v55 = vpop.f32.mrb[52].mxu1 }
 0x7c3   :  { %v1060_v60 = vmul.f32 0.35355338, %v1044_v55  ;;  %v4309_v63 = vpop.f32.mrb[53].mxu1 }
 0x7c4   :  { %v1047_v59 = vpop.f32.mrb[54].mxu1 }
 0x7c5   :  { %v1061_v2 = vmul.f32 0.35355338, %v1047_v59  ;;  %v4310_v3 = vpop.f32.mrb[55].mxu1  ;;  %v1065_v61 = vadd.f32 %v1060_v60, %v5277_v34 }
 0x7c7   :  { %v1074_v4 = vsel %vm462_vm5, %v1065_v61, -inf  ;;  %v1066_v5 = vadd.f32 %v1061_v2, %v5282_v38 }
 0x7c8   :  { %1075 = vmax.xlane.f32.xlu0 %v1074_v4 }
 0x7c9   :  { %v1077_v12 = vsel %vm462_vm5, %v1066_v5, -inf }
 0x7ca   :  { %v1052_v6 = vpop.f32.mrb[56].mxu1 }
 0x7cb   :  { %v1062_v8 = vmul.f32 0.35355338, %v1052_v6  ;;  %v4313_v11 = vpop.f32.mrb[57].mxu1 }
 0x7cc   :  { %1078 = vmax.xlane.f32.xlu0 %v1077_v12  ;;  %v1055_v7 = vpop.f32.mrb[58].mxu1 }
 0x7cd   :  { %v4314_v15 = vpop.f32.mrb[59].mxu1  ;;  %v1067_v16 = vadd.f32 %v1062_v8, %v5292_v45 }
 0x7cf   :  { %v1080_v17 = vsel %vm475_vm6, %v1067_v16, -inf }
 0x7d0   :  { %1081 = vmax.xlane.f32.xlu1 %v1080_v17 }
 0x7e1   :  { %1128 = vrot.lane.b32.xlu1 %v5201_v57, %s4994_s26 }
 0x7e2   :  { %1126 = vrot.lane.b32.xlu0 %v5197_v50, %s4994_s26 }
 0x7e5   :  { %1130 = vrot.lane.b32.xlu1 %v5207_v62, %s4994_s26 }
 0x84d   :  { %v1070_v18 = vpop.xlane.xlu1 %1069 }
 0x84e   :  { %v1083_v14 = vsub.f32 %v1063_v56, %v1070_v18 }
 0x84f   :  { %v1073_v21 = vpop.xlane.xlu0 %1072 }
 0x850   :  { %v1088_v9 = vmul.f32 1.442695, %v1083_v14  ;;  %v1084_v24 = vsub.f32 %v1064_v51, %v1073_v21 }
 0x852   :  { %4800 = vpow2.f32 %v1088_v9  ;;  %v1090_v26 = vmul.f32 1.442695, %v1084_v24 }
 0x854   :  { %4802 = vpow2.f32 %v1090_v26 }
 0x855   :  { %v1076_v27 = vpop.xlane.xlu0 %1075 }
 0x856   :  { %v1085_v1 = vsub.f32 %v1065_v61, %v1076_v27 }
 0x858   :  { %v1092_v30 = vmul.f32 1.442695, %v1085_v1 }
 0x859   :  { %v1079_v33 = vpop.xlane.xlu0 %1078 }
 0x85a   :  { %4804 = vpow2.f32 %v1092_v30  ;;  %v1086_v35 = vsub.f32 %v1066_v5, %v1079_v33 }
 0x85c   :  { %v4801_v37 = vpop.eup %4800  ;;  %v1094_v39 = vmul.f32 1.442695, %v1086_v35 }
 0x85d   :  { %v1127_v42 = vpop.permute.xlu0 %1126  ;;  %v1082_v46 = vpop.xlane.xlu1 %1081  ;;  %v1098_v28 = vsel %vm462_vm5, %v4801_v37, 0.0 }
 0x85e   :  { %v4803_v31 = vpop.eup %4802  ;;  %4806 = vpow2.f32 %v1094_v39  ;;  %v1087_v41 = vsub.f32 %v1067_v16, %v1082_v46  ;;  %1099 = vadd.xlane.f32.xlu0 %v1098_v28  ;;  %4316 = vmatpush3.bf16.msra.mxu0 %v1127_v42 }
 0x85f   :  { %v1101_v48 = vsel %vm462_vm5, %v4803_v31, 0.0  ;;  %4317 = vmatprep.subr.bf16.mxu0 %v4985_v0 }
 0x860   :  { %v1096_v49 = vmul.f32 1.442695, %v1087_v41  ;;  %1102 = vadd.xlane.f32.xlu1 %v1101_v48 }
 0x861   :  { %v1129_v43 = vpop.permute.xlu1 %1128 }
 0x862   :  { %4808 = vpow2.f32 %v1096_v49  ;;  %4318 = vmatpush3.bf16.msra.mxu0 %v1129_v43 }
 0x863   :  { %4319 = vmatprep.subr.bf16.mxu0 %v4985_v0 }
 0x864   :  { %v4805_v44 = vpop.eup %4804 }
 0x865   :  { %v1131_v53 = vpop.permute.xlu1 %1130  ;;  %v1104_v54 = vsel %vm462_vm5, %v4805_v44, 0.0 }
 0x866   :  { %v1144_v56 = vsel %vm539_vm7, %v1131_v53, 0  ;;  %1105 = vadd.xlane.f32.xlu0 %v1104_v54 }
 0x867   :  { %4320 = vmatpush3.bf16.msra.mxu0 %v1144_v56 }
 0x868   :  { %v4807_v52 = vpop.eup %4806  ;;  %4347 = vmatprep.subr.bf16.mxu0 %v4985_v0 }
 0x869   :  { %v1107_v51 = vsel %vm462_vm5, %v4807_v52, 0.0 }
 0x86a   :  { %1108 = vadd.xlane.f32.xlu1 %v1107_v51 }
 0x86c   :  { %v4809_v58 = vpop.eup %4808 }
 0x86d   :  { %v1110_v55 = vsel %vm475_vm6, %v4809_v58, 0.0 }
 0x86e   :  { %1111 = vadd.xlane.f32.xlu1 %v1110_v55 }
 0x87c   :  { %1284 = vrot.lane.b32.xlu0 %v5197_v50, %s6380_s27 }
 0x87f   :  { %1286 = vrot.lane.b32.xlu1 %v5201_v57, %s6380_s27 }
 0x880   :  { %1288 = vrot.lane.b32.xlu0 %v5207_v62, %s6380_s27 }
 0x883   :  { %1278 = vrot.lane.b32.xlu1 %v5197_v50, %s6378_s28 }
 0x884   :  { %1280 = vrot.lane.b32.xlu0 %v5201_v57, %s6378_s28 }
 0x887   :  { %1282 = vrot.lane.b32.xlu1 %v5207_v62, %s6378_s28 }
 0x8eb   :  { %v1100_v60 = vpop.xlane.xlu0 %1099 }
 0x8ec   :  { %4810 = vrcp.f32 %v1100_v60 }
 0x8ed   :  { %v1103_v63 = vpop.xlane.xlu1 %1102 }
 0x8ee   :  { %4812 = vrcp.f32 %v1103_v63 }
 0x8f3   :  { %v1106_v59 = vpop.xlane.xlu0 %1105 }
 0x8f4   :  { %4814 = vrcp.f32 %v1106_v59 }
 0x8f6   :  { %v4811_v2 = vpop.eup %4810 }
 0x8f7   :  { %v1109_v3 = vpop.xlane.xlu1 %1108  ;;  %v1118_v4 = vmul.f32 %v4811_v2, %v4801_v37  ;;  %v1285_v6 = vpop.permute.xlu0 %1284  ;;  %v366_v37 = vld [vmem:[%s6362_s8 + $0x8] sm:$0xf] }
 0x8f8   :  { %v4813_v61 = vpop.eup %4812  ;;  %4816 = vrcp.f32 %v1109_v3  ;;  %v1300_v12 = vsel %vm377_vm4, %v1285_v6, 0  ;;  %v1215_v39 = vsel %vm844_vm8, %v366_v37, 0 }
 0x8f9   :  { %v1119_v5 = vmul.f32 %v4813_v61, %v4803_v31  ;;  %4334 = vmatpush3.bf16.msra.mxu1 %v1215_v39 }
 0x8fa   :  { %4701 = vmatprep.subr.bf16.mxu1 %v4985_v0 }
 0x8fb   :  { %v1123_v8 = vpack.c.bf16 %v1119_v5, %v1118_v4  ;;  %v1112_v11 = vpop.xlane.xlu1 %1111  ;;  %v1289_v26 = vpop.permute.xlu0 %1288 }
 0x8fc   :  { %4818 = vrcp.f32 %v1112_v11  ;;  %v1306_v27 = vsel %vm377_vm4, %v1289_v26, 0 }
 0x8fd   :  { %4322 = vmatmul.mubr.msk.bf16.vlgmr.msra.gmra.mrb[48].mxu0 %vm462_vm5, %v1123_v8 }
 0x8fe   :  { %4348 = vmatpush3.bf16.xpose.msra.mxu0 %v1300_v12  ;;  %4325 = vmatprep.mubr.msk.bf16.mxu0 %vm4986_vm0, %v4985_v0  ;;  %v4815_v7 = vpop.eup %4814 }
 0x8ff   :  { %4349 = vmatprep.subr.bf16.mxu0 %v4985_v0  ;;  %v1287_v16 = vpop.permute.xlu1 %1286  ;;  %v1120_v17 = vmul.f32 %v4815_v7, %v4805_v44  ;;  %v1281_v33 = vpop.permute.xlu0 %1280 }
 0x900   :  { %v1303_v14 = vsel %vm377_vm4, %v1287_v16, 0 }
 0x902   :  { %v4817_v15 = vpop.eup %4816 }
 0x903   :  { %v1121_v18 = vmul.f32 %v4817_v15, %v4807_v52  ;;  %v1279_v30 = vpop.permute.xlu1 %1278 }
 0x905   :  { %v1124_v21 = vpack.c.bf16 %v1121_v18, %v1120_v17 }
 0x906   :  { %v4819_v9 = vpop.eup %4818  ;;  %4350 = vmatpush3.bf16.xpose.msra.mxu0 %v1303_v14 }
 0x907   :  { %4326 = vmatmul.mubr.msk.bf16.gmra.mrb[52].mxu0 %vm462_vm5, %v1124_v21  ;;  %4351 = vmatprep.subr.bf16.mxu0 %v4985_v0  ;;  %v1122_v24 = vmul.f32 %v4819_v9, %v4809_v58  ;;  %v1283_v35 = vpop.permute.xlu1 %1282 }
 0x908   :  { %4329 = vmatprep.mubr.msk.bf16.mxu0 %vm4986_vm0, %v4985_v0 }
 0x909   :  { %v1125_v1 = vpack.c.bf16 %v1122_v24, %v1122_v24 }
 0x90e   :  { %4352 = vmatpush3.bf16.xpose.msra.mxu0 %v1306_v27 }
 0x90f   :  { %4330 = vmatmul.mubr.msk.bf16.gmra.mrb[56].mxu0 %vm462_vm5, %v1125_v1  ;;  %4365 = vmatprep.subr.bf16.mxu0 %v4985_v0 }
 0x910   :  { %4353 = vmatprep.mubr.msk.bf16.mxu0 %vm4986_vm0, %v4985_v0 }
 0x917   :  { %4354 = vmatmul.mubr.msk.bf16.vlgmr.msra.gmra.mrb[60].mxu0 %vm377_vm4, %v1279_v30 }
 0x918   :  { %4357 = vmatprep.mubr.msk.bf16.mxu0 %vm4986_vm0, %v4985_v0 }
 0x91f   :  { %4358 = vmatmul.mubr.msk.bf16.gmra.mrb[64].mxu0 %vm377_vm4, %v1281_v33 }
 0x920   :  { %4361 = vmatprep.mubr.msk.bf16.mxu0 %vm4986_vm0, %v4985_v0 }
 0x927   :  { %4362 = vmatmul.mubr.msk.bf16.gmra.mrb[68].mxu0 %vm377_vm4, %v1283_v35 }
 0x928   :  { %4371 = vmatprep.mubr.msk.bf16.mxu0 %vm4986_vm0, %v4985_v0 }
 0x9d0   :  { %v1180_v42 = vpop.f32.mrb[48].mxu0 }
 0x9d1   :  { %v4323_v46 = vpop.f32.mrb[49].mxu0 }
 0x9d2   :  { %v1183_v28 = vpop.f32.mrb[50].mxu0 }
 0x9d3   :  { %v1202_v31 = vpack.c.bf16 %v1183_v28, %v1180_v42  ;;  %v4324_v41 = vpop.f32.mrb[51].mxu0 }
 0x9d5   :  { %4336 = vmatmul.mubr.msk.bf16.vlgmr.msra.gmra.mrb[60].mxu1 %vm377_vm4, %v1202_v31 }
 0x9d6   :  { %4339 = vmatprep.mubr.msk.bf16.mxu1 %vm4986_vm0, %v4985_v0 }
 0x9da   :  { %v1188_v48 = vpop.f32.mrb[52].mxu0 }
 0x9db   :  { %v4327_v49 = vpop.f32.mrb[53].mxu0 }
 0x9dc   :  { %v1191_v43 = vpop.f32.mrb[54].mxu0 }
 0x9dd   :  { %v1203_v44 = vpack.c.bf16 %v1191_v43, %v1188_v48  ;;  %v4328_v53 = vpop.f32.mrb[55].mxu0 }
 0x9df   :  { %4340 = vmatmul.mubr.msk.bf16.gmra.mrb[64].mxu1 %vm377_vm4, %v1203_v44 }
 0x9e0   :  { %4343 = vmatprep.mubr.msk.bf16.mxu1 %vm4986_vm0, %v4985_v0 }
 0x9e2   :  { %v1196_v54 = vpop.f32.mrb[56].mxu0 }
 0x9e3   :  { %v4331_v56 = vpop.f32.mrb[57].mxu0  ;;  %v1204_v51 = vpack.c.bf16 %v1196_v54, %v1196_v54 }
 0x9e4   :  { %v1199_v52 = vpop.f32.mrb[58].mxu0 }
 0x9e5   :  { %v4332_v58 = vpop.f32.mrb[59].mxu0 }
 0x9e7   :  { %4344 = vmatmul.mubr.msk.bf16.gmra.mrb[68].mxu1 %vm377_vm4, %v1204_v51 }
 0x9e8   :  { %4375 = vmatprep.mubr.msk.bf16.mxu1 %vm4986_vm0, %v4985_v0 }
 0x9ea   :  { %v1342_v55 = vpop.f32.mrb[60].mxu0 }
 0x9eb   :  { %v1364_v60 = vmul.f32 0.35355338, %v1342_v55  ;;  %v4355_v63 = vpop.f32.mrb[61].mxu0 }
 0x9ec   :  { %v1345_v59 = vpop.f32.mrb[62].mxu0 }
 0x9ed   :  { %v1365_v2 = vmul.f32 0.35355338, %v1345_v59  ;;  %v4356_v3 = vpop.f32.mrb[63].mxu0  ;;  %v1369_v61 = vadd.f32 %v1364_v60, %v5257_v19 }
 0x9ef   :  { %v1374_v4 = vsel %vm462_vm5, %v1369_v61, -inf  ;;  %v1370_v5 = vadd.f32 %v1365_v2, %v5262_v25 }
 0x9f0   :  { %1375 = vmax.xlane.f32.xlu0 %v1374_v4 }
 0x9f1   :  { %v1377_v6 = vsel %vm462_vm5, %v1370_v5, -inf }
 0x9f2   :  { %1378 = vmax.xlane.f32.xlu1 %v1377_v6  ;;  %v1350_v8 = vpop.f32.mrb[64].mxu0 }
 0x9f3   :  { %v1366_v11 = vmul.f32 0.35355338, %v1350_v8  ;;  %v4359_v12 = vpop.f32.mrb[65].mxu0 }
 0x9f4   :  { %v1353_v7 = vpop.f32.mrb[66].mxu0 }
 0x9f5   :  { %v1367_v15 = vmul.f32 0.35355338, %v1353_v7  ;;  %v4360_v16 = vpop.f32.mrb[67].mxu0  ;;  %v1371_v17 = vadd.f32 %v1366_v11, %v5277_v34 }
 0x9f7   :  { %v1380_v18 = vsel %vm462_vm5, %v1371_v17, -inf  ;;  %v1372_v19 = vadd.f32 %v1367_v15, %v5282_v38 }
 0x9f8   :  { %1381 = vmax.xlane.f32.xlu0 %v1380_v18 }
 0x9f9   :  { %v1383_v9 = vsel %vm462_vm5, %v1372_v19, -inf }
 0x9fa   :  { %v1358_v14 = vpop.f32.mrb[68].mxu0 }
 0x9fb   :  { %v1368_v21 = vmul.f32 0.35355338, %v1358_v14  ;;  %v4363_v25 = vpop.f32.mrb[69].mxu0 }
 0x9fc   :  { %1384 = vmax.xlane.f32.xlu0 %v1383_v9  ;;  %v1361_v24 = vpop.f32.mrb[70].mxu0 }
 0x9fd   :  { %v4364_v26 = vpop.f32.mrb[71].mxu0  ;;  %v1373_v27 = vadd.f32 %v1368_v21, %v5292_v45 }
 0x9ff   :  { %v1386_v1 = vsel %vm475_vm6, %v1373_v27, -inf }
 0xa00   :  { %1387 = vmax.xlane.f32.xlu0 %v1386_v1 }
 0xa03   :  { %1432 = vrot.lane.b32.xlu1 %v5197_v50, %s6376_s23 }
 0xa7d   :  { %v1376_v34 = vpop.xlane.xlu0 %1375 }
 0xa7e   :  { %v1389_v38 = vsub.f32 %v1369_v61, %v1376_v34 }
 0xa7f   :  { %v1379_v30 = vpop.xlane.xlu1 %1378 }
 0xa80   :  { %v1394_v33 = vmul.f32 1.442695, %v1389_v38  ;;  %v1390_v35 = vsub.f32 %v1370_v5, %v1379_v30 }
 0xa82   :  { %4820 = vpow2.f32 %v1394_v33  ;;  %v1396_v37 = vmul.f32 1.442695, %v1390_v35 }
 0xa83   :  { %v1433_v39 = vpop.permute.xlu1 %1432 }
 0xa84   :  { %4822 = vpow2.f32 %v1396_v37  ;;  %4366 = vmatpush3.bf16.msra.mxu0 %v1433_v39  ;;  %4704 = vmatpush3.bf16.msra.mxu1 %v1433_v39  ;;  %v367_v39 = vld [vmem:[%s6362_s8 + $0xc] sm:$0xf] }
 0xa85   :  { %v1382_v42 = vpop.xlane.xlu0 %1381  ;;  %4367 = vmatprep.subr.bf16.mxu0 %v4985_v0  ;;  %4702 = vmatprep.subr.bf16.mxu1 %v4985_v0 }
 0xa86   :  { %v1391_v45 = vsub.f32 %v1371_v17, %v1382_v42  ;;  %v1521_v42 = vsel %vm844_vm8, %v367_v39, 0 }
 0xa88   :  { %v1398_v46 = vmul.f32 1.442695, %v1391_v45 }
 0xa89   :  { %v1385_v28 = vpop.xlane.xlu0 %1384 }
 0xa8a   :  { %4824 = vpow2.f32 %v1398_v46  ;;  %v1392_v50 = vsub.f32 %v1372_v19, %v1385_v28 }
 0xa8c   :  { %v4821_v31 = vpop.eup %4820  ;;  %v1400_v41 = vmul.f32 1.442695, %v1392_v50 }
 0xa8d   :  { %v1404_v48 = vsel %vm462_vm5, %v4821_v31, 0.0  ;;  %v1388_v59 = vpop.xlane.xlu0 %1387 }
 0xa8e   :  { %v4823_v49 = vpop.eup %4822  ;;  %4826 = vpow2.f32 %v1400_v41  ;;  %1405 = vadd.xlane.f32.xlu1 %v1404_v48  ;;  %v1393_v4 = vsub.f32 %v1373_v27, %v1388_v59 }
 0xa8f   :  { %v1407_v43 = vsel %vm462_vm5, %v4823_v49, 0.0 }
 0xa90   :  { %1408 = vadd.xlane.f32.xlu0 %v1407_v43  ;;  %v1402_v6 = vmul.f32 1.442695, %v1393_v4 }
 0xa92   :  { %4828 = vpow2.f32 %v1402_v6 }
 0xa94   :  { %v4825_v44 = vpop.eup %4824 }
 0xa95   :  { %v1410_v53 = vsel %vm462_vm5, %v4825_v44, 0.0 }
 0xa96   :  { %1411 = vadd.xlane.f32.xlu1 %v1410_v53 }
 0xa98   :  { %v4827_v54 = vpop.eup %4826 }
 0xa99   :  { %v1413_v56 = vsel %vm462_vm5, %v4827_v54, 0.0 }
 0xa9a   :  { %1414 = vadd.xlane.f32.xlu0 %v1413_v56 }
 0xa9c   :  { %v4829_v7 = vpop.eup %4828 }
 0xaa7   :  { %1436 = vrot.lane.b32.xlu1 %v5207_v62, %s6376_s23 }
 0xaa8   :  { %v1251_v52 = vpop.f32.mrb[60].mxu1 }
 0xaa9   :  { %v5568_v51 = vadd.f32 %v1251_v52, %v5462_v32  ;;  %v4337_v58 = vpop.f32.mrb[61].mxu1 }
 0xaaa   :  { %v1254_v55 = vpop.f32.mrb[62].mxu1 }
 0xaab   :  { %v5571_v60 = vadd.f32 %v1254_v55, %v5464_v22  ;;  %v4338_v63 = vpop.f32.mrb[63].mxu1 }
 0xab0   :  { %1434 = vrot.lane.b32.xlu0 %v5201_v57, %s6376_s23 }
 0xab2   :  { %v1259_v2 = vpop.f32.mrb[64].mxu1 }
 0xab3   :  { %v5576_v3 = vadd.f32 %v1259_v2, %v5466_v36  ;;  %v4341_v61 = vpop.f32.mrb[65].mxu1  ;;  %v1416_v36 = vsel %vm475_vm6, %v4829_v7, 0.0  ;;  %v3869_v2 = vld [vmem:[%s6363_s9] ss:$0 sm:$0xff] }
 0xab4   :  { %v1262_v62 = vpop.f32.mrb[66].mxu1 }
 0xab5   :  { %v5579_v32 = vadd.f32 %v1262_v62, %v5468_v40  ;;  %v4342_v5 = vpop.f32.mrb[67].mxu1 }
 0xaba   :  { %v1267_v8 = vpop.f32.mrb[68].mxu1 }
 0xabb   :  { %v5582_v22 = vadd.f32 %v1267_v8, %v5470_v47  ;;  %v4345_v11 = vpop.f32.mrb[69].mxu1 }
 0xabc   :  { %v1270_v12 = vpop.f32.mrb[70].mxu1 }
 0xabd   :  { %v4346_v57 = vpop.f32.mrb[71].mxu1 }
 0xacb   :  { %1417 = vadd.xlane.f32.xlu1 %v1416_v36 }
 0xb1b   :  { %v1406_v16 = vpop.xlane.xlu1 %1405 }
 0xb1d   :  { %v1409_v15 = vpop.xlane.xlu0 %1408 }
 0xb1e   :  { %4830 = vrcp.f32 %v1409_v15 }
 0xb1f   :  { %4832 = vrcp.f32 %v1406_v16 }
 0xb23   :  { %v1412_v40 = vpop.xlane.xlu1 %1411 }
 0xb24   :  { %4834 = vrcp.f32 %v1412_v40 }
 0xb27   :  { %v1415_v17 = vpop.xlane.xlu0 %1414  ;;  %v1437_v14 = vpop.permute.xlu1 %1436 }
 0xb28   :  { %4836 = vrcp.f32 %v1415_v17  ;;  %v4831_v18 = vpop.eup %4830  ;;  %v1450_v9 = vsel %vm539_vm7, %v1437_v14, 0 }
 0xb29   :  { %v4833_v47 = vpop.eup %4832  ;;  %v1425_v21 = vmul.f32 %v4831_v18, %v4823_v49 }
 0xb2a   :  { %v1424_v25 = vmul.f32 %v4833_v47, %v4821_v31 }
 0xb2b   :  { %v1435_v19 = vpop.permute.xlu0 %1434 }
 0xb2c   :  { %4368 = vmatpush3.bf16.msra.mxu0 %v1435_v19  ;;  %4705 = vmatpush3.bf16.msra.mxu1 %v1435_v19  ;;  %v1429_v26 = vpack.c.bf16 %v1425_v21, %v1424_v25 }
 0xb2d   :  { %4369 = vmatprep.subr.bf16.mxu0 %v4985_v0  ;;  %4703 = vmatprep.subr.bf16.mxu1 %v4985_v0 }
 0xb2e   :  { %v4835_v24 = vpop.eup %4834 }
 0xb2f   :  { %v1426_v1 = vmul.f32 %v4835_v24, %v4825_v44 }
 0xb30   :  { %4370 = vmatpush3.bf16.msra.mxu0 %v1450_v9  ;;  %4706 = vmatpush3.bf16.msra.mxu1 %v1450_v9 }
 0xb31   :  { %4383 = vmatprep.subr.bf16.mxu0 %v4985_v0  ;;  %4397 = vmatprep.subr.bf16.mxu1 %v4985_v0 }
 0xb32   :  { %v4837_v27 = vpop.eup %4836 }
 0xb33   :  { %v1427_v34 = vmul.f32 %v4837_v27, %v4827_v54  ;;  %4372 = vmatmul.mubr.msk.bf16.vlgmr.msra.gmra.mrb[72].mxu0 %vm462_vm5, %v1429_v26 }
 0xb34   :  { %4385 = vmatprep.mubr.msk.bf16.mxu0 %vm4986_vm0, %v4985_v0  ;;  %4384 = vmatpush3.bf16.msra.mxu0 %v1521_v42 }
 0xb35   :  { %v1430_v38 = vpack.c.bf16 %v1427_v34, %v1426_v1  ;;  %4413 = vmatprep.subr.bf16.mxu0 %v4985_v0 }
 0xb37   :  { %4376 = vmatmul.mubr.msk.bf16.vlgmr.msra.gmra.mrb[72].mxu1 %vm462_vm5, %v1430_v38 }
 0xb38   :  { %4379 = vmatprep.mubr.msk.bf16.mxu1 %vm4986_vm0, %v4985_v0 }
 0xb58   :  { %v1418_v30 = vpop.xlane.xlu1 %1417 }
 0xb59   :  { %4838 = vrcp.f32 %v1418_v30 }
 0xb63   :  { %v4839_v33 = vpop.eup %4838 }
 0xb64   :  { %v1428_v35 = vmul.f32 %v4839_v33, %v4829_v7 }
 0xb66   :  { %v1431_v37 = vpack.c.bf16 %v1428_v35, %v1428_v35 }
 0xb68   :  { %4380 = vmatmul.mubr.msk.bf16.gmra.mrb[76].mxu1 %vm462_vm5, %v1431_v37 }
 0xb69   :  { %4401 = vmatprep.mubr.msk.bf16.mxu1 %vm4986_vm0, %v4985_v0 }
 0xc06   :  { %v1486_v45 = vpop.f32.mrb[72].mxu0 }
 0xc07   :  { %v4373_v46 = vpop.f32.mrb[73].mxu0 }
 0xc08   :  { %v1489_v28 = vpop.f32.mrb[74].mxu0 }
 0xc09   :  { %v1508_v50 = vpack.c.bf16 %v1489_v28, %v1486_v45  ;;  %v4374_v31 = vpop.f32.mrb[75].mxu0 }
 0xc0a   :  { %v1494_v41 = vpop.f32.mrb[72].mxu1 }
 0xc0b   :  { %v4377_v48 = vpop.f32.mrb[73].mxu1  ;;  %4386 = vmatmul.mubr.msk.bf16.vlgmr.msra.gmra.mrb[76].mxu0 %vm377_vm4, %v1508_v50 }
 0xc0c   :  { %v1497_v49 = vpop.f32.mrb[74].mxu1  ;;  %4389 = vmatprep.mubr.msk.bf16.mxu0 %vm4986_vm0, %v4985_v0  ;;  %v4729_v48 = vld [vmem:[%s6364_s12 + $0x8] sm:$0xff]  }
 0xc0d   :  { %v1509_v43 = vpack.c.bf16 %v1497_v49, %v1494_v41  ;;  %v4378_v44 = vpop.f32.mrb[75].mxu1  ;;  %v4728_v41 = vld [vmem:[%s6364_s12] sm:$0xff]  }
 0xc0e   :  { %4398 = vmatpush3.bf16.msra.mxu1 %v4728_v41 }
 0xc0f   :  { %4399 = vmatprep.subr.bf16.mxu1 %v4985_v0 }
 0xc12   :  { %4400 = vmatpush3.bf16.msra.mxu1 %v4729_v48 }
 0xc13   :  { %4390 = vmatmul.mubr.msk.bf16.gmra.mrb[80].mxu0 %vm377_vm4, %v1509_v43  ;;  %4441 = vmatprep.subr.bf16.mxu1 %v4985_v0 }
 0xc14   :  { %4393 = vmatprep.mubr.msk.bf16.mxu0 %vm4986_vm0, %v4985_v0 }
 0xc3b   :  { %v1502_v53 = vpop.f32.mrb[76].mxu1 }
 0xc3c   :  { %v1510_v54 = vpack.c.bf16 %v1502_v53, %v1502_v53  ;;  %v4381_v56 = vpop.f32.mrb[77].mxu1 }
 0xc3d   :  { %v1505_v52 = vpop.f32.mrb[78].mxu1  ;;  %v4730_v56 = vld [vmem:[%s6365_s14] sm:$0xff]  }
 0xc3e   :  { %v4382_v58 = vpop.f32.mrb[79].mxu1  ;;  %4394 = vmatmul.mubr.msk.bf16.gmra.mrb[84].mxu0 %vm377_vm4, %v1510_v54  ;;  %v4731_v52 = vld [vmem:[%s6365_s14 + $0x8] sm:$0xff]  }
 0xc3f   :  { %4429 = vmatprep.mubr.msk.bf16.mxu0 %vm4986_vm0, %v4985_v0  ;;  %4414 = vmatpush3.bf16.msra.mxu0 %v4730_v56 }
 0xc40   :  { %4415 = vmatprep.subr.bf16.mxu0 %v4985_v0 }
 0xc43   :  { %4416 = vmatpush3.bf16.msra.mxu0 %v4731_v52 }
 0xc44   :  { %4417 = vmatprep.subr.bf16.mxu0 %v4985_v0 }
 0xcde   :  { %v1557_v55 = vpop.f32.mrb[76].mxu0 }
 0xcdf   :  { %v1579_v63 = vadd.f32 %v1557_v55, %v5568_v51  ;;  %v4387_v59 = vpop.f32.mrb[77].mxu0 }
 0xce0   :  { %v1560_v61 = vpop.f32.mrb[78].mxu0 }
 0xce1   :  { %v1584_v62 = vadd.f32 %v1579_v63, %v5132_v10  ;;  %v1580_v4 = vadd.f32 %v1560_v61, %v5571_v60  ;;  %v4388_v5 = vpop.f32.mrb[79].mxu0 }
 0xce3   :  { %v5619_v6 = vadd.f32 %v3869_v2, %v1584_v62  ;;  %v1585_v8 = vadd.f32 %v1580_v4, %v5134_v13 }
 0xce5   :  { %v5622_v11 = vadd.f32 %v3869_v2, %v1585_v8  ;;  %v1603_v51 = vsel %vm180_vm2, %v5619_v6, 0.0 }
 0xce6   :  { %1604 = vadd.xlane.f32.xlu0 %v1603_v51  ;;  %v1565_v12 = vpop.f32.mrb[80].mxu0 }
 0xce7   :  { %v1581_v57 = vadd.f32 %v1565_v12, %v5576_v3  ;;  %v4391_v7 = vpop.f32.mrb[81].mxu0  ;;  %v1606_v16 = vsel %vm180_vm2, %v5622_v11, 0.0 }
 0xce8   :  { %v1568_v36 = vpop.f32.mrb[82].mxu0 }
 0xce9   :  { %v1586_v10 = vadd.f32 %v1581_v57, %v5146_v20  ;;  %v1582_v60 = vadd.f32 %v1568_v36, %v5579_v32  ;;  %v4392_v15 = vpop.f32.mrb[83].mxu0  ;;  %v3870_v36 = vld [vmem:[%s6366_s10] ss:$0 sm:$0xff] }
 0xcea   :  { %1607 = vadd.xlane.f32.xlu0 %v1606_v16  ;;  %v3871_v16 = vld [vmem:[%s6367_s11] ss:$0 sm:$0xff] }
 0xceb   :  { %v5631_v13 = vadd.f32 %v3869_v2, %v1586_v10  ;;  %v1587_v40 = vadd.f32 %v1582_v60, %v5148_v23 }
 0xced   :  { %v5634_v17 = vadd.f32 %v3869_v2, %v1587_v40  ;;  %v1609_v3 = vsel %vm180_vm2, %v5631_v13, 0.0 }
 0xcee   :  { %1610 = vadd.xlane.f32.xlu1 %v1609_v3 }
 0xcef   :  { %v1612_v20 = vsel %vm180_vm2, %v5634_v17, 0.0 }
 0xcf0   :  { %1613 = vadd.xlane.f32.xlu0 %v1612_v20 }
 0xd11   :  { %v1573_v32 = vpop.f32.mrb[84].mxu0 }
 0xd12   :  { %v1583_v18 = vadd.f32 %v1573_v32, %v5582_v22  ;;  %v4395_v19 = vpop.f32.mrb[85].mxu0 }
 0xd13   :  { %v1576_v47 = vpop.f32.mrb[86].mxu0 }
 0xd14   :  { %v1588_v14 = vadd.f32 %v1583_v18, %v5157_v29  ;;  %v4396_v21 = vpop.f32.mrb[87].mxu0 }
 0xd16   :  { %v5642_v25 = vadd.f32 %v3869_v2, %v1588_v14 }
 0xd18   :  { %v1615_v23 = vsel %vm193_vm3, %v5642_v25, 0.0 }
 0xd19   :  { %1616 = vadd.xlane.f32.xlu1 %v1615_v23 }
 0xd73   :  { %v1605_v9 = vpop.xlane.xlu0 %1604 }
 0xd74   :  { %v1618_v24 = vmul.f32 0.03125, %v1605_v9 }
 0xd76   :  { %v1623_v26 = vsub.f32 %v5619_v6, %v1618_v24 }
 0xd77   :  { %v1608_v27 = vpop.xlane.xlu0 %1607 }
 0xd78   :  { %v1619_v1 = vmul.f32 0.03125, %v1608_v27  ;;  %v1628_v34 = vmul.f32 %v1623_v26, %v1623_v26 }
 0xd7a   :  { %v1624_v22 = vsub.f32 %v5622_v11, %v1619_v1  ;;  %v1633_v38 = vsel %vm180_vm2, %v1628_v34, 0.0 }
 0xd7b   :  { %v1611_v30 = vpop.xlane.xlu1 %1610  ;;  %1634 = vadd.xlane.f32.xlu0 %v1633_v38 }
 0xd7c   :  { %v1620_v29 = vmul.f32 0.03125, %v1611_v30  ;;  %v1629_v33 = vmul.f32 %v1624_v22, %v1624_v22 }
 0xd7d   :  { %v1614_v35 = vpop.xlane.xlu0 %1613 }
 0xd7e   :  { %v1625_v37 = vsub.f32 %v5631_v13, %v1620_v29  ;;  %v1621_v39 = vmul.f32 0.03125, %v1614_v35  ;;  %v1636_v42 = vsel %vm180_vm2, %v1629_v33, 0.0  ;;  %v4732_v35 = vld [vmem:[%s6365_s14 + $0x10] sm:$0xff]  }
 0xd7f   :  { %1637 = vadd.xlane.f32.xlu1 %v1636_v42  ;;  %4418 = vmatpush3.bf16.msra.mxu0 %v4732_v35  ;;  %v4735_v42 = vld [vmem:[%s6365_s14 + $0x28] sm:$0xff]  }
 0xd80   :  { %v1626_v45 = vsub.f32 %v5634_v17, %v1621_v39  ;;  %v1630_v46 = vmul.f32 %v1625_v37, %v1625_v37  ;;  %4419 = vmatprep.subr.bf16.mxu0 %v4985_v0  ;;  %v4734_v39 = vld [vmem:[%s6365_s14 + $0x20] sm:$0xff]  }
 0xd82   :  { %v1639_v28 = vsel %vm180_vm2, %v1630_v46, 0.0  ;;  %v1631_v50 = vmul.f32 %v1626_v45, %v1626_v45  ;;  %v4737_v46 = vld [vmem:[%s6365_s14 + $0x38] sm:$0xff]  }
 0xd83   :  { %1640 = vadd.xlane.f32.xlu0 %v1639_v28  ;;  %v3872_v28 = vld [vmem:[%s6368_s13] ss:$0 sm:$0xff] }
 0xd84   :  { %v1642_v31 = vsel %vm180_vm2, %v1631_v50, 0.0 }
 0xd85   :  { %1643 = vadd.xlane.f32.xlu1 %v1642_v31 }
 0xda6   :  { %v1617_v49 = vpop.xlane.xlu1 %1616 }
 0xda7   :  { %v1622_v43 = vmul.f32 0.03125, %v1617_v49 }
 0xda9   :  { %v1627_v44 = vsub.f32 %v5642_v25, %v1622_v43 }
 0xdab   :  { %v1632_v53 = vmul.f32 %v1627_v44, %v1627_v44 }
 0xdad   :  { %v1645_v54 = vsel %vm193_vm3, %v1632_v53, 0.0 }
 0xdae   :  { %1646 = vadd.xlane.f32.xlu0 %v1645_v54 }
 0xe08   :  { %v1635_v58 = vpop.xlane.xlu0 %1634 }
 0xe09   :  { %v1648_v55 = vmul.f32 0.03125, %v1635_v58 }
 0xe0b   :  { %v1653_v63 = vadd.f32 1e-06, %v1648_v55 }
 0xe0c   :  { %v1638_v59 = vpop.xlane.xlu1 %1637 }
 0xe0d   :  { %4840 = vrsqrt.f32 %v1653_v63  ;;  %v1649_v2 = vmul.f32 0.03125, %v1638_v59 }
 0xe0f   :  { %v1654_v61 = vadd.f32 1e-06, %v1649_v2 }
 0xe10   :  { %v1641_v62 = vpop.xlane.xlu0 %1640 }
 0xe11   :  { %4842 = vrsqrt.f32 %v1654_v61  ;;  %v1650_v4 = vmul.f32 0.03125, %v1641_v62 }
 0xe12   :  { %v1644_v5 = vpop.xlane.xlu1 %1643 }
 0xe13   :  { %v1655_v8 = vadd.f32 1e-06, %v1650_v4  ;;  %v1651_v51 = vmul.f32 0.03125, %v1644_v5 }
 0xe15   :  { %4844 = vrsqrt.f32 %v1655_v8  ;;  %v1656_v12 = vadd.f32 1e-06, %v1651_v51 }
 0xe17   :  { %v4841_v57 = vpop.eup %4840  ;;  %4846 = vrsqrt.f32 %v1656_v12 }
 0xe18   :  { %v1663_v7 = vmul.f32 %v4841_v57, %v1623_v26 }
 0xe1a   :  { %v1674_v60 = vmul.f32 %v3870_v36, %v1663_v7 }
 0xe1b   :  { %v4843_v10 = vpop.eup %4842 }
 0xe1c   :  { %v1664_v15 = vmul.f32 %v4843_v10, %v1624_v22  ;;  %v1685_v20 = vadd.f32 %v3871_v16, %v1674_v60 }
 0xe1e   :  { %v1675_v40 = vmul.f32 %v3870_v36, %v1664_v15 }
 0xe1f   :  { %v4845_v3 = vpop.eup %4844 }
 0xe20   :  { %v1686_v32 = vadd.f32 %v3871_v16, %v1675_v40  ;;  %v1665_v18 = vmul.f32 %v4845_v3, %v1625_v37  ;;  %v4733_v37 = vld [vmem:[%s6365_s14 + $0x18] sm:$0xff]  }
 0xe21   :  { %v4847_v19 = vpop.eup %4846  ;;  %4420 = vmatpush3.bf16.msra.mxu0 %v4733_v37 }
 0xe22   :  { %v1690_v47 = vpack.c.bf16 %v1686_v32, %v1685_v20  ;;  %v1666_v14 = vmul.f32 %v4847_v19, %v1626_v45  ;;  %v1676_v21 = vmul.f32 %v3870_v36, %v1665_v18  ;;  %4421 = vmatprep.subr.bf16.mxu0 %v4985_v0  ;;  %v4736_v45 = vld [vmem:[%s6365_s14 + $0x30] sm:$0xff]  }
 0xe24   :  { %4402 = vmatmul.mubr.msk.bf16.vlgmr.msra.gmra.mrb[80].mxu1 %vm180_vm2, %v1690_v47  ;;  %v1677_v23 = vmul.f32 %v3870_v36, %v1666_v14  ;;  %v1687_v24 = vadd.f32 %v3871_v16, %v1676_v21 }
 0xe25   :  { %4405 = vmatprep.mubr.msk.bf16.mxu1 %vm4986_vm0, %v4985_v0  ;;  %4422 = vmatpush3.bf16.msra.mxu0 %v4734_v39 }
 0xe26   :  { %v1688_v9 = vadd.f32 %v3871_v16, %v1677_v23  ;;  %4423 = vmatprep.subr.bf16.mxu0 %v4985_v0 }
 0xe28   :  { %v1691_v26 = vpack.c.bf16 %v1688_v9, %v1687_v24 }
 0xe29   :  { %4424 = vmatpush3.bf16.msra.mxu0 %v4735_v42 }
 0xe2a   :  { %4425 = vmatprep.subr.bf16.mxu0 %v4985_v0 }
 0xe2c   :  { %4406 = vmatmul.mubr.msk.bf16.gmra.mrb[84].mxu1 %vm180_vm2, %v1691_v26 }
 0xe2d   :  { %4409 = vmatprep.mubr.msk.bf16.mxu1 %vm4986_vm0, %v4985_v0  ;;  %4426 = vmatpush3.bf16.msra.mxu0 %v4736_v45 }
 0xe2e   :  { %4427 = vmatprep.subr.bf16.mxu0 %v4985_v0 }
 0xe31   :  { %4428 = vmatpush3.bf16.msra.mxu0 %v4737_v46 }
 0xe32   :  { %4457 = vmatprep.subr.bf16.mxu0 %v4985_v0 }
 0xe3b   :  { %v1647_v27 = vpop.xlane.xlu0 %1646 }
 0xe3c   :  { %v1652_v1 = vmul.f32 0.03125, %v1647_v27 }
 0xe3e   :  { %v1657_v34 = vadd.f32 1e-06, %v1652_v1 }
 0xe40   :  { %4848 = vrsqrt.f32 %v1657_v34 }
 0xe4a   :  { %v4849_v22 = vpop.eup %4848 }
 0xe4b   :  { %v1667_v38 = vmul.f32 %v4849_v22, %v1627_v44  ;;  %v3886_v22 = vld [vmem:[%s6369_s15] ss:$0 sm:$0xff] }
 0xe4d   :  { %v1678_v30 = vmul.f32 %v3870_v36, %v1667_v38 }
 0xe4f   :  { %v1689_v29 = vadd.f32 %v3871_v16, %v1678_v30 }
 0xe51   :  { %v1692_v33 = vpack.c.bf16 %v1689_v29, %v1689_v29 }
 0xe53   :  { %4410 = vmatmul.mubr.msk.bf16.gmra.mrb[88].mxu1 %vm180_vm2, %v1692_v33 }
 0xe54   :  { %4445 = vmatprep.mubr.msk.bf16.mxu1 %vm4986_vm0, %v4985_v0 }
 0xef7   :  { %v1759_v50 = vpop.f32.mrb[80].mxu1 }
 0xef8   :  { %v1760_v31 = vadd.f32 %v3872_v28, %v1759_v50  ;;  %v4403_v41 = vpop.f32.mrb[81].mxu1 }
 0xef9   :  { %v1762_v48 = vpop.f32.mrb[82].mxu1 }
 0xefa   :  { %v1786_v49 = vmul.f32 0.70710677, %v1760_v31  ;;  %v1763_v43 = vadd.f32 %v3872_v28, %v1762_v48  ;;  %v4404_v44 = vpop.f32.mrb[83].mxu1  ;;  %v1781_v5 = vmul.f32 0.5, %v1760_v31 }
 0xefc   :  { %4850 = verf.f32 %v1786_v49  ;;  %v1787_v53 = vmul.f32 0.70710677, %v1763_v43  ;;  %v1782_v8 = vmul.f32 0.5, %v1763_v43 }
 0xefe   :  { %4852 = verf.f32 %v1787_v53 }
 0xeff   :  { %v1767_v54 = vpop.f32.mrb[84].mxu1 }
 0xf00   :  { %v1768_v56 = vadd.f32 %v3872_v28, %v1767_v54  ;;  %v4407_v52 = vpop.f32.mrb[85].mxu1 }
 0xf01   :  { %v1770_v58 = vpop.f32.mrb[86].mxu1 }
 0xf02   :  { %v1788_v55 = vmul.f32 0.70710677, %v1768_v56  ;;  %v1771_v63 = vadd.f32 %v3872_v28, %v1770_v58  ;;  %v4408_v59 = vpop.f32.mrb[87].mxu1  ;;  %v1783_v15 = vmul.f32 0.5, %v1768_v56 }
 0xf04   :  { %4854 = verf.f32 %v1788_v55  ;;  %v1789_v2 = vmul.f32 0.70710677, %v1771_v63  ;;  %v1784_v16 = vmul.f32 0.5, %v1771_v63 }
 0xf06   :  { %v4851_v61 = vpop.eup %4850  ;;  %4856 = verf.f32 %v1789_v2 }
 0xf07   :  { %v1796_v62 = vadd.f32 1.0, %v4851_v61 }
 0xf08   :  { %v4853_v4 = vpop.eup %4852 }
 0xf09   :  { %v1797_v51 = vadd.f32 1.0, %v4853_v4  ;;  %v1801_v12 = vmul.f32 %v1796_v62, %v1781_v5 }
 0xf0b   :  { %v1802_v57 = vmul.f32 %v1797_v51, %v1782_v8 }
 0xf0d   :  { %v1806_v7 = vpack.c.bf16 %v1802_v57, %v1801_v12 }
 0xf0e   :  { %v4855_v36 = vpop.eup %4854 }
 0xf0f   :  { %v1798_v10 = vadd.f32 1.0, %v4855_v36  ;;  %4430 = vmatmul.mubr.bf16.vlgmr.msra.gmra.mrb[88].mxu0 %v1806_v7 }
 0xf10   :  { %v4857_v60 = vpop.eup %4856  ;;  %4433 = vmatprep.mubr.msk.bf16.mxu0 %vm4986_vm0, %v4985_v0 }
 0xf11   :  { %v1799_v40 = vadd.f32 1.0, %v4857_v60  ;;  %v1803_v3 = vmul.f32 %v1798_v10, %v1783_v15 }
 0xf13   :  { %v1804_v20 = vmul.f32 %v1799_v40, %v1784_v16  ;;  %v4738_v40 = vld [vmem:[%s6357_s6 + $0x10] sm:$0xff]  }
 0xf14   :  { %4442 = vmatpush3.bf16.msra.mxu1 %v4738_v40 }
 0xf15   :  { %v1807_v32 = vpack.c.bf16 %v1804_v20, %v1803_v3  ;;  %4443 = vmatprep.subr.bf16.mxu1 %v4985_v0  ;;  %v4739_v3 = vld [vmem:[%s6357_s6 + $0x18] sm:$0xff]  }
 0xf17   :  { %4434 = vmatmul.mubr.bf16.gmra.mrb[92].mxu0 %v1807_v32 }
 0xf18   :  { %4437 = vmatprep.mubr.msk.bf16.mxu0 %vm4986_vm0, %v4985_v0  ;;  %4444 = vmatpush3.bf16.msra.mxu1 %v4739_v3 }
 0xf19   :  { %4475 = vmatprep.subr.bf16.mxu1 %v4985_v0 }
 0xf26   :  { %v1775_v18 = vpop.f32.mrb[88].mxu1 }
 0xf27   :  { %v1776_v19 = vadd.f32 %v3872_v28, %v1775_v18  ;;  %v4411_v47 = vpop.f32.mrb[89].mxu1 }
 0xf28   :  { %v1778_v14 = vpop.f32.mrb[90].mxu1 }
 0xf29   :  { %v1790_v21 = vmul.f32 0.70710677, %v1776_v19  ;;  %v4412_v23 = vpop.f32.mrb[91].mxu1  ;;  %v1785_v24 = vmul.f32 0.5, %v1776_v19 }
 0xf2b   :  { %4858 = verf.f32 %v1790_v21 }
 0xf35   :  { %v4859_v9 = vpop.eup %4858 }
 0xf36   :  { %v1800_v26 = vadd.f32 1.0, %v4859_v9 }
 0xf38   :  { %v1805_v27 = vmul.f32 %v1800_v26, %v1785_v24 }
 0xf3a   :  { %v1808_v1 = vpack.c.bf16 %v1805_v27, %v1805_v27 }
 0xf3c   :  { %4438 = vmatmul.mubr.bf16.gmra.mrb[96].mxu0 %v1808_v1 }
 0xf3d   :  { %4463 = vmatprep.mubr.msk.bf16.mxu0 %vm4986_vm0, %v4985_v0 }
 0xfe2   :  { %v1907_v34 = vpop.f32.mrb[88].mxu0 }
 0xfe3   :  { %v1929_v38 = vadd.f32 %v1907_v34, %v5619_v6  ;;  %v4431_v30 = vpop.f32.mrb[89].mxu0 }
 0xfe4   :  { %v1910_v29 = vpop.f32.mrb[90].mxu0 }
 0xfe5   :  { %v5724_v33 = vadd.f32 %v3886_v22, %v1929_v38  ;;  %v1930_v35 = vadd.f32 %v1910_v29, %v5622_v11  ;;  %v4432_v37 = vpop.f32.mrb[91].mxu0 }
 0xfe7   :  { %v5727_v39 = vadd.f32 %v3886_v22, %v1930_v35  ;;  %v1950_v42 = vsel %vm180_vm2, %v5724_v33, 0.0  ;;  %v3889_v35 = vld [vmem:[%s6358_s4 + $0x1] ss:$0 sm:$0xff]  ;;  %s6390_s4 = smov 40  }
 0xfe8   :  { %1951 = vadd.xlane.f32.xlu1 %v1950_v42 }
 0xfe9   :  { %v1953_v45 = vsel %vm180_vm2, %v5727_v39, 0.0 }
 0xfea   :  { %1954 = vadd.xlane.f32.xlu0 %v1953_v45  ;;  %v1915_v46 = vpop.f32.mrb[92].mxu0  ;;  %v3890_v45 = vld [vmem:[%s6359_s5 + $0x1] ss:$0 sm:$0xff] }
 0xfeb   :  { %v1931_v6 = vadd.f32 %v1915_v46, %v5631_v13  ;;  %v4435_v28 = vpop.f32.mrb[93].mxu0 }
 0xfec   :  { %v1918_v50 = vpop.f32.mrb[94].mxu0 }
 0xfed   :  { %v5734_v31 = vadd.f32 %v3886_v22, %v1931_v6  ;;  %v1932_v11 = vadd.f32 %v1918_v50, %v5634_v17  ;;  %v4436_v41 = vpop.f32.mrb[95].mxu0 }
 0xfef   :  { %v5737_v48 = vadd.f32 %v3886_v22, %v1932_v11  ;;  %v1956_v49 = vsel %vm180_vm2, %v5734_v31, 0.0 }
 0xff0   :  { %1957 = vadd.xlane.f32.xlu1 %v1956_v49 }
 0xff1   :  { %v1959_v43 = vsel %vm180_vm2, %v5737_v48, 0.0 }
 0xff2   :  { %1960 = vadd.xlane.f32.xlu0 %v1959_v43 }
0x100f   :  { %v1923_v44 = vpop.f32.mrb[96].mxu0 }
0x1010   :  { %v1933_v13 = vadd.f32 %v1923_v44, %v5642_v25  ;;  %v4439_v53 = vpop.f32.mrb[97].mxu0 }
0x1011   :  { %v1926_v54 = vpop.f32.mrb[98].mxu0 }
0x1012   :  { %v5744_v56 = vadd.f32 %v3886_v22, %v1933_v13  ;;  %v4440_v52 = vpop.f32.mrb[99].mxu0 }
0x1014   :  { %v1962_v17 = vsel %vm193_vm3, %v5744_v56, 0.0 }
0x1015   :  { %1963 = vadd.xlane.f32.xlu1 %v1962_v17 }
0x1075   :  { %v1952_v58 = vpop.xlane.xlu1 %1951 }
0x1076   :  { %v1965_v55 = vmul.f32 0.03125, %v1952_v58 }
0x1077   :  { %v1955_v63 = vpop.xlane.xlu0 %1954 }
0x1078   :  { %v1970_v59 = vsub.f32 %v5724_v33, %v1965_v55  ;;  %v1966_v2 = vmul.f32 0.03125, %v1955_v63 }
0x107a   :  { %v1971_v61 = vsub.f32 %v5727_v39, %v1966_v2  ;;  %v1975_v62 = vmul.f32 %v1970_v59, %v1970_v59 }
0x107c   :  { %v1980_v25 = vsel %vm180_vm2, %v1975_v62, 0.0  ;;  %v1976_v4 = vmul.f32 %v1971_v61, %v1971_v61 }
0x107d   :  { %v1958_v5 = vpop.xlane.xlu1 %1957  ;;  %1981 = vadd.xlane.f32.xlu0 %v1980_v25 }
0x107e   :  { %v1967_v8 = vmul.f32 0.03125, %v1958_v5  ;;  %v1983_v51 = vsel %vm180_vm2, %v1976_v4, 0.0  ;;  %v3896_v5 = vld [vmem:[%s6360_s7 + $0x1] ss:$0 sm:$0xff] }
0x107f   :  { %v1961_v12 = vpop.xlane.xlu0 %1960  ;;  %1984 = vadd.xlane.f32.xlu1 %v1983_v51 }
0x1080   :  { %v1972_v57 = vsub.f32 %v5734_v31, %v1967_v8  ;;  %v1968_v7 = vmul.f32 0.03125, %v1961_v12 }
0x1082   :  { %v1973_v36 = vsub.f32 %v5737_v48, %v1968_v7  ;;  %v1977_v10 = vmul.f32 %v1972_v57, %v1972_v57 }
0x1084   :  { %v1986_v60 = vsel %vm180_vm2, %v1977_v10, 0.0  ;;  %v1978_v15 = vmul.f32 %v1973_v36, %v1973_v36 }
0x1085   :  { %1987 = vadd.xlane.f32.xlu0 %v1986_v60 }
0x1086   :  { %v1989_v16 = vsel %vm180_vm2, %v1978_v15, 0.0 }
0x1087   :  { %1990 = vadd.xlane.f32.xlu1 %v1989_v16 }
0x10a2   :  { %v1964_v20 = vpop.xlane.xlu1 %1963 }
0x10a3   :  { %v1969_v32 = vmul.f32 0.03125, %v1964_v20 }
0x10a5   :  { %v1974_v18 = vsub.f32 %v5744_v56, %v1969_v32 }
0x10a7   :  { %v1979_v19 = vmul.f32 %v1974_v18, %v1974_v18 }
0x10a9   :  { %v1992_v47 = vsel %vm193_vm3, %v1979_v19, 0.0 }
0x10aa   :  { %1993 = vadd.xlane.f32.xlu0 %v1992_v47 }
0x110a   :  { %v1982_v14 = vpop.xlane.xlu0 %1981 }
0x110b   :  { %v1995_v21 = vmul.f32 0.03125, %v1982_v14 }
0x110c   :  { %v1985_v23 = vpop.xlane.xlu1 %1984 }
0x110d   :  { %v2000_v9 = vadd.f32 1e-06, %v1995_v21  ;;  %v1996_v24 = vmul.f32 0.03125, %v1985_v23 }
0x110f   :  { %4860 = vrsqrt.f32 %v2000_v9  ;;  %v2001_v26 = vadd.f32 1e-06, %v1996_v24 }
0x1111   :  { %4862 = vrsqrt.f32 %v2001_v26 }
0x1112   :  { %v1988_v27 = vpop.xlane.xlu0 %1987 }
0x1113   :  { %v1997_v1 = vmul.f32 0.03125, %v1988_v27 }
0x1114   :  { %v1991_v34 = vpop.xlane.xlu1 %1990 }
0x1115   :  { %v2002_v22 = vadd.f32 1e-06, %v1997_v1  ;;  %v1998_v38 = vmul.f32 0.03125, %v1991_v34 }
0x1117   :  { %4864 = vrsqrt.f32 %v2002_v22  ;;  %v2003_v30 = vadd.f32 1e-06, %v1998_v38 }
0x1119   :  { %v4861_v29 = vpop.eup %4860  ;;  %4866 = vrsqrt.f32 %v2003_v30 }
0x111a   :  { %v2010_v37 = vmul.f32 %v4861_v29, %v1970_v59 }
0x111b   :  { %v4863_v42 = vpop.eup %4862 }
0x111c   :  { %v2021_v46 = vmul.f32 %v3889_v35, %v2010_v37  ;;  %v2011_v6 = vmul.f32 %v4863_v42, %v1971_v61 }
0x111e   :  { %v2032_v28 = vadd.f32 %v3890_v45, %v2021_v46  ;;  %v2022_v50 = vmul.f32 %v3889_v35, %v2011_v6 }
0x1120   :  { %v2033_v11 = vadd.f32 %v3890_v45, %v2022_v50 }
0x1121   :  { %v4865_v41 = vpop.eup %4864 }
0x1122   :  { %v2012_v49 = vmul.f32 %v4865_v41, %v1972_v57  ;;  %v2037_v43 = vpack.c.bf16 %v2033_v11, %v2032_v28  ;;  %v5844_v41 = vld [vmem:[%s6361_s3] sm:$0xff] }
0x1123   :  { %v4867_v44 = vpop.eup %4866 }
0x1124   :  { %v2013_v13 = vmul.f32 %v4867_v44, %v1973_v36  ;;  %4446 = vmatmul.mubr.msk.bf16.vlgmr.msra.gmra.mrb[92].mxu1 %vm180_vm2, %v2037_v43  ;;  %v2023_v53 = vmul.f32 %v3889_v35, %v2012_v49 }
0x1125   :  { %4449 = vmatprep.mubr.msk.bf16.mxu1 %vm4986_vm0, %v4985_v0 }
0x1126   :  { %v2024_v54 = vmul.f32 %v3889_v35, %v2013_v13  ;;  %v2034_v52 = vadd.f32 %v3890_v45, %v2023_v53  ;;  %v5852_v13 = vld [vmem:[%s6361_s3 + $0x8] sm:$0xff] }
0x1128   :  { %v2035_v17 = vadd.f32 %v3890_v45, %v2024_v54 }
0x112a   :  { %v2038_v58 = vpack.c.bf16 %v2035_v17, %v2034_v52 }
0x112c   :  { %4450 = vmatmul.mubr.msk.bf16.gmra.mrb[96].mxu1 %vm180_vm2, %v2038_v58 }
0x112d   :  { %4453 = vmatprep.mubr.msk.bf16.mxu1 %vm4986_vm0, %v4985_v0 }
0x1137   :  { %v1994_v55 = vpop.xlane.xlu0 %1993 }
0x1138   :  { %v1999_v63 = vmul.f32 0.03125, %v1994_v55 }
0x113a   :  { %v2004_v59 = vadd.f32 1e-06, %v1999_v63 }
0x113c   :  { %4868 = vrsqrt.f32 %v2004_v59  ;;  %v5864_v59 = vld [vmem:[%s6361_s3 + $0x10] sm:$0xff] }
0x1146   :  { %v4869_v2 = vpop.eup %4868 }
0x1147   :  { %v2014_v61 = vmul.f32 %v4869_v2, %v1974_v18 }
0x1149   :  { %v2025_v62 = vmul.f32 %v3889_v35, %v2014_v61 }
0x114b   :  { %v2036_v25 = vadd.f32 %v3890_v45, %v2025_v62 }
0x114d   :  { %v2039_v4 = vpack.c.bf16 %v2036_v25, %v2036_v25  ;;  %v5870_v25 = vld [vmem:[%s6361_s3 + $0x18] sm:$0xff] }
0x114f   :  { %4454 = vmatmul.mubr.msk.bf16.gmra.mrb[100].mxu1 %vm180_vm2, %v2039_v4 }
0x1150   :  { %4481 = vmatprep.mubr.msk.bf16.mxu1 %vm4986_vm0, %v4985_v0 }
0x11f7   :  { %v2108_v8 = vpop.f32.mrb[92].mxu1 }
0x11f8   :  { %v4447_v51 = vpop.f32.mrb[93].mxu1  ;;  %v2109_v57 = vadd.f32 %v3896_v5, %v2108_v8 }
0x11f9   :  { %v2111_v12 = vpop.f32.mrb[94].mxu1 }
0x11fa   :  { %v2112_v7 = vadd.f32 %v3896_v5, %v2111_v12  ;;  %v4448_v36 = vpop.f32.mrb[95].mxu1 }
0x11fb   :  { %v5881_v36 = vld [vmem:[%s6361_s3 + $0x20] sm:$0x3] }
0x11fc   :  { %v5784_v10 = vpack.c.bf16 %v2112_v7, %v2109_v57 }
0x11fe   :  { %2141 = vrot.lane.b32.xlu1 %v5784_v10, %s4987_s19 }
0x11ff   :  { %v2116_v60 = vpop.f32.mrb[96].mxu1 }
0x1200   :  { %v4451_v15 = vpop.f32.mrb[97].mxu1  ;;  %v2117_v40 = vadd.f32 %v3896_v5, %v2116_v60 }
0x1201   :  { %v2119_v16 = vpop.f32.mrb[98].mxu1 }
0x1202   :  { %v2120_v3 = vadd.f32 %v3896_v5, %v2119_v16  ;;  %v4452_v20 = vpop.f32.mrb[99].mxu1 }
0x1204   :  { %v5788_v32 = vpack.c.bf16 %v2120_v3, %v2117_v40 }
0x1206   :  { %2143 = vrot.lane.b32.xlu0 %v5788_v32, %s4987_s19 }
0x1222   :  { %v2124_v18 = vpop.f32.mrb[100].mxu1 }
0x1223   :  { %v2125_v19 = vadd.f32 %v3896_v5, %v2124_v18  ;;  %v4455_v47 = vpop.f32.mrb[101].mxu1 }
0x1224   :  { %v2127_v14 = vpop.f32.mrb[102].mxu1 }
0x1225   :  { %v5792_v21 = vpack.c.bf16 %v2125_v19, %v2125_v19  ;;  %v4456_v23 = vpop.f32.mrb[103].mxu1 }
0x1227   :  { %2378 = vrot.lane.b32.xlu0 %v5792_v21, %s4988_s0  ;;  %2145 = vrot.lane.b32.xlu1 %v5792_v21, %s4987_s19 }
0x122b   :  { %2370 = vrot.lane.b32.xlu0 %v5788_v32, %s4989_s20  ;;  %2374 = vrot.lane.b32.xlu1 %v5784_v10, %s4988_s0 }
0x122f   :  { %2376 = vrot.lane.b32.xlu1 %v5788_v32, %s4988_s0 }
0x1233   :  { %2368 = vrot.lane.b32.xlu1 %v5784_v10, %s4989_s20 }
0x1237   :  { %2372 = vrot.lane.b32.xlu1 %v5792_v21, %s4989_s20 }
0x1270   :  { %v2142_v9 = vpop.permute.xlu1 %2141 }
0x1271   :  { %v2157_v24 = vsel %vm377_vm4, %v2142_v9, 0 }
0x1272   :  { %4458 = vmatpush3.bf16.xpose.msra.mxu0 %v2157_v24 }
0x1273   :  { %4459 = vmatprep.subr.bf16.mxu0 %v4985_v0 }
0x1278   :  { %v2144_v26 = vpop.permute.xlu0 %2143 }
0x1279   :  { %v2160_v27 = vsel %vm377_vm4, %v2144_v26, 0 }
0x127a   :  { %4460 = vmatpush3.bf16.xpose.msra.mxu0 %v2160_v27 }
0x127b   :  { %4461 = vmatprep.subr.bf16.mxu0 %v4985_v0 }
0x1299   :  { %v2146_v1 = vpop.permute.xlu1 %2145  ;;  %v2379_v35 = vpop.permute.xlu0 %2378 }
0x129a   :  { %v2163_v34 = vsel %vm377_vm4, %v2146_v1, 0  ;;  %v2396_v37 = vsel %vm377_vm4, %v2379_v35, 0 }
0x129b   :  { %4462 = vmatpush3.bf16.xpose.msra.mxu0 %v2163_v34 }
0x129c   :  { %4493 = vmatprep.subr.bf16.mxu0 %v4985_v0 }
0x129d   :  { %v2375_v22 = vpop.permute.xlu1 %2374  ;;  %v2371_v45 = vpop.permute.xlu0 %2370 }
0x129e   :  { %v2390_v38 = vsel %vm377_vm4, %v2375_v22, 0 }
0x12a1   :  { %v2377_v30 = vpop.permute.xlu1 %2376 }
0x12a2   :  { %4464 = vmatmul.mubr.msk.bf16.vlgmr.msra.gmra.mrb[100].mxu0 %vm377_vm4, %v5784_v10  ;;  %v2393_v29 = vsel %vm377_vm4, %v2377_v30, 0 }
0x12a3   :  { %4494 = vmatpush3.bf16.xpose.msra.mxu0 %v2390_v38  ;;  %4467 = vmatprep.mubr.msk.bf16.mxu0 %vm4986_vm0, %v4985_v0 }
0x12a4   :  { %4495 = vmatprep.subr.bf16.mxu0 %v4985_v0 }
0x12a5   :  { %v2369_v42 = vpop.permute.xlu1 %2368 }
0x12a9   :  { %v2373_v46 = vpop.permute.xlu1 %2372 }
0x12aa   :  { %4468 = vmatmul.mubr.msk.bf16.gmra.mrb[104].mxu0 %vm377_vm4, %v5788_v32 }
0x12ab   :  { %4496 = vmatpush3.bf16.xpose.msra.mxu0 %v2393_v29  ;;  %4471 = vmatprep.mubr.msk.bf16.mxu0 %vm4986_vm0, %v4985_v0 }
0x12ac   :  { %4497 = vmatprep.subr.bf16.mxu0 %v4985_v0 }
0x12b2   :  { %4472 = vmatmul.mubr.msk.bf16.gmra.mrb[108].mxu0 %vm377_vm4, %v5792_v21 }
0x12b3   :  { %4498 = vmatpush3.bf16.xpose.msra.mxu0 %v2396_v37  ;;  %4499 = vmatprep.mubr.msk.bf16.mxu0 %vm4986_vm0, %v4985_v0 }
0x12b4   :  { %4529 = vmatprep.subr.bf16.mxu0 %v4985_v0 }
0x12ba   :  { %4500 = vmatmul.mubr.msk.bf16.vlgmr.msra.gmra.mrb[112].mxu0 %vm377_vm4, %v2369_v42 }
0x12bb   :  { %4503 = vmatprep.mubr.msk.bf16.mxu0 %vm4986_vm0, %v4985_v0 }
0x12c2   :  { %4504 = vmatmul.mubr.msk.bf16.gmra.mrb[116].mxu0 %vm377_vm4, %v2371_v45 }
0x12c3   :  { %4507 = vmatprep.mubr.msk.bf16.mxu0 %vm4986_vm0, %v4985_v0 }
0x12ca   :  { %4508 = vmatmul.mubr.msk.bf16.gmra.mrb[120].mxu0 %vm377_vm4, %v2373_v46 }
0x12cb   :  { %4531 = vmatprep.mubr.msk.bf16.mxu0 %vm4986_vm0, %v4985_v0 }
0x1375   :  { %v2199_v6 = vpop.f32.mrb[100].mxu0 }
0x1376   :  { %v2221_v28 = vmul.f32 0.35355338, %v2199_v6  ;;  %v4465_v50 = vpop.f32.mrb[101].mxu0 }
0x1377   :  { %v2202_v11 = vpop.f32.mrb[102].mxu0 }
0x1378   :  { %v5847_v49 = vadd.f32 %v5844_v41, %v2221_v28  ;;  %v2222_v43 = vmul.f32 0.35355338, %v2202_v11  ;;  %v4466_v44 = vpop.f32.mrb[103].mxu0 }
0x137a   :  { %v5855_v53 = vadd.f32 %v5852_v13, %v2222_v43  ;;  %v2231_v54 = vsel %vm462_vm5, %v5847_v49, -inf }
0x137b   :  { %2232 = vmax.xlane.f32.xlu0 %v2231_v54 }
0x137c   :  { %v2234_v52 = vsel %vm462_vm5, %v5855_v53, -inf }
0x137d   :  { %2235 = vmax.xlane.f32.xlu1 %v2234_v52  ;;  %v2207_v17 = vpop.f32.mrb[104].mxu0 }
0x137e   :  { %v2223_v58 = vmul.f32 0.35355338, %v2207_v17  ;;  %v4469_v55 = vpop.f32.mrb[105].mxu0 }
0x137f   :  { %v2210_v63 = vpop.f32.mrb[106].mxu0 }
0x1380   :  { %v2228_v2 = vadd.f32 %v5864_v59, %v2223_v58  ;;  %v2224_v61 = vmul.f32 0.35355338, %v2210_v63  ;;  %v4470_v62 = vpop.f32.mrb[107].mxu0 }
0x1382   :  { %v5873_v4 = vadd.f32 %v5870_v25, %v2224_v61  ;;  %v2237_v5 = vsel %vm462_vm5, %v2228_v2, -inf }
0x1383   :  { %2238 = vmax.xlane.f32.xlu0 %v2237_v5 }
0x1384   :  { %v2240_v57 = vsel %vm462_vm5, %v5873_v4, -inf }
0x1385   :  { %v2215_v8 = vpop.f32.mrb[108].mxu0 }
0x1386   :  { %v2225_v51 = vmul.f32 0.35355338, %v2215_v8  ;;  %v4473_v12 = vpop.f32.mrb[109].mxu0 }
0x1387   :  { %2241 = vmax.xlane.f32.xlu0 %v2240_v57  ;;  %v2218_v7 = vpop.f32.mrb[110].mxu0 }
0x1388   :  { %v2230_v60 = vadd.f32 %v5881_v36, %v2225_v51  ;;  %v4474_v15 = vpop.f32.mrb[111].mxu0 }
0x138a   :  { %v2243_v16 = vsel %vm475_vm6, %v2230_v60, -inf }
0x138b   :  { %2244 = vmax.xlane.f32.xlu0 %v2243_v16 }
0x138d   :  { %v2432_v40 = vpop.f32.mrb[112].mxu0 }
0x138e   :  { %v2454_v3 = vmul.f32 0.35355338, %v2432_v40  ;;  %v4501_v20 = vpop.f32.mrb[113].mxu0 }
0x138f   :  { %v2435_v18 = vpop.f32.mrb[114].mxu0 }
0x1390   :  { %v5886_v19 = vadd.f32 %v5844_v41, %v2454_v3  ;;  %v2455_v47 = vmul.f32 0.35355338, %v2435_v18  ;;  %v4502_v14 = vpop.f32.mrb[115].mxu0 }
0x1392   :  { %v2460_v23 = vadd.f32 %v5852_v13, %v2455_v47  ;;  %v2464_v9 = vsel %vm462_vm5, %v5886_v19, -inf }
0x1393   :  { %2465 = vmax.xlane.f32.xlu1 %v2464_v9 }
0x1394   :  { %v2467_v24 = vsel %vm462_vm5, %v2460_v23, -inf }
0x1395   :  { %2468 = vmax.xlane.f32.xlu0 %v2467_v24  ;;  %v2440_v26 = vpop.f32.mrb[116].mxu0 }
0x1396   :  { %v4505_v27 = vpop.f32.mrb[117].mxu0  ;;  %v2456_v45 = vmul.f32 0.35355338, %v2440_v26 }
0x1397   :  { %v2443_v1 = vpop.f32.mrb[118].mxu0 }
0x1398   :  { %v2457_v34 = vmul.f32 0.35355338, %v2443_v1  ;;  %v4506_v22 = vpop.f32.mrb[119].mxu0  ;;  %v5902_v46 = vadd.f32 %v5864_v59, %v2456_v45 }
0x139a   :  { %v5893_v38 = vadd.f32 %v5870_v25, %v2457_v34  ;;  %v2470_v50 = vsel %vm462_vm5, %v5902_v46, -inf }
0x139c   :  { %v2473_v30 = vsel %vm462_vm5, %v5893_v38, -inf }
0x139d   :  { %2474 = vmax.xlane.f32.xlu0 %v2473_v30  ;;  %v2448_v29 = vpop.f32.mrb[120].mxu0 }
0x139e   :  { %v4509_v35 = vpop.f32.mrb[121].mxu0  ;;  %v2458_v6 = vmul.f32 0.35355338, %v2448_v29 }
0x139f   :  { %v2451_v37 = vpop.f32.mrb[122].mxu0 }
0x13a0   :  { %v4510_v42 = vpop.f32.mrb[123].mxu0  ;;  %v5905_v28 = vadd.f32 %v5881_v36, %v2458_v6 }
0x13a2   :  { %v2476_v11 = vsel %vm475_vm6, %v5905_v28, -inf }
0x13a4   :  { %2289 = vrot.lane.b32.xlu1 %v5784_v10, %s4990_s30 }
0x13b3   :  { %2291 = vrot.lane.b32.xlu0 %v5788_v32, %s4990_s30 }
0x13c8   :  { %2471 = vmax.xlane.f32.xlu1 %v2470_v50 }
0x13cc   :  { %2477 = vmax.xlane.f32.xlu1 %v2476_v11 }
0x1408   :  { %v2233_v43 = vpop.xlane.xlu0 %2232 }
0x1409   :  { %v2246_v44 = vsub.f32 %v5847_v49, %v2233_v43 }
0x140a   :  { %v2236_v54 = vpop.xlane.xlu1 %2235 }
0x140b   :  { %v2251_v52 = vmul.f32 1.442695, %v2246_v44  ;;  %v2247_v17 = vsub.f32 %v5855_v53, %v2236_v54 }
0x140d   :  { %4870 = vpow2.f32 %v2251_v52  ;;  %v2253_v58 = vmul.f32 1.442695, %v2247_v17 }
0x140f   :  { %4872 = vpow2.f32 %v2253_v58 }
0x1410   :  { %v2239_v55 = vpop.xlane.xlu0 %2238 }
0x1411   :  { %v2248_v63 = vsub.f32 %v2228_v2, %v2239_v55 }
0x1413   :  { %v2255_v61 = vmul.f32 1.442695, %v2248_v63 }
0x1414   :  { %v2242_v62 = vpop.xlane.xlu0 %2241 }
0x1415   :  { %4874 = vpow2.f32 %v2255_v61  ;;  %v2249_v24 = vsub.f32 %v5873_v4, %v2242_v62 }
0x1417   :  { %v5913_v5 = vpop.eup %4870  ;;  %v2257_v26 = vmul.f32 1.442695, %v2249_v24 }
0x1418   :  { %v2245_v8 = vpop.xlane.xlu0 %2244  ;;  %v2261_v51 = vsel %vm462_vm5, %v5913_v5, 0.0 }
0x1419   :  { %v5917_v12 = vpop.eup %4872  ;;  %v2250_v49 = vsub.f32 %v2230_v60, %v2245_v8  ;;  %2262 = vadd.xlane.f32.xlu0 %v2261_v51 }
0x141a   :  { %v2264_v53 = vsel %vm462_vm5, %v5917_v12, 0.0 }
0x141b   :  { %v2259_v57 = vmul.f32 1.442695, %v2250_v49  ;;  %2265 = vadd.xlane.f32.xlu1 %v2264_v53 }
0x141d   :  { %4876 = vpow2.f32 %v2259_v57 }
0x141f   :  { %v5921_v2 = vpop.eup %4874 }
0x1420   :  { %v2466_v7 = vpop.xlane.xlu1 %2465  ;;  %v2267_v15 = vsel %vm462_vm5, %v5921_v2, 0.0 }
0x1421   :  { %2268 = vadd.xlane.f32.xlu0 %v2267_v15  ;;  %v2479_v27 = vsub.f32 %v5886_v19, %v2466_v7 }
0x1422   :  { %v2469_v16 = vpop.xlane.xlu0 %2468 }
0x1423   :  { %v2480_v40 = vsub.f32 %v2460_v23, %v2469_v16  ;;  %v2484_v1 = vmul.f32 1.442695, %v2479_v27 }
0x1424   :  { %v2290_v3 = vpop.permute.xlu1 %2289 }
0x1425   :  { %v2486_v20 = vmul.f32 1.442695, %v2480_v40  ;;  %4476 = vmatpush3.bf16.msra.mxu1 %v2290_v3 }
0x1426   :  { %4477 = vmatprep.subr.bf16.mxu1 %v4985_v0 }
0x1427   :  { %v5926_v60 = vpop.eup %4876  ;;  %4878 = vpow2.f32 %v2486_v20 }
0x1428   :  { %v2273_v18 = vsel %vm475_vm6, %v5926_v60, 0.0  ;;  %4880 = vpow2.f32 %v2257_v26 }
0x1429   :  { %2274 = vadd.xlane.f32.xlu0 %v2273_v18  ;;  %4882 = vpow2.f32 %v2484_v1 }
0x142a   :  { %v2475_v47 = vpop.xlane.xlu0 %2474 }
0x142b   :  { %v2482_v35 = vsub.f32 %v5893_v38, %v2475_v47 }
0x142c   :  { %2293 = vrot.lane.b32.xlu1 %v5792_v21, %s4990_s30 }
0x142d   :  { %v2490_v42 = vmul.f32 1.442695, %v2482_v35 }
0x142e   :  { %v2292_v14 = vpop.permute.xlu0 %2291 }
0x142f   :  { %4478 = vmatpush3.bf16.msra.mxu1 %v2292_v14 }
0x1430   :  { %4479 = vmatprep.subr.bf16.mxu1 %v4985_v0 }
0x1431   :  { %v5933_v23 = vpop.eup %4878 }
0x1432   :  { %v2497_v9 = vsel %vm462_vm5, %v5933_v23, 0.0  ;;  %v4881_v34 = vpop.eup %4880 }
0x1433   :  { %2498 = vadd.xlane.f32.xlu0 %v2497_v9  ;;  %v2270_v22 = vsel %vm462_vm5, %v4881_v34, 0.0  ;;  %v5940_v30 = vpop.eup %4882 }
0x1434   :  { %v2494_v29 = vsel %vm462_vm5, %v5940_v30, 0.0 }
0x1450   :  { %2271 = vadd.xlane.f32.xlu1 %v2270_v22 }
0x1454   :  { %2495 = vadd.xlane.f32.xlu1 %v2494_v29 }
0x1455   :  { %v2472_v37 = vpop.xlane.xlu1 %2471 }
0x1456   :  { %v2481_v4 = vsub.f32 %v5902_v46, %v2472_v37 }
0x1458   :  { %v2488_v19 = vmul.f32 1.442695, %v2481_v4 }
0x1459   :  { %v2478_v45 = vpop.xlane.xlu1 %2477 }
0x145a   :  { %4884 = vpow2.f32 %v2488_v19  ;;  %v2483_v6 = vsub.f32 %v5905_v28, %v2478_v45 }
0x145b   :  { %4886 = vpow2.f32 %v2490_v42 }
0x145c   :  { %v2492_v50 = vmul.f32 1.442695, %v2483_v6 }
0x145e   :  { %4888 = vpow2.f32 %v2492_v50 }
0x1464   :  { %v5947_v11 = vpop.eup %4884 }
0x1465   :  { %2524 = vrot.lane.b32.xlu1 %v5788_v32, %s4991_s1  ;;  %v2500_v38 = vsel %vm462_vm5, %v5947_v11, 0.0  ;;  %v5953_v43 = vpop.eup %4886 }
0x1466   :  { %2501 = vadd.xlane.f32.xlu0 %v2500_v38  ;;  %v2503_v46 = vsel %vm462_vm5, %v5953_v43, 0.0 }
0x1468   :  { %v5959_v28 = vpop.eup %4888 }
0x1469   :  { %2526 = vrot.lane.b32.xlu1 %v5792_v21, %s4991_s1  ;;  %v2506_v44 = vsel %vm475_vm6, %v5959_v28, 0.0 }
0x146a   :  { %2504 = vadd.xlane.f32.xlu0 %v2503_v46 }
0x146d   :  { %2743 = vrot.lane.b32.xlu1 %v5784_v10, %s4992_s21 }
0x146e   :  { %2507 = vadd.xlane.f32.xlu0 %v2506_v44 }
0x1471   :  { %2745 = vrot.lane.b32.xlu1 %v5788_v32, %s4992_s21 }
0x1475   :  { %2747 = vrot.lane.b32.xlu1 %v5792_v21, %s4992_s21 }
0x1479   :  { %2737 = vrot.lane.b32.xlu1 %v5784_v10, %s4993_s22 }
0x147d   :  { %2741 = vrot.lane.b32.xlu1 %v5792_v21, %s4993_s22 }
0x1484   :  { %2522 = vrot.lane.b32.xlu0 %v5784_v10, %s4991_s1 }
0x1488   :  { %2739 = vrot.lane.b32.xlu0 %v5788_v32, %s4993_s22  ;;  %s6388_s22 = smov 72  }
0x14a6   :  { %v2263_v54 = vpop.xlane.xlu0 %2262 }
0x14a7   :  { %4890 = vrcp.f32 %v2263_v54 }
0x14a8   :  { %v2266_v52 = vpop.xlane.xlu1 %2265 }
0x14a9   :  { %4892 = vrcp.f32 %v2266_v52 }
0x14ac   :  { %v2294_v17 = vpop.permute.xlu1 %2293 }
0x14ad   :  { %v2307_v58 = vsel %vm539_vm7, %v2294_v17, 0 }
0x14ae   :  { %4480 = vmatpush3.bf16.msra.mxu1 %v2307_v58  ;;  %v2269_v51 = vpop.xlane.xlu0 %2268 }
0x14af   :  { %4511 = vmatprep.subr.bf16.mxu1 %v4985_v0  ;;  %4894 = vrcp.f32 %v2269_v51 }
0x14b1   :  { %v4891_v55 = vpop.eup %4890 }
0x14b2   :  { %v2281_v61 = vmul.f32 %v4891_v55, %v5913_v5 }
0x14b3   :  { %v4893_v63 = vpop.eup %4892 }
0x14b4   :  { %v2282_v62 = vmul.f32 %v4893_v63, %v5917_v12 }
0x14b6   :  { %v2286_v8 = vpack.c.bf16 %v2282_v62, %v2281_v61  ;;  %v2275_v53 = vpop.xlane.xlu0 %2274 }
0x14b8   :  { %4482 = vmatmul.mubr.msk.bf16.vlgmr.msra.gmra.mrb[104].mxu1 %vm462_vm5, %v2286_v8 }
0x14b9   :  { %4485 = vmatprep.mubr.msk.bf16.mxu1 %vm4986_vm0, %v4985_v0  ;;  %v4895_v57 = vpop.eup %4894 }
0x14ba   :  { %v2283_v15 = vmul.f32 %v4895_v57, %v5921_v2 }
0x14c0   :  { %v2499_v12 = vpop.xlane.xlu0 %2498 }
0x14dd   :  { %v2272_v49 = vpop.xlane.xlu1 %2271 }
0x14de   :  { %4896 = vrcp.f32 %v2272_v49 }
0x14df   :  { %4898 = vrcp.f32 %v2275_v53 }
0x14e1   :  { %v2496_v47 = vpop.xlane.xlu1 %2495 }
0x14e2   :  { %4900 = vrcp.f32 %v2496_v47 }
0x14e3   :  { %4902 = vrcp.f32 %v2499_v12 }
0x14e5   :  { %v2525_v9 = vpop.permute.xlu1 %2524 }
0x14e8   :  { %v4897_v7 = vpop.eup %4896 }
0x14e9   :  { %v2284_v16 = vmul.f32 %v4897_v7, %v4881_v34  ;;  %v4899_v40 = vpop.eup %4898  ;;  %v2527_v27 = vpop.permute.xlu1 %2526 }
0x14ea   :  { %v2285_v3 = vmul.f32 %v4899_v40, %v5926_v60  ;;  %v2540_v22 = vsel %vm539_vm7, %v2527_v27, 0 }
0x14eb   :  { %v2287_v5 = vpack.c.bf16 %v2284_v16, %v2283_v15 }
0x14ec   :  { %v2288_v18 = vpack.c.bf16 %v2285_v3, %v2285_v3  ;;  %v4901_v26 = vpop.eup %4900 }
0x14ed   :  { %4486 = vmatmul.mubr.msk.bf16.gmra.mrb[108].mxu1 %vm462_vm5, %v2287_v5  ;;  %v4903_v60 = vpop.eup %4902  ;;  %v2514_v1 = vmul.f32 %v4901_v26, %v5940_v30  ;;  %v3902_v30 = vld [vmem:[%s6362_s8 + $0x10] sm:$0xf]  ;;  %v2744_v7 = vpop.permute.xlu1 %2743 }
0x14ee   :  { %4489 = vmatprep.mubr.msk.bf16.mxu1 %vm4986_vm0, %v4985_v0  ;;  %v2515_v34 = vmul.f32 %v4903_v60, %v5933_v23  ;;  %v2679_v4 = vsel %vm844_vm8, %v3902_v30, 0  ;;  %v2759_v40 = vsel %vm377_vm4, %v2744_v7, 0 }
0x14f0   :  { %v2519_v29 = vpack.c.bf16 %v2515_v34, %v2514_v1 }
0x14f3   :  { %v2502_v20 = vpop.xlane.xlu0 %2501 }
0x14f5   :  { %4490 = vmatmul.mubr.msk.bf16.gmra.mrb[112].mxu1 %vm462_vm5, %v2288_v18 }
0x14f6   :  { %4517 = vmatprep.mubr.msk.bf16.mxu1 %vm4986_vm0, %v4985_v0 }
0x14f7   :  { %v2505_v2 = vpop.xlane.xlu0 %2504 }
0x14f8   :  { %4904 = vrcp.f32 %v2505_v2 }
0x14f9   :  { %4906 = vrcp.f32 %v2502_v20  ;;  %v2746_v20 = vpop.permute.xlu1 %2745 }
0x14fb   :  { %v2508_v14 = vpop.xlane.xlu0 %2507 }
0x14fc   :  { %4908 = vrcp.f32 %v2508_v14  ;;  %v2762_v14 = vsel %vm377_vm4, %v2746_v20, 0 }
0x14fd   :  { %v2748_v26 = vpop.permute.xlu1 %2747 }
0x14fe   :  { %v2765_v34 = vsel %vm377_vm4, %v2748_v26, 0 }
0x14ff   :  { %v2523_v24 = vpop.permute.xlu0 %2522 }
0x1500   :  { %4512 = vmatpush3.bf16.msra.mxu1 %v2523_v24 }
0x1501   :  { %4513 = vmatprep.subr.bf16.mxu1 %v4985_v0 }
0x1502   :  { %v4905_v35 = vpop.eup %4904 }
0x1503   :  { %v4907_v37 = vpop.eup %4906  ;;  %v2517_v23 = vmul.f32 %v4905_v35, %v5953_v43 }
0x1504   :  { %4514 = vmatpush3.bf16.msra.mxu1 %v2525_v9  ;;  %v2516_v42 = vmul.f32 %v4907_v37, %v5947_v11  ;;  %v3903_v11 = vld [vmem:[%s6362_s8 + $0x14] sm:$0xf] }
0x1505   :  { %4515 = vmatprep.subr.bf16.mxu1 %v4985_v0  ;;  %v2611_v38 = vsel %vm844_vm8, %v3903_v11, 0 }
0x1506   :  { %v2520_v19 = vpack.c.bf16 %v2517_v23, %v2516_v42  ;;  %v4909_v45 = vpop.eup %4908  ;;  %4530 = vmatpush3.bf16.msra.mxu0 %v2611_v38 }
0x1507   :  { %v2518_v6 = vmul.f32 %v4909_v45, %v5959_v28  ;;  %4557 = vmatprep.subr.bf16.mxu0 %v4985_v0 }
0x1508   :  { %4516 = vmatpush3.bf16.msra.mxu1 %v2540_v22  ;;  %v2738_v22 = vpop.permute.xlu1 %2737 }
0x1509   :  { %4543 = vmatprep.subr.bf16.mxu1 %v4985_v0  ;;  %v2521_v50 = vpack.c.bf16 %v2518_v6, %v2518_v6 }
0x150b   :  { %4518 = vmatmul.mubr.msk.bf16.vlgmr.msra.gmra.mrb[116].mxu1 %vm462_vm5, %v2519_v29  ;;  %v2740_v29 = vpop.permute.xlu0 %2739 }
0x150c   :  { %4521 = vmatprep.mubr.msk.bf16.mxu1 %vm4986_vm0, %v4985_v0  ;;  %4544 = vmatpush3.bf16.msra.mxu1 %v2679_v4  ;;  %v2742_v35 = vpop.permute.xlu1 %2741 }
0x150d   :  { %4575 = vmatprep.subr.bf16.mxu1 %v4985_v0 }
0x1513   :  { %4522 = vmatmul.mubr.msk.bf16.gmra.mrb[120].mxu1 %vm462_vm5, %v2520_v19 }
0x1514   :  { %4525 = vmatprep.mubr.msk.bf16.mxu1 %vm4986_vm0, %v4985_v0 }
0x151b   :  { %4526 = vmatmul.mubr.msk.bf16.gmra.mrb[124].mxu1 %vm462_vm5, %v2521_v50 }
0x151c   :  { %4545 = vmatprep.mubr.msk.bf16.mxu1 %vm4986_vm0, %v4985_v0 }
0x158b   :  { %v2343_v43 = vpop.f32.mrb[104].mxu1 }
0x158c   :  { %v4483_v46 = vpop.f32.mrb[105].mxu1 }
0x158d   :  { %v2346_v44 = vpop.f32.mrb[106].mxu1 }
0x158e   :  { %v2365_v54 = vpack.c.bf16 %v2346_v44, %v2343_v43  ;;  %v4484_v28 = vpop.f32.mrb[107].mxu1 }
0x1590   :  { %4546 = vmatmul.mubr.msk.bf16.vlgmr.msra.gmra.mrb[128].mxu1 %vm377_vm4, %v2365_v54 }
0x1591   :  { %4549 = vmatprep.mubr.msk.bf16.mxu1 %vm4986_vm0, %v4985_v0 }
0x15c0   :  { %v2351_v52 = vpop.f32.mrb[108].mxu1 }
0x15c1   :  { %v4487_v17 = vpop.f32.mrb[109].mxu1 }
0x15c2   :  { %v2354_v58 = vpop.f32.mrb[110].mxu1 }
0x15c3   :  { %v2366_v55 = vpack.c.bf16 %v2354_v58, %v2351_v52  ;;  %v4488_v63 = vpop.f32.mrb[111].mxu1 }
0x15c5   :  { %4550 = vmatmul.mubr.msk.bf16.gmra.mrb[132].mxu1 %vm377_vm4, %v2366_v55 }
0x15c6   :  { %4553 = vmatprep.mubr.msk.bf16.mxu1 %vm4986_vm0, %v4985_v0 }
0x15c8   :  { %v2359_v61 = vpop.f32.mrb[112].mxu1 }
0x15c9   :  { %v4491_v62 = vpop.f32.mrb[113].mxu1  ;;  %v2367_v51 = vpack.c.bf16 %v2359_v61, %v2359_v61 }
0x15ca   :  { %v2362_v8 = vpop.f32.mrb[114].mxu1 }
0x15cb   :  { %v4492_v49 = vpop.f32.mrb[115].mxu1 }
0x15cd   :  { %4554 = vmatmul.mubr.msk.bf16.gmra.mrb[136].mxu1 %vm377_vm4, %v2367_v51 }
0x15ce   :  { %4581 = vmatprep.mubr.msk.bf16.mxu1 %vm4986_vm0, %v4985_v0 }
0x15de   :  { %v2576_v53 = vpop.f32.mrb[116].mxu1 }
0x15df   :  { %v4519_v57 = vpop.f32.mrb[117].mxu1 }
0x15e0   :  { %v2579_v15 = vpop.f32.mrb[118].mxu1 }
0x15e1   :  { %v2598_v16 = vpack.c.bf16 %v2579_v15, %v2576_v53  ;;  %v4520_v5 = vpop.f32.mrb[119].mxu1 }
0x15e3   :  { %4532 = vmatmul.mubr.msk.bf16.vlgmr.msra.gmra.mrb[124].mxu0 %vm377_vm4, %v2598_v16 }
0x15e4   :  { %4558 = vmatpush3.bf16.xpose.msra.mxu0 %v2759_v40  ;;  %4535 = vmatprep.mubr.msk.bf16.mxu0 %vm4986_vm0, %v4985_v0 }
0x15e5   :  { %4559 = vmatprep.subr.bf16.mxu0 %v4985_v0 }
0x15e6   :  { %v2584_v12 = vpop.f32.mrb[120].mxu1 }
0x15e7   :  { %v4523_v3 = vpop.f32.mrb[121].mxu1 }
0x15e8   :  { %v2587_v18 = vpop.f32.mrb[122].mxu1 }
0x15e9   :  { %v2599_v47 = vpack.c.bf16 %v2587_v18, %v2584_v12  ;;  %v4524_v2 = vpop.f32.mrb[123].mxu1 }
0x15eb   :  { %4536 = vmatmul.mubr.msk.bf16.gmra.mrb[128].mxu0 %vm377_vm4, %v2599_v47 }
0x15ec   :  { %4560 = vmatpush3.bf16.xpose.msra.mxu0 %v2762_v14  ;;  %4539 = vmatprep.mubr.msk.bf16.mxu0 %vm4986_vm0, %v4985_v0 }
0x15ed   :  { %4561 = vmatprep.subr.bf16.mxu0 %v4985_v0 }
0x15ee   :  { %v2592_v9 = vpop.f32.mrb[124].mxu1 }
0x15ef   :  { %v4527_v24 = vpop.f32.mrb[125].mxu1  ;;  %v2600_v27 = vpack.c.bf16 %v2592_v9, %v2592_v9 }
0x15f0   :  { %v2595_v60 = vpop.f32.mrb[126].mxu1 }
0x15f1   :  { %v4528_v1 = vpop.f32.mrb[127].mxu1 }
0x15f3   :  { %4540 = vmatmul.mubr.msk.bf16.gmra.mrb[132].mxu0 %vm377_vm4, %v2600_v27 }
0x15f4   :  { %4562 = vmatpush3.bf16.xpose.msra.mxu0 %v2765_v34  ;;  %4563 = vmatprep.mubr.msk.bf16.mxu0 %vm4986_vm0, %v4985_v0 }
0x15f5   :  { %4593 = vmatprep.subr.bf16.mxu0 %v4985_v0 }
0x15fb   :  { %4564 = vmatmul.mubr.msk.bf16.vlgmr.msra.gmra.mrb[136].mxu0 %vm377_vm4, %v2738_v22 }
0x15fc   :  { %4567 = vmatprep.mubr.msk.bf16.mxu0 %vm4986_vm0, %v4985_v0 }
0x1603   :  { %4568 = vmatmul.mubr.msk.bf16.gmra.mrb[140].mxu0 %vm377_vm4, %v2740_v29 }
0x1604   :  { %4571 = vmatprep.mubr.msk.bf16.mxu0 %vm4986_vm0, %v4985_v0 }
0x160b   :  { %4572 = vmatmul.mubr.msk.bf16.gmra.mrb[144].mxu0 %vm377_vm4, %v2742_v35 }
0x160c   :  { %4595 = vmatprep.mubr.msk.bf16.mxu0 %vm4986_vm0, %v4985_v0 }
0x1663   :  { %v2715_v37 = vpop.f32.mrb[128].mxu1 }
0x1664   :  { %v4547_v30 = vpop.f32.mrb[129].mxu1 }
0x1665   :  { %v2718_v23 = vpop.f32.mrb[130].mxu1 }
0x1666   :  { %v4548_v4 = vpop.f32.mrb[131].mxu1 }
0x1698   :  { %v2723_v42 = vpop.f32.mrb[132].mxu1 }
0x1699   :  { %v4551_v19 = vpop.f32.mrb[133].mxu1 }
0x169a   :  { %v2726_v45 = vpop.f32.mrb[134].mxu1 }
0x169b   :  { %v4552_v6 = vpop.f32.mrb[135].mxu1 }
0x16a0   :  { %v2731_v50 = vpop.f32.mrb[136].mxu1 }
0x16a1   :  { %v4555_v11 = vpop.f32.mrb[137].mxu1 }
0x16a2   :  { %v2734_v38 = vpop.f32.mrb[138].mxu1 }
0x16a3   :  { %v4556_v43 = vpop.f32.mrb[139].mxu1 }
0x16b6   :  { %v2647_v46 = vpop.f32.mrb[124].mxu0 }
0x16b7   :  { %v6053_v44 = vadd.f32 %v2715_v37, %v2647_v46  ;;  %v4533_v54 = vpop.f32.mrb[125].mxu0 }
0x16b8   :  { %v2650_v28 = vpop.f32.mrb[126].mxu0 }
0x16b9   :  { %v6055_v52 = vadd.f32 %v2718_v23, %v2650_v28  ;;  %v4534_v17 = vpop.f32.mrb[127].mxu0 }
0x16be   :  { %v2655_v58 = vpop.f32.mrb[128].mxu0 }
0x16bf   :  { %v6057_v55 = vadd.f32 %v2723_v42, %v2655_v58  ;;  %v4537_v63 = vpop.f32.mrb[129].mxu0 }
0x16c0   :  { %v2658_v61 = vpop.f32.mrb[130].mxu0 }
0x16c1   :  { %v6059_v62 = vadd.f32 %v2726_v45, %v2658_v61  ;;  %v4538_v8 = vpop.f32.mrb[131].mxu0 }
0x16c6   :  { %v2663_v51 = vpop.f32.mrb[132].mxu0 }
0x16c7   :  { %v6061_v49 = vadd.f32 %v2731_v50, %v2663_v51  ;;  %v4541_v53 = vpop.f32.mrb[133].mxu0 }
0x16c8   :  { %v2666_v57 = vpop.f32.mrb[134].mxu0 }
0x16c9   :  { %v4542_v7 = vpop.f32.mrb[135].mxu0 }
0x16ce   :  { %v2801_v15 = vpop.f32.mrb[136].mxu0 }
0x16cf   :  { %v2823_v16 = vmul.f32 0.35355338, %v2801_v15  ;;  %v4565_v5 = vpop.f32.mrb[137].mxu0 }
0x16d0   :  { %v2804_v40 = vpop.f32.mrb[138].mxu0 }
0x16d1   :  { %v2828_v12 = vadd.f32 %v5844_v41, %v2823_v16  ;;  %v2824_v3 = vmul.f32 0.35355338, %v2804_v40  ;;  %v4566_v20 = vpop.f32.mrb[139].mxu0 }
0x16d3   :  { %v2829_v18 = vadd.f32 %v5852_v13, %v2824_v3  ;;  %v2833_v47 = vsel %vm462_vm5, %v2828_v12, -inf }
0x16d4   :  { %2834 = vmax.xlane.f32.xlu0 %v2833_v47 }
0x16d5   :  { %v2836_v2 = vsel %vm462_vm5, %v2829_v18, -inf }
0x16d6   :  { %2837 = vmax.xlane.f32.xlu1 %v2836_v2  ;;  %v2809_v14 = vpop.f32.mrb[140].mxu0 }
0x16d7   :  { %v2825_v9 = vmul.f32 0.35355338, %v2809_v14  ;;  %v4569_v24 = vpop.f32.mrb[141].mxu0 }
0x16d8   :  { %v2812_v26 = vpop.f32.mrb[142].mxu0 }
0x16d9   :  { %v2830_v60 = vadd.f32 %v5864_v59, %v2825_v9  ;;  %v2826_v27 = vmul.f32 0.35355338, %v2812_v26  ;;  %v4570_v1 = vpop.f32.mrb[143].mxu0 }
0x16db   :  { %v2831_v34 = vadd.f32 %v5870_v25, %v2826_v27  ;;  %v2839_v22 = vsel %vm462_vm5, %v2830_v60, -inf }
0x16dc   :  { %2840 = vmax.xlane.f32.xlu0 %v2839_v22 }
0x16dd   :  { %v2842_v30 = vsel %vm462_vm5, %v2831_v34, -inf }
0x16de   :  { %v2817_v29 = vpop.f32.mrb[144].mxu0 }
0x16df   :  { %v2827_v35 = vmul.f32 0.35355338, %v2817_v29  ;;  %v4573_v37 = vpop.f32.mrb[145].mxu0 }
0x16e0   :  { %2843 = vmax.xlane.f32.xlu0 %v2842_v30  ;;  %v2820_v23 = vpop.f32.mrb[146].mxu0 }
0x16e1   :  { %v2832_v4 = vadd.f32 %v5881_v36, %v2827_v35  ;;  %v4574_v42 = vpop.f32.mrb[147].mxu0 }
0x16e3   :  { %v2845_v19 = vsel %vm475_vm6, %v2832_v4, -inf }
0x16e4   :  { %2846 = vmax.xlane.f32.xlu0 %v2845_v19 }
0x16e7   :  { %2891 = vrot.lane.b32.xlu1 %v5784_v10, %s4994_s26 }
0x1761   :  { %v2835_v45 = vpop.xlane.xlu0 %2834 }
0x1762   :  { %v2848_v6 = vsub.f32 %v2828_v12, %v2835_v45 }
0x1763   :  { %v2838_v50 = vpop.xlane.xlu1 %2837 }
0x1764   :  { %v2853_v11 = vmul.f32 1.442695, %v2848_v6  ;;  %v2849_v38 = vsub.f32 %v2829_v18, %v2838_v50 }
0x1766   :  { %4910 = vpow2.f32 %v2853_v11  ;;  %v2855_v43 = vmul.f32 1.442695, %v2849_v38 }
0x1767   :  { %v2892_v46 = vpop.permute.xlu1 %2891 }
0x1768   :  { %4912 = vpow2.f32 %v2855_v43  ;;  %4576 = vmatpush3.bf16.msra.mxu1 %v2892_v46 }
0x1769   :  { %v2841_v54 = vpop.xlane.xlu0 %2840  ;;  %4577 = vmatprep.subr.bf16.mxu1 %v4985_v0 }
0x176a   :  { %v2850_v28 = vsub.f32 %v2830_v60, %v2841_v54 }
0x176c   :  { %v2857_v17 = vmul.f32 1.442695, %v2850_v28 }
0x176d   :  { %v2844_v58 = vpop.xlane.xlu0 %2843 }
0x176e   :  { %4914 = vpow2.f32 %v2857_v17  ;;  %v2851_v63 = vsub.f32 %v2831_v34, %v2844_v58 }
0x1770   :  { %v4911_v61 = vpop.eup %4910  ;;  %v2859_v8 = vmul.f32 1.442695, %v2851_v63  ;;  %v3904_v63 = vld [vmem:[%s6362_s8 + $0x18] sm:$0xf] }
0x1771   :  { %v2847_v51 = vpop.xlane.xlu0 %2846  ;;  %v2863_v53 = vsel %vm462_vm5, %v4911_v61, 0.0 }
0x1772   :  { %v4913_v57 = vpop.eup %4912  ;;  %4916 = vpow2.f32 %v2859_v8  ;;  %v2852_v7 = vsub.f32 %v2832_v4, %v2847_v51  ;;  %2864 = vadd.xlane.f32.xlu1 %v2863_v53 }
0x1773   :  { %v2866_v15 = vsel %vm462_vm5, %v4913_v57, 0.0 }
0x1774   :  { %v2861_v16 = vmul.f32 1.442695, %v2852_v7  ;;  %2867 = vadd.xlane.f32.xlu0 %v2866_v15 }
0x1776   :  { %4918 = vpow2.f32 %v2861_v16 }
0x1778   :  { %v4915_v5 = vpop.eup %4914 }
0x1779   :  { %v2869_v40 = vsel %vm462_vm5, %v4915_v5, 0.0 }
0x177a   :  { %2870 = vadd.xlane.f32.xlu1 %v2869_v40 }
0x177c   :  { %v4917_v12 = vpop.eup %4916 }
0x177d   :  { %v2872_v3 = vsel %vm462_vm5, %v4917_v12, 0.0 }
0x177e   :  { %2873 = vadd.xlane.f32.xlu0 %v2872_v3 }
0x1780   :  { %v4919_v20 = vpop.eup %4918 }
0x1781   :  { %v2875_v18 = vsel %vm475_vm6, %v4919_v20, 0.0 }
0x1782   :  { %2876 = vadd.xlane.f32.xlu0 %v2875_v18 }
0x178b   :  { %2895 = vrot.lane.b32.xlu1 %v5792_v21, %s4994_s26 }
0x178f   :  { %3049 = vrot.lane.b32.xlu1 %v5784_v10, %s6388_s22 }
0x1793   :  { %3051 = vrot.lane.b32.xlu1 %v5788_v32, %s6388_s22 }
0x1797   :  { %3053 = vrot.lane.b32.xlu1 %v5792_v21, %s6388_s22 }
0x1798   :  { %2893 = vrot.lane.b32.xlu0 %v5788_v32, %s4994_s26 }
0x179b   :  { %3045 = vrot.lane.b32.xlu1 %v5788_v32, %s6389_s24 }
0x179c   :  { %3043 = vrot.lane.b32.xlu0 %v5784_v10, %s6389_s24 }
0x17a0   :  { %3047 = vrot.lane.b32.xlu0 %v5792_v21, %s6389_s24 }
0x17ff   :  { %v2865_v2 = vpop.xlane.xlu1 %2864 }
0x1801   :  { %v2868_v47 = vpop.xlane.xlu0 %2867 }
0x1802   :  { %4920 = vrcp.f32 %v2868_v47 }
0x1803   :  { %4922 = vrcp.f32 %v2865_v2 }
0x1807   :  { %v2871_v9 = vpop.xlane.xlu1 %2870 }
0x180b   :  { %v2874_v14 = vpop.xlane.xlu0 %2873  ;;  %v2896_v1 = vpop.permute.xlu1 %2895 }
0x180c   :  { %4924 = vrcp.f32 %v2874_v14  ;;  %v4921_v26 = vpop.eup %4920  ;;  %v2909_v29 = vsel %vm539_vm7, %v2896_v1, 0 }
0x180d   :  { %4926 = vrcp.f32 %v2871_v9  ;;  %v4923_v27 = vpop.eup %4922  ;;  %v2884_v34 = vmul.f32 %v4921_v26, %v4913_v57 }
0x180e   :  { %v2883_v22 = vmul.f32 %v4923_v27, %v4911_v61  ;;  %v2980_v61 = vsel %vm844_vm8, %v3904_v63, 0 }
0x180f   :  { %v2877_v24 = vpop.xlane.xlu0 %2876  ;;  %v3050_v23 = vpop.permute.xlu1 %3049  ;;  %4594 = vmatpush3.bf16.msra.mxu0 %v2980_v61 }
0x1810   :  { %4928 = vrcp.f32 %v2877_v24  ;;  %v2888_v35 = vpack.c.bf16 %v2884_v34, %v2883_v22  ;;  %v3065_v19 = vsel %vm377_vm4, %v3050_v23, 0  ;;  %4625 = vmatprep.subr.bf16.mxu0 %v4985_v0 }
0x1813   :  { %v2894_v60 = vpop.permute.xlu0 %2893  ;;  %v3052_v50 = vpop.permute.xlu1 %3051 }
0x1814   :  { %4578 = vmatpush3.bf16.msra.mxu1 %v2894_v60  ;;  %v3068_v38 = vsel %vm377_vm4, %v3052_v50, 0 }
0x1815   :  { %4579 = vmatprep.subr.bf16.mxu1 %v4985_v0 }
0x1816   :  { %v4925_v37 = vpop.eup %4924 }
0x1817   :  { %v4927_v30 = vpop.eup %4926  ;;  %v2886_v4 = vmul.f32 %v4925_v37, %v4917_v12  ;;  %v3054_v46 = vpop.permute.xlu1 %3053 }
0x1818   :  { %4580 = vmatpush3.bf16.msra.mxu1 %v2909_v29  ;;  %v2885_v42 = vmul.f32 %v4927_v30, %v4915_v5  ;;  %v3071_v54 = vsel %vm377_vm4, %v3054_v46, 0  ;;  %v3044_v28 = vpop.permute.xlu0 %3043 }
0x1819   :  { %4607 = vmatprep.subr.bf16.mxu1 %v4985_v0 }
0x181a   :  { %v2889_v45 = vpack.c.bf16 %v2886_v4, %v2885_v42  ;;  %v4929_v6 = vpop.eup %4928 }
0x181b   :  { %4582 = vmatmul.mubr.msk.bf16.vlgmr.msra.gmra.mrb[140].mxu1 %vm462_vm5, %v2888_v35  ;;  %v2887_v11 = vmul.f32 %v4929_v6, %v4919_v20  ;;  %v3046_v17 = vpop.permute.xlu1 %3045 }
0x181c   :  { %4585 = vmatprep.mubr.msk.bf16.mxu1 %vm4986_vm0, %v4985_v0  ;;  %v3048_v58 = vpop.permute.xlu0 %3047 }
0x181d   :  { %v2890_v43 = vpack.c.bf16 %v2887_v11, %v2887_v11 }
0x1821   :  { %4608 = vmatpush3.bf16.xpose.msra.mxu1 %v3065_v19 }
0x1822   :  { %4609 = vmatprep.subr.bf16.mxu1 %v4985_v0 }
0x1823   :  { %4586 = vmatmul.mubr.msk.bf16.gmra.mrb[144].mxu1 %vm462_vm5, %v2889_v45 }
0x1824   :  { %4589 = vmatprep.mubr.msk.bf16.mxu1 %vm4986_vm0, %v4985_v0 }
0x1829   :  { %4610 = vmatpush3.bf16.xpose.msra.mxu1 %v3068_v38 }
0x182a   :  { %4611 = vmatprep.subr.bf16.mxu1 %v4985_v0 }
0x182b   :  { %4590 = vmatmul.mubr.msk.bf16.gmra.mrb[148].mxu1 %vm462_vm5, %v2890_v43 }
0x182c   :  { %4613 = vmatprep.mubr.msk.bf16.mxu1 %vm4986_vm0, %v4985_v0 }
0x1831   :  { %4612 = vmatpush3.bf16.xpose.msra.mxu1 %v3071_v54 }
0x1832   :  { %4643 = vmatprep.subr.bf16.mxu1 %v4985_v0 }
0x1838   :  { %4614 = vmatmul.mubr.msk.bf16.vlgmr.msra.gmra.mrb[152].mxu1 %vm377_vm4, %v3044_v28 }
0x1839   :  { %4617 = vmatprep.mubr.msk.bf16.mxu1 %vm4986_vm0, %v4985_v0 }
0x1840   :  { %4618 = vmatmul.mubr.msk.bf16.gmra.mrb[156].mxu1 %vm377_vm4, %v3046_v17 }
0x1841   :  { %4621 = vmatprep.mubr.msk.bf16.mxu1 %vm4986_vm0, %v4985_v0 }
0x1848   :  { %4622 = vmatmul.mubr.msk.bf16.gmra.mrb[160].mxu1 %vm377_vm4, %v3048_v58 }
0x1849   :  { %4645 = vmatprep.mubr.msk.bf16.mxu1 %vm4986_vm0, %v4985_v0 }
0x18ee   :  { %v2945_v8 = vpop.f32.mrb[140].mxu1 }
0x18ef   :  { %v4583_v51 = vpop.f32.mrb[141].mxu1 }
0x18f0   :  { %v2948_v53 = vpop.f32.mrb[142].mxu1 }
0x18f1   :  { %v2967_v57 = vpack.c.bf16 %v2948_v53, %v2945_v8  ;;  %v4584_v7 = vpop.f32.mrb[143].mxu1 }
0x18f3   :  { %4596 = vmatmul.mubr.msk.bf16.vlgmr.msra.gmra.mrb[148].mxu0 %vm377_vm4, %v2967_v57 }
0x18f4   :  { %4599 = vmatprep.mubr.msk.bf16.mxu0 %vm4986_vm0, %v4985_v0 }
0x18f6   :  { %v2953_v15 = vpop.f32.mrb[144].mxu1 }
0x18f7   :  { %v4587_v16 = vpop.f32.mrb[145].mxu1 }
0x18f8   :  { %v2956_v5 = vpop.f32.mrb[146].mxu1 }
0x18f9   :  { %v2968_v40 = vpack.c.bf16 %v2956_v5, %v2953_v15  ;;  %v4588_v12 = vpop.f32.mrb[147].mxu1 }
0x18fb   :  { %4600 = vmatmul.mubr.msk.bf16.gmra.mrb[152].mxu0 %vm377_vm4, %v2968_v40 }
0x18fc   :  { %4603 = vmatprep.mubr.msk.bf16.mxu0 %vm4986_vm0, %v4985_v0 }
0x18fe   :  { %v2961_v3 = vpop.f32.mrb[148].mxu1 }
0x18ff   :  { %v4591_v20 = vpop.f32.mrb[149].mxu1  ;;  %v2969_v47 = vpack.c.bf16 %v2961_v3, %v2961_v3 }
0x1900   :  { %v2964_v18 = vpop.f32.mrb[150].mxu1 }
0x1901   :  { %v4592_v2 = vpop.f32.mrb[151].mxu1 }
0x1903   :  { %4604 = vmatmul.mubr.msk.bf16.gmra.mrb[156].mxu0 %vm377_vm4, %v2969_v47 }
0x1904   :  { %4631 = vmatprep.mubr.msk.bf16.mxu0 %vm4986_vm0, %v4985_v0 }
0x190b   :  { %v3107_v14 = vpop.f32.mrb[152].mxu1 }
0x190c   :  { %v3129_v9 = vmul.f32 0.35355338, %v3107_v14  ;;  %v4615_v24 = vpop.f32.mrb[153].mxu1 }
0x190d   :  { %v3110_v26 = vpop.f32.mrb[154].mxu1 }
0x190e   :  { %v3134_v60 = vadd.f32 %v5844_v41, %v3129_v9  ;;  %v3130_v27 = vmul.f32 0.35355338, %v3110_v26  ;;  %v4616_v1 = vpop.f32.mrb[155].mxu1 }
0x1910   :  { %v3135_v34 = vadd.f32 %v5852_v13, %v3130_v27  ;;  %v3139_v22 = vsel %vm462_vm5, %v3134_v60, -inf }
0x1911   :  { %3140 = vmax.xlane.f32.xlu1 %v3139_v22 }
0x1912   :  { %v3142_v29 = vsel %vm462_vm5, %v3135_v34, -inf }
0x1913   :  { %3143 = vmax.xlane.f32.xlu0 %v3142_v29  ;;  %v3115_v35 = vpop.f32.mrb[156].mxu1 }
0x1914   :  { %v3131_v37 = vmul.f32 0.35355338, %v3115_v35  ;;  %v4619_v30 = vpop.f32.mrb[157].mxu1 }
0x1915   :  { %v3118_v23 = vpop.f32.mrb[158].mxu1 }
0x1916   :  { %v3136_v4 = vadd.f32 %v5864_v59, %v3131_v37  ;;  %v3132_v42 = vmul.f32 0.35355338, %v3118_v23  ;;  %v4620_v19 = vpop.f32.mrb[159].mxu1 }
0x1918   :  { %v3137_v41 = vadd.f32 %v5870_v25, %v3132_v42  ;;  %v3145_v45 = vsel %vm462_vm5, %v3136_v4, -inf }
0x1919   :  { %3146 = vmax.xlane.f32.xlu0 %v3145_v45 }
0x191a   :  { %v3148_v11 = vsel %vm462_vm5, %v3137_v41, -inf }
0x191b   :  { %v3123_v13 = vpop.f32.mrb[160].mxu1 }
0x191c   :  { %v3133_v6 = vmul.f32 0.35355338, %v3123_v13  ;;  %v4623_v50 = vpop.f32.mrb[161].mxu1 }
0x191d   :  { %3149 = vmax.xlane.f32.xlu0 %v3148_v11  ;;  %v3126_v38 = vpop.f32.mrb[162].mxu1 }
0x191e   :  { %v3138_v43 = vadd.f32 %v5881_v36, %v3133_v6  ;;  %v4624_v46 = vpop.f32.mrb[163].mxu1 }
0x1920   :  { %v3151_v54 = vsel %vm475_vm6, %v3138_v43, -inf }
0x1921   :  { %3152 = vmax.xlane.f32.xlu1 %v3151_v54 }
0x199e   :  { %v3141_v59 = vpop.xlane.xlu1 %3140 }
0x199f   :  { %v3154_v28 = vsub.f32 %v3134_v60, %v3141_v59 }
0x19a0   :  { %v3144_v17 = vpop.xlane.xlu0 %3143 }
0x19a1   :  { %v3159_v25 = vmul.f32 1.442695, %v3154_v28  ;;  %v3155_v58 = vsub.f32 %v3135_v34, %v3144_v17 }
0x19a3   :  { %4930 = vpow2.f32 %v3159_v25  ;;  %v3161_v63 = vmul.f32 1.442695, %v3155_v58 }
0x19a5   :  { %4932 = vpow2.f32 %v3161_v63 }
0x19a6   :  { %v3147_v61 = vpop.xlane.xlu0 %3146 }
0x19a7   :  { %v3156_v8 = vsub.f32 %v3136_v4, %v3147_v61 }
0x19a9   :  { %v3163_v51 = vmul.f32 1.442695, %v3156_v8 }
0x19aa   :  { %v3150_v47 = vpop.xlane.xlu0 %3149 }
0x19ab   :  { %4934 = vpow2.f32 %v3163_v51 }
0x19ad   :  { %v6148_v53 = vpop.eup %4930 }
0x19ae   :  { %v3169_v36 = vsel %vm462_vm5, %v6148_v53, 0.0  ;;  %v3153_v26 = vpop.xlane.xlu1 %3152 }
0x19af   :  { %v4933_v57 = vpop.eup %4932  ;;  %3170 = vadd.xlane.f32.xlu0 %v3169_v36 }
0x19b0   :  { %v3172_v7 = vsel %vm462_vm5, %v4933_v57, 0.0 }
0x19b1   :  { %3173 = vadd.xlane.f32.xlu1 %v3172_v7 }
0x19b5   :  { %v6153_v15 = vpop.eup %4934 }
0x19b6   :  { %v3175_v16 = vsel %vm462_vm5, %v6153_v15, 0.0 }
0x19b7   :  { %3176 = vadd.xlane.f32.xlu0 %v3175_v16 }
0x19c2   :  { %3199 = vrot.lane.b32.xlu1 %v5788_v32, %s6390_s4  ;;  %v3157_v32 = vsub.f32 %v3137_v41, %v3150_v47 }
0x19c4   :  { %v3165_v27 = vmul.f32 1.442695, %v3157_v32 }
0x19c6   :  { %v3016_v5 = vpop.f32.mrb[148].mxu0  ;;  %4936 = vpow2.f32 %v3165_v27  ;;  %v3943_v27 = vld [vmem:[%s6363_s9 + $0x1] ss:$0 sm:$0xff] }
0x19c7   :  { %v6160_v40 = vadd.f32 %v3016_v5, %v6053_v44  ;;  %v4597_v12 = vpop.f32.mrb[149].mxu0 }
0x19c8   :  { %v3019_v3 = vpop.f32.mrb[150].mxu0 }
0x19c9   :  { %v6163_v20 = vadd.f32 %v3019_v3, %v6055_v52  ;;  %v4598_v18 = vpop.f32.mrb[151].mxu0  ;;  %v3158_v52 = vsub.f32 %v3138_v43, %v3153_v26 }
0x19cd   :  { %3197 = vrot.lane.b32.xlu0 %v5784_v10, %s6390_s4  ;;  %v3167_v10 = vmul.f32 1.442695, %v3158_v52 }
0x19ce   :  { %v3024_v2 = vpop.f32.mrb[152].mxu0 }
0x19cf   :  { %v6168_v14 = vadd.f32 %v3024_v2, %v6057_v55  ;;  %v4601_v9 = vpop.f32.mrb[153].mxu0  ;;  %4938 = vpow2.f32 %v3167_v10 }
0x19d0   :  { %v3027_v24 = vpop.f32.mrb[154].mxu0  ;;  %v4937_v35 = vpop.eup %4936 }
0x19d1   :  { %v6171_v44 = vadd.f32 %v3027_v24, %v6059_v62  ;;  %v4602_v60 = vpop.f32.mrb[155].mxu0  ;;  %v3178_v37 = vsel %vm462_vm5, %v4937_v35, 0.0 }
0x19d6   :  { %v3032_v1 = vpop.f32.mrb[156].mxu0 }
0x19d7   :  { %v6174_v34 = vadd.f32 %v3032_v1, %v6061_v49  ;;  %v4605_v22 = vpop.f32.mrb[157].mxu0  ;;  %v3905_v49 = vld [vmem:[%s6362_s8 + $0x1c] sm:$0xf] }
0x19d8   :  { %v3035_v29 = vpop.f32.mrb[158].mxu0  ;;  %v3286_v23 = vsel %vm844_vm8, %v3905_v49, 0 }
0x19d9   :  { %v4606_v55 = vpop.f32.mrb[159].mxu0  ;;  %v4939_v30 = vpop.eup %4938  ;;  %4644 = vmatpush3.bf16.msra.mxu1 %v3286_v23 }
0x19da   :  { %v3181_v62 = vsel %vm475_vm6, %v4939_v30, 0.0  ;;  %4673 = vmatprep.subr.bf16.mxu1 %v4985_v0 }
0x19e6   :  { %3179 = vadd.xlane.f32.xlu1 %v3178_v37 }
0x19ea   :  { %3182 = vadd.xlane.f32.xlu1 %v3181_v62 }
0x19fb   :  { %3201 = vrot.lane.b32.xlu1 %v5792_v21, %s6390_s4 }
0x1a3c   :  { %v3171_v4 = vpop.xlane.xlu0 %3170 }
0x1a3e   :  { %v3174_v19 = vpop.xlane.xlu1 %3173 }
0x1a3f   :  { %4940 = vrcp.f32 %v3174_v19 }
0x1a40   :  { %4942 = vrcp.f32 %v3171_v4 }
0x1a42   :  { %v3200_v45 = vpop.permute.xlu1 %3199 }
0x1a44   :  { %v3177_v42 = vpop.xlane.xlu0 %3176 }
0x1a48   :  { %v3198_v41 = vpop.permute.xlu0 %3197 }
0x1a49   :  { %4626 = vmatpush3.bf16.msra.mxu0 %v3198_v41  ;;  %v4941_v13 = vpop.eup %4940 }
0x1a4a   :  { %4627 = vmatprep.subr.bf16.mxu0 %v4985_v0  ;;  %v4943_v50 = vpop.eup %4942  ;;  %v3190_v11 = vmul.f32 %v4941_v13, %v4933_v57 }
0x1a4b   :  { %v3189_v43 = vmul.f32 %v4943_v50, %v6148_v53 }
0x1a4d   :  { %4628 = vmatpush3.bf16.msra.mxu0 %v3200_v45  ;;  %v3194_v54 = vpack.c.bf16 %v3190_v11, %v3189_v43 }
0x1a4e   :  { %4629 = vmatprep.subr.bf16.mxu0 %v4985_v0 }
0x1a73   :  { %v3180_v21 = vpop.xlane.xlu1 %3179 }
0x1a74   :  { %4944 = vrcp.f32 %v3180_v21 }
0x1a75   :  { %4946 = vrcp.f32 %v3177_v42 }
0x1a77   :  { %v3183_v6 = vpop.xlane.xlu1 %3182 }
0x1a78   :  { %4948 = vrcp.f32 %v3183_v6 }
0x1a7b   :  { %v3202_v38 = vpop.permute.xlu1 %3201 }
0x1a7c   :  { %v3215_v46 = vsel %vm539_vm7, %v3202_v38, 0 }
0x1a7d   :  { %4630 = vmatpush3.bf16.msra.mxu0 %v3215_v46 }
0x1a7e   :  { %4657 = vmatprep.subr.bf16.mxu0 %v4985_v0  ;;  %v4945_v59 = vpop.eup %4944 }
0x1a7f   :  { %v4947_v28 = vpop.eup %4946  ;;  %v3192_v17 = vmul.f32 %v4945_v59, %v4937_v35 }
0x1a80   :  { %4632 = vmatmul.mubr.msk.bf16.vlgmr.msra.gmra.mrb[160].mxu0 %vm462_vm5, %v3194_v54  ;;  %v3191_v25 = vmul.f32 %v4947_v28, %v6153_v15 }
0x1a81   :  { %4635 = vmatprep.mubr.msk.bf16.mxu0 %vm4986_vm0, %v4985_v0 }
0x1a82   :  { %v3195_v58 = vpack.c.bf16 %v3192_v17, %v3191_v25  ;;  %v4949_v63 = vpop.eup %4948 }
0x1a83   :  { %v3193_v61 = vmul.f32 %v4949_v63, %v4939_v30 }
0x1a85   :  { %v3196_v8 = vpack.c.bf16 %v3193_v61, %v3193_v61 }
0x1a88   :  { %4636 = vmatmul.mubr.msk.bf16.gmra.mrb[164].mxu0 %vm462_vm5, %v3195_v58 }
0x1a89   :  { %4639 = vmatprep.mubr.msk.bf16.mxu0 %vm4986_vm0, %v4985_v0 }
0x1a90   :  { %4640 = vmatmul.mubr.msk.bf16.gmra.mrb[168].mxu0 %vm462_vm5, %v3196_v8 }
0x1a91   :  { %4661 = vmatprep.mubr.msk.bf16.mxu0 %vm4986_vm0, %v4985_v0 }
0x1b53   :  { %v3251_v51 = vpop.f32.mrb[160].mxu0 }
0x1b54   :  { %v4633_v53 = vpop.f32.mrb[161].mxu0 }
0x1b55   :  { %v3254_v36 = vpop.f32.mrb[162].mxu0 }
0x1b56   :  { %v3273_v57 = vpack.c.bf16 %v3254_v36, %v3251_v51  ;;  %v4634_v7 = vpop.f32.mrb[163].mxu0 }
0x1b58   :  { %4646 = vmatmul.mubr.msk.bf16.vlgmr.msra.gmra.mrb[164].mxu1 %vm377_vm4, %v3273_v57 }
0x1b59   :  { %4649 = vmatprep.mubr.msk.bf16.mxu1 %vm4986_vm0, %v4985_v0 }
0x1b5b   :  { %v3259_v15 = vpop.f32.mrb[164].mxu0 }
0x1b5c   :  { %v4637_v16 = vpop.f32.mrb[165].mxu0 }
0x1b5d   :  { %v3262_v5 = vpop.f32.mrb[166].mxu0 }
0x1b5e   :  { %v3274_v12 = vpack.c.bf16 %v3262_v5, %v3259_v15  ;;  %v4638_v3 = vpop.f32.mrb[167].mxu0 }
0x1b60   :  { %4650 = vmatmul.mubr.msk.bf16.gmra.mrb[168].mxu1 %vm377_vm4, %v3274_v12 }
0x1b61   :  { %4653 = vmatprep.mubr.msk.bf16.mxu1 %vm4986_vm0, %v4985_v0 }
0x1b63   :  { %v3267_v18 = vpop.f32.mrb[168].mxu0 }
0x1b64   :  { %v4641_v47 = vpop.f32.mrb[169].mxu0  ;;  %v3275_v9 = vpack.c.bf16 %v3267_v18, %v3267_v18  ;;  %v4740_v18 = vld [vmem:[%s6364_s12 + $0x10] sm:$0xff]  }
0x1b65   :  { %v3270_v2 = vpop.f32.mrb[170].mxu0  ;;  %4658 = vmatpush3.bf16.msra.mxu0 %v4740_v18  ;;  %v4741_v47 = vld [vmem:[%s6364_s12 + $0x18] sm:$0xff]  }
0x1b66   :  { %v4642_v32 = vpop.f32.mrb[171].mxu0  ;;  %4659 = vmatprep.subr.bf16.mxu0 %v4985_v0  ;;  %v4742_v2 = vld [vmem:[%s6365_s14 + $0x40] sm:$0xff]  }
0x1b67   :  { %4674 = vmatpush3.bf16.msra.mxu1 %v4742_v2 }
0x1b68   :  { %4654 = vmatmul.mubr.msk.bf16.gmra.mrb[172].mxu1 %vm377_vm4, %v3275_v9  ;;  %v4743_v9 = vld [vmem:[%s6365_s14 + $0x48] sm:$0xff]   ;;  %4675 = vmatprep.subr.bf16.mxu1 %v4985_v0 }
0x1b69   :  { %4689 = vmatprep.mubr.msk.bf16.mxu1 %vm4986_vm0, %v4985_v0  ;;  %4660 = vmatpush3.bf16.msra.mxu0 %v4741_v47 }
0x1b6b   :  { %4676 = vmatpush3.bf16.msra.mxu1 %v4743_v9 }
0x1b6c   :  { %4677 = vmatprep.subr.bf16.mxu1 %v4985_v0 }
0x1c2b   :  { %v3322_v24 = vpop.f32.mrb[164].mxu1 }
0x1c2c   :  { %v3344_v26 = vadd.f32 %v3322_v24, %v6160_v40  ;;  %v4647_v60 = vpop.f32.mrb[165].mxu1 }
0x1c2d   :  { %v3325_v52 = vpop.f32.mrb[166].mxu1 }
0x1c2e   :  { %v3349_v1 = vadd.f32 %v3344_v26, %v5724_v33  ;;  %v3345_v22 = vadd.f32 %v3325_v52, %v6163_v20  ;;  %v4648_v10 = vpop.f32.mrb[167].mxu1 }
0x1c30   :  { %v6215_v29 = vadd.f32 %v3943_v27, %v3349_v1  ;;  %v3350_v55 = vadd.f32 %v3345_v22, %v5727_v39 }
0x1c32   :  { %v6218_v35 = vadd.f32 %v3943_v27, %v3350_v55  ;;  %v3371_v40 = vsel %vm180_vm2, %v6215_v29, 0.0 }
0x1c33   :  { %3372 = vadd.xlane.f32.xlu0 %v3371_v40  ;;  %v3330_v37 = vpop.f32.mrb[168].mxu1 }
0x1c34   :  { %v3346_v30 = vadd.f32 %v3330_v37, %v6168_v14  ;;  %v4651_v62 = vpop.f32.mrb[169].mxu1  ;;  %v3374_v33 = vsel %vm180_vm2, %v6218_v35, 0.0 }
0x1c35   :  { %3375 = vadd.xlane.f32.xlu1 %v3374_v33  ;;  %v3333_v20 = vpop.f32.mrb[170].mxu1 }
0x1c36   :  { %v3351_v49 = vadd.f32 %v3346_v30, %v5734_v31  ;;  %v3347_v23 = vadd.f32 %v3333_v20, %v6171_v44  ;;  %v4652_v39 = vpop.f32.mrb[171].mxu1  ;;  %v3946_v30 = vld [vmem:[%s6366_s10 + $0x1] ss:$0 sm:$0xff] }
0x1c38   :  { %v6227_v4 = vadd.f32 %v3943_v27, %v3351_v49  ;;  %v3352_v42 = vadd.f32 %v3347_v23, %v5737_v48 }
0x1c3a   :  { %v6230_v19 = vadd.f32 %v3943_v27, %v3352_v42  ;;  %v3377_v14 = vsel %vm180_vm2, %v6227_v4, 0.0 }
0x1c3b   :  { %3378 = vadd.xlane.f32.xlu0 %v3377_v14  ;;  %v3338_v41 = vpop.f32.mrb[172].mxu1  ;;  %v3947_v14 = vld [vmem:[%s6367_s11 + $0x1] ss:$0 sm:$0xff] }
0x1c3c   :  { %v3348_v45 = vadd.f32 %v3338_v41, %v6174_v34  ;;  %v4655_v21 = vpop.f32.mrb[173].mxu1  ;;  %v3380_v44 = vsel %vm180_vm2, %v6230_v19, 0.0 }
0x1c3d   :  { %v3341_v13 = vpop.f32.mrb[174].mxu1 }
0x1c3e   :  { %v3353_v31 = vadd.f32 %v3348_v45, %v5744_v56  ;;  %v4656_v6 = vpop.f32.mrb[175].mxu1 }
0x1c3f   :  { %3381 = vadd.xlane.f32.xlu0 %v3380_v44 }
0x1c40   :  { %v6238_v50 = vadd.f32 %v3943_v27, %v3353_v31 }
0x1c42   :  { %v3383_v48 = vsel %vm193_vm3, %v6238_v50, 0.0 }
0x1c43   :  { %3384 = vadd.xlane.f32.xlu0 %v3383_v48 }
0x1cc0   :  { %v3373_v11 = vpop.xlane.xlu0 %3372 }
0x1cc1   :  { %v3386_v38 = vmul.f32 0.03125, %v3373_v11 }
0x1cc2   :  { %v3376_v43 = vpop.xlane.xlu1 %3375 }
0x1cc3   :  { %v3391_v34 = vsub.f32 %v6215_v29, %v3386_v38  ;;  %v3387_v46 = vmul.f32 0.03125, %v3376_v43 }
0x1cc5   :  { %v3392_v54 = vsub.f32 %v6218_v35, %v3387_v46  ;;  %v3396_v56 = vmul.f32 %v3391_v34, %v3391_v34 }
0x1cc7   :  { %v3401_v59 = vsel %vm180_vm2, %v3396_v56, 0.0  ;;  %v3397_v28 = vmul.f32 %v3392_v54, %v3392_v54 }
0x1cc8   :  { %3402 = vadd.xlane.f32.xlu1 %v3401_v59  ;;  %v3379_v17 = vpop.xlane.xlu0 %3378 }
0x1cc9   :  { %v3388_v25 = vmul.f32 0.03125, %v3379_v17  ;;  %v3404_v58 = vsel %vm180_vm2, %v3397_v28, 0.0 }
0x1cca   :  { %3405 = vadd.xlane.f32.xlu0 %v3404_v58  ;;  %v4744_v58 = vld [vmem:[%s6365_s14 + $0x50] sm:$0xff]  }
0x1ccb   :  { %v3393_v63 = vsub.f32 %v6227_v4, %v3388_v25  ;;  %4678 = vmatpush3.bf16.msra.mxu1 %v4744_v58 }
0x1ccc   :  { %v3382_v61 = vpop.xlane.xlu0 %3381  ;;  %4679 = vmatprep.subr.bf16.mxu1 %v4985_v0 }
0x1ccd   :  { %v3389_v8 = vmul.f32 0.03125, %v3382_v61  ;;  %v3398_v51 = vmul.f32 %v3393_v63, %v3393_v63  ;;  %v4746_v61 = vld [vmem:[%s6365_s14 + $0x60] sm:$0xff]  }
0x1ccf   :  { %v3394_v53 = vsub.f32 %v6230_v19, %v3389_v8  ;;  %v3407_v36 = vsel %vm180_vm2, %v3398_v51, 0.0  ;;  %v4747_v8 = vld [vmem:[%s6365_s14 + $0x68] sm:$0xff]   ;;  %v4748_v51 = vld [vmem:[%s6365_s14 + $0x70] sm:$0xff]  }
0x1cd0   :  { %3408 = vadd.xlane.f32.xlu1 %v3407_v36  ;;  %v3385_v57 = vpop.xlane.xlu0 %3384  ;;  %v3953_v36 = vld [vmem:[%s6368_s13 + $0x1] ss:$0 sm:$0xff] }
0x1cd1   :  { %v3390_v7 = vmul.f32 0.03125, %v3385_v57  ;;  %v3399_v15 = vmul.f32 %v3394_v53, %v3394_v53 }
0x1cd3   :  { %v3395_v16 = vsub.f32 %v6238_v50, %v3390_v7  ;;  %v3410_v5 = vsel %vm180_vm2, %v3399_v15, 0.0 }
0x1cd4   :  { %3411 = vadd.xlane.f32.xlu0 %v3410_v5 }
0x1cd5   :  { %v3400_v12 = vmul.f32 %v3395_v16, %v3395_v16 }
0x1cd7   :  { %v3413_v3 = vsel %vm193_vm3, %v3400_v12, 0.0 }
0x1cd8   :  { %3414 = vadd.xlane.f32.xlu1 %v3413_v3 }
0x1d55   :  { %v3403_v32 = vpop.xlane.xlu1 %3402 }
0x1d56   :  { %v3416_v24 = vmul.f32 0.03125, %v3403_v32 }
0x1d57   :  { %v3406_v26 = vpop.xlane.xlu0 %3405 }
0x1d58   :  { %v3421_v60 = vadd.f32 1e-06, %v3416_v24  ;;  %v3417_v27 = vmul.f32 0.03125, %v3406_v26 }
0x1d5a   :  { %4950 = vrsqrt.f32 %v3421_v60  ;;  %v3422_v52 = vadd.f32 1e-06, %v3417_v27 }
0x1d5c   :  { %4952 = vrsqrt.f32 %v3422_v52 }
0x1d5d   :  { %v3409_v1 = vpop.xlane.xlu1 %3408 }
0x1d5e   :  { %v3418_v22 = vmul.f32 0.03125, %v3409_v1 }
0x1d60   :  { %v3423_v10 = vadd.f32 1e-06, %v3418_v22 }
0x1d61   :  { %v3412_v55 = vpop.xlane.xlu0 %3411 }
0x1d62   :  { %4954 = vrsqrt.f32 %v3423_v10  ;;  %v3419_v40 = vmul.f32 0.03125, %v3412_v55 }
0x1d64   :  { %v4951_v37 = vpop.eup %4950  ;;  %v3424_v62 = vadd.f32 1e-06, %v3419_v40 }
0x1d65   :  { %v3431_v33 = vmul.f32 %v4951_v37, %v3391_v34  ;;  %v3415_v20 = vpop.xlane.xlu1 %3414 }
0x1d66   :  { %v4953_v49 = vpop.eup %4952  ;;  %4956 = vrsqrt.f32 %v3424_v62  ;;  %v3420_v23 = vmul.f32 0.03125, %v3415_v20 }
0x1d67   :  { %v3442_v39 = vmul.f32 %v3946_v30, %v3431_v33  ;;  %v3432_v42 = vmul.f32 %v4953_v49, %v3392_v54 }
0x1d68   :  { %v3425_v41 = vadd.f32 1e-06, %v3420_v23 }
0x1d69   :  { %v3443_v45 = vmul.f32 %v3946_v30, %v3432_v42  ;;  %v3453_v21 = vadd.f32 %v3947_v14, %v3442_v39 }
0x1d6a   :  { %4958 = vrsqrt.f32 %v3425_v41 }
0x1d6b   :  { %v3454_v13 = vadd.f32 %v3947_v14, %v3443_v45 }
0x1d6c   :  { %v4955_v31 = vpop.eup %4954 }
0x1d6d   :  { %v3433_v6 = vmul.f32 %v4955_v31, %v3393_v63  ;;  %v3458_v44 = vpack.c.bf16 %v3454_v13, %v3453_v21  ;;  %v4745_v63 = vld [vmem:[%s6365_s14 + $0x58] sm:$0xff]  }
0x1d6e   :  { %4680 = vmatpush3.bf16.msra.mxu1 %v4745_v63 }
0x1d6f   :  { %4662 = vmatmul.mubr.msk.bf16.vlgmr.msra.gmra.mrb[172].mxu0 %vm180_vm2, %v3458_v44  ;;  %v3444_v38 = vmul.f32 %v3946_v30, %v3433_v6  ;;  %4681 = vmatprep.subr.bf16.mxu1 %v4985_v0 }
0x1d70   :  { %v4957_v48 = vpop.eup %4956  ;;  %4665 = vmatprep.mubr.msk.bf16.mxu0 %vm4986_vm0, %v4985_v0 }
0x1d71   :  { %v3434_v11 = vmul.f32 %v4957_v48, %v3394_v53  ;;  %v3455_v46 = vadd.f32 %v3947_v14, %v3444_v38  ;;  %v4749_v53 = vld [vmem:[%s6365_s14 + $0x78] sm:$0xff]  }
0x1d72   :  { %4682 = vmatpush3.bf16.msra.mxu1 %v4746_v61 }
0x1d73   :  { %v3445_v43 = vmul.f32 %v3946_v30, %v3434_v11  ;;  %4683 = vmatprep.subr.bf16.mxu1 %v4985_v0 }
0x1d74   :  { %v4959_v34 = vpop.eup %4958 }
0x1d75   :  { %v3456_v54 = vadd.f32 %v3947_v14, %v3445_v43  ;;  %v3435_v56 = vmul.f32 %v4959_v34, %v3395_v16 }
0x1d76   :  { %4684 = vmatpush3.bf16.msra.mxu1 %v4747_v8 }
0x1d77   :  { %v3459_v59 = vpack.c.bf16 %v3456_v54, %v3455_v46  ;;  %v3446_v28 = vmul.f32 %v3946_v30, %v3435_v56  ;;  %4685 = vmatprep.subr.bf16.mxu1 %v4985_v0  ;;  %v3984_v56 = vld [vmem:[%s6369_s15 + $0x1] ss:$0 sm:$0xff] }
0x1d79   :  { %4666 = vmatmul.mubr.msk.bf16.gmra.mrb[176].mxu0 %vm180_vm2, %v3459_v59  ;;  %v3457_v17 = vadd.f32 %v3947_v14, %v3446_v28 }
0x1d7a   :  { %4669 = vmatprep.mubr.msk.bf16.mxu0 %vm4986_vm0, %v4985_v0  ;;  %4686 = vmatpush3.bf16.msra.mxu1 %v4748_v51 }
0x1d7b   :  { %v3460_v25 = vpack.c.bf16 %v3457_v17, %v3457_v17  ;;  %4687 = vmatprep.subr.bf16.mxu1 %v4985_v0 }
0x1d7e   :  { %4688 = vmatpush3.bf16.msra.mxu1 %v4749_v53 }
0x1d81   :  { %4670 = vmatmul.mubr.msk.bf16.gmra.mrb[180].mxu0 %vm180_vm2, %v3460_v25 }
0x1e42   :  { %v3529_v57 = vpop.f32.mrb[172].mxu0 }
0x1e43   :  { %v3530_v7 = vadd.f32 %v3953_v36, %v3529_v57  ;;  %v4663_v15 = vpop.f32.mrb[173].mxu0 }
0x1e44   :  { %v3532_v16 = vpop.f32.mrb[174].mxu0 }
0x1e45   :  { %v3556_v5 = vmul.f32 0.70710677, %v3530_v7  ;;  %v3533_v12 = vadd.f32 %v3953_v36, %v3532_v16  ;;  %v4664_v3 = vpop.f32.mrb[175].mxu0  ;;  %v3551_v10 = vmul.f32 0.5, %v3530_v7 }
0x1e47   :  { %4960 = verf.f32 %v3556_v5  ;;  %v3557_v18 = vmul.f32 0.70710677, %v3533_v12  ;;  %v3552_v55 = vmul.f32 0.5, %v3533_v12 }
0x1e49   :  { %4962 = verf.f32 %v3557_v18 }
0x1e4c   :  { %v3537_v47 = vpop.f32.mrb[176].mxu0 }
0x1e4d   :  { %v3538_v2 = vadd.f32 %v3953_v36, %v3537_v47  ;;  %v4667_v9 = vpop.f32.mrb[177].mxu0 }
0x1e4e   :  { %v3540_v32 = vpop.f32.mrb[178].mxu0 }
0x1e4f   :  { %v3558_v24 = vmul.f32 0.70710677, %v3538_v2  ;;  %v3541_v26 = vadd.f32 %v3953_v36, %v3540_v32  ;;  %v4668_v60 = vpop.f32.mrb[179].mxu0  ;;  %v3553_v21 = vmul.f32 0.5, %v3538_v2 }
0x1e51   :  { %v4961_v27 = vpop.eup %4960  ;;  %4964 = verf.f32 %v3558_v24  ;;  %v3559_v52 = vmul.f32 0.70710677, %v3541_v26  ;;  %v3554_v13 = vmul.f32 0.5, %v3541_v26 }
0x1e52   :  { %v3566_v1 = vadd.f32 1.0, %v4961_v27 }
0x1e53   :  { %v4963_v22 = vpop.eup %4962  ;;  %4966 = verf.f32 %v3559_v52 }
0x1e54   :  { %v3567_v40 = vadd.f32 1.0, %v4963_v22  ;;  %v3545_v37 = vpop.f32.mrb[180].mxu0  ;;  %v3571_v33 = vmul.f32 %v3566_v1, %v3551_v10 }
0x1e55   :  { %v3546_v30 = vadd.f32 %v3953_v36, %v3545_v37  ;;  %v4671_v62 = vpop.f32.mrb[181].mxu0 }
0x1e56   :  { %v3572_v20 = vmul.f32 %v3567_v40, %v3552_v55  ;;  %v3548_v49 = vpop.f32.mrb[182].mxu0 }
0x1e57   :  { %v3560_v23 = vmul.f32 0.70710677, %v3546_v30  ;;  %v4672_v39 = vpop.f32.mrb[183].mxu0  ;;  %v3555_v38 = vmul.f32 0.5, %v3546_v30 }
0x1e58   :  { %v3576_v42 = vpack.c.bf16 %v3572_v20, %v3571_v33 }
0x1e59   :  { %4968 = verf.f32 %v3560_v23 }
0x1e5a   :  { %4690 = vmatmul.mubr.bf16.vlgmr.msra.gmra.mrb[176].mxu1 %v3576_v42 }
0x1e5b   :  { %v4965_v14 = vpop.eup %4964  ;;  %4693 = vmatprep.mubr.msk.bf16.mxu1 %vm4986_vm0, %v4985_v0 }
0x1e5c   :  { %v3568_v41 = vadd.f32 1.0, %v4965_v14 }
0x1e5d   :  { %v4967_v45 = vpop.eup %4966 }
0x1e5e   :  { %v3569_v31 = vadd.f32 1.0, %v4967_v45  ;;  %v3573_v6 = vmul.f32 %v3568_v41, %v3553_v21 }
0x1e60   :  { %v3574_v44 = vmul.f32 %v3569_v31, %v3554_v13 }
0x1e62   :  { %v3577_v48 = vpack.c.bf16 %v3574_v44, %v3573_v6 }
0x1e63   :  { %v4969_v11 = vpop.eup %4968 }
0x1e64   :  { %v3570_v43 = vadd.f32 1.0, %v4969_v11  ;;  %4694 = vmatmul.mubr.bf16.gmra.mrb[180].mxu1 %v3577_v48 }
0x1e65   :  { %4697 = vmatprep.mubr.msk.bf16.mxu1 %vm4986_vm0, %v4985_v0 }
0x1e66   :  { %v3575_v34 = vmul.f32 %v3570_v43, %v3555_v38 }
0x1e68   :  { %v3578_v46 = vpack.c.bf16 %v3575_v34, %v3575_v34 }
0x1e6c   :  { %4698 = vmatmul.mubr.bf16.gmra.mrb[184].mxu1 %v3578_v46 }
0x1f2d   :  { %v3678_v54 = vpop.f32.mrb[176].mxu1 }
0x1f2e   :  { %v3700_v59 = vadd.f32 %v3678_v54, %v6215_v29  ;;  %v4691_v28 = vpop.f32.mrb[177].mxu1 }
0x1f2f   :  { %v3681_v17 = vpop.f32.mrb[178].mxu1 }
0x1f30   :  { %v3713_v25 = vadd.f32 %v3984_v56, %v3700_v59  ;;  %v3701_v58 = vadd.f32 %v3681_v17, %v6218_v35  ;;  %v4692_v63 = vpop.f32.mrb[179].mxu1 }
0x1f32   :  { %v3714_v61 = vadd.f32 %v3984_v56, %v3701_v58  ;;  %v3720_v8 = vsel %vm180_vm2, %v3713_v25, 0.0 }
0x1f33   :  { %3721 = vadd.xlane.f32.xlu0 %v3720_v8 }
0x1f34   :  { %v3723_v0 = vsel %vm180_vm2, %v3714_v61, 0.0 }
0x1f35   :  { %3724 = vadd.xlane.f32.xlu1 %v3723_v0 }
0x1f37   :  { %v3686_v51 = vpop.f32.mrb[180].mxu1 }
0x1f38   :  { %v3702_v53 = vadd.f32 %v3686_v51, %v6227_v4  ;;  %v4695_v36 = vpop.f32.mrb[181].mxu1 }
0x1f39   :  { %v3689_v57 = vpop.f32.mrb[182].mxu1 }
0x1f3a   :  { %v3715_v7 = vadd.f32 %v3984_v56, %v3702_v53  ;;  %v3703_v29 = vadd.f32 %v3689_v57, %v6230_v19  ;;  %v4696_v15 = vpop.f32.mrb[183].mxu1 }
0x1f3c   :  { %v3716_v16 = vadd.f32 %v3984_v56, %v3703_v29  ;;  %v3726_v35 = vsel %vm180_vm2, %v3715_v7, 0.0 }
0x1f3d   :  { %3727 = vadd.xlane.f32.xlu0 %v3726_v35 }
0x1f3e   :  { %v3729_v5 = vsel %vm180_vm2, %v3716_v16, 0.0 }
0x1f3f   :  { %3730 = vadd.xlane.f32.xlu1 %v3729_v5  ;;  %v3694_v12 = vpop.f32.mrb[184].mxu1 }
0x1f40   :  { %v3704_v3 = vadd.f32 %v3694_v12, %v6238_v50  ;;  %v4699_v18 = vpop.f32.mrb[185].mxu1 }
0x1f41   :  { %v3697_v47 = vpop.f32.mrb[186].mxu1 }
0x1f42   :  { %v3717_v2 = vadd.f32 %v3984_v56, %v3704_v3  ;;  %v4700_v4 = vpop.f32.mrb[187].mxu1  ;;  %v3985_v56 = vld [vmem:[%s6370_s16] ss:$0 sm:$0xff] }
0x1f44   :  { %v3732_v9 = vsel %vm193_vm3, %v3717_v2, 0.0 }
0x1f45   :  { %3733 = vadd.xlane.f32.xlu0 %v3732_v9 }
0x1fc0   :  { %v3722_v32 = vpop.xlane.xlu0 %3721 }
0x1fc1   :  { %v3735_v19 = vmul.f32 0.03125, %v3722_v32 }
0x1fc2   :  { %v3725_v24 = vpop.xlane.xlu1 %3724 }
0x1fc3   :  { %v3740_v26 = vsub.f32 %v3713_v25, %v3735_v19  ;;  %v3736_v60 = vmul.f32 0.03125, %v3725_v24  ;;  %v3986_v25 = vld [vmem:[%s6371_s17] ss:$0 sm:$0xff] }
0x1fc5   :  { %v3741_v27 = vsub.f32 %v3714_v61, %v3736_v60  ;;  %v3745_v52 = vmul.f32 %v3740_v26, %v3740_v26 }
0x1fc7   :  { %v3750_v1 = vsel %vm180_vm2, %v3745_v52, 0.0  ;;  %v3746_v22 = vmul.f32 %v3741_v27, %v3741_v27 }
0x1fc8   :  { %3751 = vadd.xlane.f32.xlu1 %v3750_v1 }
0x1fc9   :  { %v3753_v50 = vsel %vm180_vm2, %v3746_v22, 0.0 }
0x1fca   :  { %v3728_v10 = vpop.xlane.xlu0 %3727  ;;  %3754 = vadd.xlane.f32.xlu0 %v3753_v50 }
0x1fcb   :  { %v3737_v55 = vmul.f32 0.03125, %v3728_v10 }
0x1fcc   :  { %v3731_v40 = vpop.xlane.xlu1 %3730 }
0x1fcd   :  { %v3742_v37 = vsub.f32 %v3715_v7, %v3737_v55  ;;  %v3738_v30 = vmul.f32 0.03125, %v3731_v40 }
0x1fcf   :  { %v3743_v62 = vsub.f32 %v3716_v16, %v3738_v30  ;;  %v3747_v33 = vmul.f32 %v3742_v37, %v3742_v37 }
0x1fd1   :  { %v3756_v20 = vsel %vm180_vm2, %v3747_v33, 0.0  ;;  %v3748_v49 = vmul.f32 %v3743_v62, %v3743_v62 }
0x1fd2   :  { %3757 = vadd.xlane.f32.xlu1 %v3756_v20  ;;  %v3734_v23 = vpop.xlane.xlu0 %3733 }
0x1fd3   :  { %v3739_v39 = vmul.f32 0.03125, %v3734_v23  ;;  %v3759_v42 = vsel %vm180_vm2, %v3748_v49, 0.0 }
0x1fd4   :  { %3760 = vadd.xlane.f32.xlu0 %v3759_v42 }
0x1fd5   :  { %v3744_v14 = vsub.f32 %v3717_v2, %v3739_v39 }
0x1fd7   :  { %v3749_v41 = vmul.f32 %v3744_v14, %v3744_v14 }
0x1fd9   :  { %v3762_v45 = vsel %vm193_vm3, %v3749_v41, 0.0 }
0x1fda   :  { %3763 = vadd.xlane.f32.xlu1 %v3762_v45 }
0x2055   :  { %v3752_v21 = vpop.xlane.xlu1 %3751 }
0x2056   :  { %v3765_v13 = vmul.f32 0.03125, %v3752_v21 }
0x2057   :  { %v3755_v31 = vpop.xlane.xlu0 %3754 }
0x2058   :  { %v3770_v6 = vadd.f32 1e-06, %v3765_v13  ;;  %v3766_v44 = vmul.f32 0.03125, %v3755_v31 }
0x205a   :  { %4970 = vrsqrt.f32 %v3770_v6  ;;  %v3771_v48 = vadd.f32 1e-06, %v3766_v44 }
0x205c   :  { %4972 = vrsqrt.f32 %v3771_v48 }
0x205f   :  { %v3758_v11 = vpop.xlane.xlu1 %3757 }
0x2060   :  { %v3767_v38 = vmul.f32 0.03125, %v3758_v11 }
0x2061   :  { %v3761_v43 = vpop.xlane.xlu0 %3760 }
0x2062   :  { %v3772_v34 = vadd.f32 1e-06, %v3767_v38  ;;  %v3768_v46 = vmul.f32 0.03125, %v3761_v43 }
0x2064   :  { %v4971_v54 = vpop.eup %4970  ;;  %4974 = vrsqrt.f32 %v3772_v34  ;;  %v3773_v59 = vadd.f32 1e-06, %v3768_v46 }
0x2065   :  { %v3780_v28 = vmul.f32 %v4971_v54, %v3740_v26 }
0x2066   :  { %v4973_v17 = vpop.eup %4972  ;;  %4976 = vrsqrt.f32 %v3773_v59 }
0x2067   :  { %v3791_v58 = vmul.f32 %v3985_v56, %v3780_v28  ;;  %v3781_v63 = vmul.f32 %v4973_v17, %v3741_v27  ;;  %v3764_v61 = vpop.xlane.xlu1 %3763 }
0x2068   :  { %v3769_v8 = vmul.f32 0.03125, %v3764_v61 }
0x2069   :  { %v3802_v0 = vadd.f32 %v3986_v25, %v3791_v58  ;;  %v3792_v51 = vmul.f32 %v3985_v56, %v3781_v63 }
0x206a   :  { %v3774_v53 = vadd.f32 1e-06, %v3769_v8 }
0x206b   :  { %3807 = vst.msk [vmem:[%s6372_s18] sm:$0xff] %vm180_vm2, %v3802_v0  ;;  %v3803_v36 = vadd.f32 %v3986_v25, %v3792_v51 }
0x206c   :  { %4978 = vrsqrt.f32 %v3774_v53 }
0x206d   :  { %3808 = vst.msk [vmem:[%s6372_s18 + $0x8] sm:$0xff] %vm180_vm2, %v3803_v36 }
0x206e   :  { %v4975_v57 = vpop.eup %4974 }
0x206f   :  { %v3782_v7 = vmul.f32 %v4975_v57, %v3742_v37 }
0x2070   :  { %v4977_v29 = vpop.eup %4976 }
0x2071   :  { %v3793_v15 = vmul.f32 %v3985_v56, %v3782_v7  ;;  %v3783_v16 = vmul.f32 %v4977_v29, %v3743_v62 }
0x2073   :  { %v3804_v35 = vadd.f32 %v3986_v25, %v3793_v15  ;;  %v3794_v5 = vmul.f32 %v3985_v56, %v3783_v16 }
0x2075   :  { %3809 = vst.msk [vmem:[%s6372_s18 + $0x10] sm:$0xff] %vm180_vm2, %v3804_v35  ;;  %v3805_v12 = vadd.f32 %v3986_v25, %v3794_v5 }
0x2076   :  { %v4979_v3 = vpop.eup %4978 }
0x2077   :  { %3810 = vst.msk [vmem:[%s6372_s18 + $0x18] sm:$0xff] %vm180_vm2, %v3805_v12  ;;  %v3784_v18 = vmul.f32 %v4979_v3, %v3744_v14 }
0x2079   :  { %v3795_v47 = vmul.f32 %v3985_v56, %v3784_v18 }
0x207b   :  { %v3806_v2 = vadd.f32 %v3986_v25, %v3795_v47 }
0x207d   :  { %3811 = vst.msk [vmem:[%s6372_s18 + $0x20] sm:$0x3] %vm193_vm3, %v3806_v2 }

</bundles_post_ra>
